<compile_context>
chip_gen: v7x
topology: tpu7x:2x2x1
jax: 0.10.0
libtpu: 0.0.40
codegen_flags: <defaults>
</compile_context>

<pallas_src>
import functools

import jax
import jax.numpy as jnp
from jax import lax
from jax.experimental import pallas as pl
from jax.experimental.pallas import tpu as pltpu


# ---------------------------------------------------------------------------
# Fused kernel: relu(bn1) -> conv1(1x1) -> relu(bn2) -> conv2(3x3, stride) ->
#               relu(bn3) -> conv3(1x1) -> + shortcut
# Grid is over the batch dimension; each step owns one (H, W, C) image.
# ---------------------------------------------------------------------------
def _fused_kernel(H, W, P, stride, has_shortcut, *refs):
    if has_shortcut:
        (x_ref, s1_ref, b1_ref, w1_ref, b2_ref, w2r_ref, b3_ref, w3_ref,
         wsc_ref, out_ref, u_ref, acc_ref) = refs
    else:
        (x_ref, s1_ref, b1_ref, w1_ref, b2_ref, w2r_ref, b3_ref, w3_ref,
         out_ref, u_ref, acc_ref) = refs

    Ho = (H - 1) // stride + 1
    Wo = (W - 1) // stride + 1

    # ---- stage 1: relu(bn1(x)); conv1 (1x1) + bn2 + relu; shortcut ---------
    x = x_ref[0]                                            # (H, W, Cin) f32
    a = jnp.maximum(x * s1_ref[0] + b1_ref[0], 0.0)         # relu(bn1(x)) f32
    a2 = a.reshape(H * W, -1).astype(jnp.bfloat16)          # MXU operand

    # conv1 (bn2 scale pre-folded into w1); shift + relu in f32.
    t = jnp.dot(a2, w1_ref[...], preferred_element_type=jnp.float32)
    u = jnp.maximum(t + b2_ref[0], 0.0)                     # (H*W, P) f32

    # Shortcut goes straight into the output block (residual accumulator) so
    # it does not stay live across the conv2 tap loop.
    if has_shortcut:
        if stride == 1:
            sc = jnp.dot(a2, wsc_ref[...], preferred_element_type=jnp.float32)
        else:
            xs = x_ref[0, pl.ds(0, Ho, stride=stride),
                       pl.ds(0, Wo, stride=stride), :]
            a_s = jnp.maximum(xs * s1_ref[0] + b1_ref[0], 0.0)
            sc = jnp.dot(a_s.reshape(Ho * Wo, -1).astype(jnp.bfloat16),
                         wsc_ref[...], preferred_element_type=jnp.float32)
        out_ref[0] = sc.reshape(Ho, Wo, -1)
    else:
        out_ref[0] = x      # identity shortcut (stride == 1, Cin == Cout)

    # ---- stash u in the zero-padded VMEM scratch (3x3 conv, padding=1) -----
    u_ref[...] = jnp.zeros_like(u_ref)        # (re)zero the 1-pixel border
    u_ref[1:H + 1, 1:W + 1, :] = u.reshape(H, W, P)

    # ---- conv2 (3x3, bn3 scale pre-folded into w2) --------------------------
    if stride == 1:
        # One contiguous row-slab read per dy tap; the 3 dx shifts are fused
        # into a single (H*W, 3P) x (3P, P) MXU matmul (deeper contraction).
        for dy in range(3):
            slab = u_ref[dy:dy + H, :, :].astype(jnp.bfloat16)  # (H, W+2, P)
            im2col = jnp.concatenate(
                [slab[:, 0:W, :], slab[:, 1:W + 1, :], slab[:, 2:W + 2, :]],
                axis=-1).reshape(H * W, 3 * P)                   # (H*W, 3P)
            contrib = jnp.dot(im2col, w2r_ref[dy],
                              preferred_element_type=jnp.float32)
            if dy == 0:
                acc_ref[...] = contrib
            else:
                acc_ref[...] += contrib
    else:
        # Strided block: gather only the strided output rows/cols per tap so
        # no wasted MXU work / stores (output is computed directly at stride).
        for dy in range(3):
            for dx in range(3):
                patch = u_ref[pl.ds(dy, Ho, stride=stride),
                              pl.ds(dx, Wo, stride=stride), :]
                contrib = jnp.dot(
                    patch.reshape(Ho * Wo, P).astype(jnp.bfloat16),
                    w2r_ref[dy, dx * P:(dx + 1) * P, :],
                    preferred_element_type=jnp.float32)
                if dy == 0 and dx == 0:
                    acc_ref[...] = contrib
                else:
                    acc_ref[...] += contrib

    # ---- bn3 shift + relu, conv3 (1x1), residual add ------------------------
    v = jnp.maximum(acc_ref[...] + b3_ref[0], 0.0).astype(jnp.bfloat16)
    o = jnp.dot(v, w3_ref[...], preferred_element_type=jnp.float32)
    out_ref[0] += o.reshape(Ho, Wo, -1)


# ---------------------------------------------------------------------------
# Wrapper
# ---------------------------------------------------------------------------
def preact_bottleneck_forward(x, params, *, stride=1):
    """x: (N, H, W, Cin) float32, NHWC."""
    N, H, W, Cin = x.shape
    w1, w2, w3 = params["w1"], params["w2"], params["w3"]
    P = w1.shape[1]
    Cout = w3.shape[1]
    has_shortcut = (stride != 1) or (Cin != Cout)
    Ho = (H - 1) // stride + 1
    Wo = (W - 1) // stride + 1

    # Fold bn2/bn3 scales into the conv1/conv2 weights (in f32), then cast the
    # MXU operands to bf16 once here (also halves weight HBM/VMEM traffic).
    w1_eff = (w1 * params["s2"]).astype(jnp.bfloat16)                # (Cin, P)
    w2_eff = (w2 * params["s3"][0]).reshape(3, 3 * P, P).astype(jnp.bfloat16)
    w3_bf = w3.astype(jnp.bfloat16)                                  # (P, Cout)

    def const_spec(shape):
        zeros = (0,) * len(shape)
        return pl.BlockSpec(shape, lambda n: zeros)

    in_arrays = [x, params["s1"], params["b1"], w1_eff, params["b2"],
                 w2_eff, params["b3"], w3_bf]
    in_specs = [
        pl.BlockSpec((1, H, W, Cin), lambda n: (n, 0, 0, 0)),
        const_spec((1, Cin)), const_spec((1, Cin)),
        const_spec((Cin, P)), const_spec((1, P)),
        const_spec((3, 3 * P, P)), const_spec((1, P)),
        const_spec((P, Cout)),
    ]
    if has_shortcut:
        in_arrays.append(params["wsc"].astype(jnp.bfloat16))
        in_specs.append(const_spec((Cin, Cout)))

    kernel = functools.partial(_fused_kernel, H, W, P, stride, has_shortcut)
    return pl.pallas_call(
        kernel,
        grid=(N,),
        in_specs=in_specs,
        out_specs=pl.BlockSpec((1, Ho, Wo, Cout), lambda n: (n, 0, 0, 0)),
        out_shape=jax.ShapeDtypeStruct((N, Ho, Wo, Cout), jnp.float32),
        scratch_shapes=[
            pltpu.VMEM((H + 2, W + 2, P), jnp.float32),   # zero-padded u
            pltpu.VMEM((Ho * Wo, P), jnp.float32),        # conv2 accumulator
        ],
        compiler_params=pltpu.CompilerParams(
            dimension_semantics=("parallel",),
            vmem_limit_bytes=64 * 1024 * 1024),
    )(*in_arrays)


# ---------------------------------------------------------------------------
# Deterministic parameter init (BN folded to per-channel scale/shift)
# ---------------------------------------------------------------------------
def init_params(key, in_planes, planes, stride=1, expansion=4):
    cout = expansion * planes
    ks = jax.random.split(key, 7)

    def bn_affine(k, c):
        kg, kb, km, kv = jax.random.split(k, 4)
        gamma = 1.0 + 0.1 * jax.random.normal(kg, (c,), jnp.float32)
        beta = 0.1 * jax.random.normal(kb, (c,), jnp.float32)
        mean = 0.1 * jax.random.normal(km, (c,), jnp.float32)
        var = jnp.abs(1.0 + 0.1 * jax.random.normal(kv, (c,), jnp.float32))
        scale = gamma / jnp.sqrt(var + 1e-5)
        shift = beta - mean * scale
        return scale.reshape(1, c), shift.reshape(1, c)

    def conv_w(k, shape, fan_in):
        return jax.random.normal(k, shape, jnp.float32) / jnp.sqrt(float(fan_in))

    s1, b1 = bn_affine(ks[0], in_planes)
    s2, b2 = bn_affine(ks[1], planes)
    s3, b3 = bn_affine(ks[2], planes)
    params = dict(
        s1=s1, b1=b1, s2=s2, b2=b2, s3=s3, b3=b3,
        w1=conv_w(ks[3], (in_planes, planes), in_planes),
        w2=conv_w(ks[4], (3, 3, planes, planes), 9 * planes),
        w3=conv_w(ks[5], (planes, cout), planes),
    )
    if stride != 1 or in_planes != cout:
        params["wsc"] = conv_w(ks[6], (in_planes, cout), in_planes)
    return params


# ---------------------------------------------------------------------------
# Pure-JAX reference (same math, via lax.conv, all f32) for correctness check
# ---------------------------------------------------------------------------
def ref_forward(x, params, *, stride=1):
    dn = ("NHWC", "HWIO", "NHWC")
    Cout = params["w3"].shape[1]
    a = jnp.maximum(x * params["s1"][0] + params["b1"][0], 0.0)
    if stride != 1 or x.shape[-1] != Cout:
        sc = lax.conv_general_dilated(a, params["wsc"][None, None],
                                      (stride, stride), "VALID",
                                      dimension_numbers=dn)
    else:
        sc = x
    t = lax.conv_general_dilated(a, params["w1"][None, None], (1, 1), "VALID",
                                 dimension_numbers=dn)
    u = jnp.maximum(t * params["s2"][0] + params["b2"][0], 0.0)
    c2 = lax.conv_general_dilated(u, params["w2"], (stride, stride),
                                  [(1, 1), (1, 1)], dimension_numbers=dn)
    v = jnp.maximum(c2 * params["s3"][0] + params["b3"][0], 0.0)
    o = lax.conv_general_dilated(v, params["w3"][None, None], (1, 1), "VALID",
                                 dimension_numbers=dn)
    return o + sc


if __name__ == "__main__":
    key = jax.random.PRNGKey(0)
    N, H, W = 2, 16, 16
    # Lane-dense output channels (Cout = 4*planes = 128), per perf review.
    configs = [
        (64, 32, 1),    # in_planes != 4*planes  -> 1x1 conv shortcut
        (128, 32, 1),   # in_planes == 4*planes  -> identity shortcut
    ]
    for i, (in_planes, planes, stride) in enumerate(configs):
        kx, kp = jax.random.split(jax.random.fold_in(key, i))
        x = jax.random.normal(kx, (N, H, W, in_planes), jnp.float32)  # NHWC
        params = init_params(kp, in_planes, planes, stride)

        out = jax.block_until_ready(
            preact_bottleneck_forward(x, params, stride=stride))
        ref = ref_forward(x, params, stride=stride)

        assert out.shape == ref.shape, (out.shape, ref.shape)
        # bf16 MXU inputs vs an all-f32 reference -> loose tolerance.
        max_err = float(jnp.max(jnp.abs(out - ref)))
        assert jnp.allclose(out, ref, atol=5e-2, rtol=5e-2), max_err

    print("KERNEL_OK")
</pallas_src>

<mosaic_0001>
module attributes {stable_mosaic.version = 11 : i64} {
  func.func @_fused_kernel(%arg0: i32, %arg1: memref<1x16x16x64xf32, #tpu.memory_space<vmem>>, %arg2: memref<1x64xf32, #tpu.memory_space<vmem>>, %arg3: memref<1x64xf32, #tpu.memory_space<vmem>>, %arg4: memref<64x32xbf16, #tpu.memory_space<vmem>>, %arg5: memref<1x32xf32, #tpu.memory_space<vmem>>, %arg6: memref<3x96x32xbf16, #tpu.memory_space<vmem>>, %arg7: memref<1x32xf32, #tpu.memory_space<vmem>>, %arg8: memref<32x128xbf16, #tpu.memory_space<vmem>>, %arg9: memref<64x128xbf16, #tpu.memory_space<vmem>>, %arg10: memref<1x16x16x128xf32, #tpu.memory_space<vmem>>, %arg11: memref<18x18x32xf32, #tpu.memory_space<vmem>>, %arg12: memref<256x32xf32, #tpu.memory_space<vmem>>) attributes {dimension_semantics = [#tpu.dimension_semantics<parallel>], iteration_bounds = array<i64: 2>, scalar_prefetch = 0 : i64, scratch_operands = 2 : i64, tpu.core_type = #tpu.core_type<tc>, window_params = [{transform_indices = @transform_0, window_bounds = array<i64: 1, 16, 16, 64>}, {pipeline_mode = #tpu.pipeline_mode<synchronous>, transform_indices = @transform_1, window_bounds = array<i64: 1, 64>}, {pipeline_mode = #tpu.pipeline_mode<synchronous>, transform_indices = @transform_2, window_bounds = array<i64: 1, 64>}, {pipeline_mode = #tpu.pipeline_mode<synchronous>, transform_indices = @transform_3, window_bounds = array<i64: 64, 32>}, {pipeline_mode = #tpu.pipeline_mode<synchronous>, transform_indices = @transform_4, window_bounds = array<i64: 1, 32>}, {pipeline_mode = #tpu.pipeline_mode<synchronous>, transform_indices = @transform_5, window_bounds = array<i64: 3, 96, 32>}, {pipeline_mode = #tpu.pipeline_mode<synchronous>, transform_indices = @transform_6, window_bounds = array<i64: 1, 32>}, {pipeline_mode = #tpu.pipeline_mode<synchronous>, transform_indices = @transform_7, window_bounds = array<i64: 32, 128>}, {pipeline_mode = #tpu.pipeline_mode<synchronous>, transform_indices = @transform_8, window_bounds = array<i64: 64, 128>}, {transform_indices = @transform_9, window_bounds = array<i64: 1, 16, 16, 128>}]} {
    %c0 = arith.constant 0 : index
    %c0_0 = arith.constant 0 : index
    %c0_1 = arith.constant 0 : index
    %c0_2 = arith.constant 0 : index
    %0 = vector.load %arg1[%c0, %c0_0, %c0_1, %c0_2] : memref<1x16x16x64xf32, #tpu.memory_space<vmem>>, vector<1x16x16x64xf32>
    %1 = vector.shape_cast %0 : vector<1x16x16x64xf32> to vector<16x16x64xf32>
    %c0_3 = arith.constant 0 : index
    %c0_4 = arith.constant 0 : index
    %2 = vector.load %arg2[%c0_3, %c0_4] : memref<1x64xf32, #tpu.memory_space<vmem>>, vector<1x64xf32>
    %3 = vector.shape_cast %2 : vector<1x64xf32> to vector<64xf32>
    %4 = vector.shape_cast %3 : vector<64xf32> to vector<1x1x64xf32>
    %5 = vector.broadcast %4 : vector<1x1x64xf32> to vector<16x16x64xf32>
    %6 = arith.mulf %1, %5 : vector<16x16x64xf32>
    %c0_5 = arith.constant 0 : index
    %c0_6 = arith.constant 0 : index
    %7 = vector.load %arg3[%c0_5, %c0_6] : memref<1x64xf32, #tpu.memory_space<vmem>>, vector<1x64xf32>
    %8 = vector.shape_cast %7 : vector<1x64xf32> to vector<64xf32>
    %9 = vector.shape_cast %8 : vector<64xf32> to vector<1x1x64xf32>
    %10 = vector.broadcast %9 : vector<1x1x64xf32> to vector<16x16x64xf32>
    %11 = arith.addf %6, %10 : vector<16x16x64xf32>
    %cst = arith.constant 0.000000e+00 : f32
    %12 = vector.broadcast %cst : f32 to vector<16x16x64xf32>
    %13 = arith.maximumf %11, %12 : vector<16x16x64xf32>
    %14 = vector.shape_cast %13 : vector<16x16x64xf32> to vector<256x64xf32>
    %15 = arith.truncf %14 : vector<256x64xf32> to vector<256x64xbf16>
    %c0_7 = arith.constant 0 : index
    %c0_8 = arith.constant 0 : index
    %16 = vector.load %arg4[%c0_7, %c0_8] : memref<64x32xbf16, #tpu.memory_space<vmem>>, vector<64x32xbf16>
    %cst_9 = arith.constant dense<0.000000e+00> : vector<256x32xf32>
    %17 = tpu.matmul %15, %16, %cst_9 {dimension_numbers = #tpu.dot_dimension_numbers<[1], [0], [0], [1], [0, 0, 1, 1], [], []>} : vector<256x64xbf16>, vector<64x32xbf16>, vector<256x32xf32> -> vector<256x32xf32>
    %c0_10 = arith.constant 0 : index
    %c0_11 = arith.constant 0 : index
    %18 = vector.load %arg5[%c0_10, %c0_11] : memref<1x32xf32, #tpu.memory_space<vmem>>, vector<1x32xf32>
    %19 = vector.shape_cast %18 : vector<1x32xf32> to vector<32xf32>
    %20 = vector.shape_cast %19 : vector<32xf32> to vector<1x32xf32>
    %21 = vector.broadcast %20 : vector<1x32xf32> to vector<256x32xf32>
    %22 = arith.addf %17, %21 : vector<256x32xf32>
    %cst_12 = arith.constant 0.000000e+00 : f32
    %23 = vector.broadcast %cst_12 : f32 to vector<256x32xf32>
    %24 = arith.maximumf %22, %23 : vector<256x32xf32>
    %c0_13 = arith.constant 0 : index
    %c0_14 = arith.constant 0 : index
    %25 = vector.load %arg9[%c0_13, %c0_14] : memref<64x128xbf16, #tpu.memory_space<vmem>>, vector<64x128xbf16>
    %cst_15 = arith.constant dense<0.000000e+00> : vector<256x128xf32>
    %26 = tpu.matmul %15, %25, %cst_15 {dimension_numbers = #tpu.dot_dimension_numbers<[1], [0], [0], [1], [0, 0, 1, 1], [], []>} : vector<256x64xbf16>, vector<64x128xbf16>, vector<256x128xf32> -> vector<256x128xf32>
    %27 = vector.shape_cast %26 : vector<256x128xf32> to vector<16x16x128xf32>
    %c0_16 = arith.constant 0 : index
    %c0_17 = arith.constant 0 : index
    %c0_18 = arith.constant 0 : index
    %c0_19 = arith.constant 0 : index
    %28 = vector.load %arg10[%c0_16, %c0_17, %c0_18, %c0_19] : memref<1x16x16x128xf32, #tpu.memory_space<vmem>>, vector<1x16x16x128xf32>
    %29 = vector.shape_cast %28 : vector<1x16x16x128xf32> to vector<16x16x128xf32>
    %30 = vector.shape_cast %27 : vector<16x16x128xf32> to vector<1x16x16x128xf32>
    tpu.vector_store %arg10[%c0_16, %c0_17, %c0_18, %c0_19], %30 {strides = array<i32>} : memref<1x16x16x128xf32, #tpu.memory_space<vmem>>, vector<1x16x16x128xf32>,
    %cst_20 = arith.constant 0.000000e+00 : f32
    %31 = vector.broadcast %cst_20 : f32 to vector<18x18x32xf32>
    %c0_21 = arith.constant 0 : index
    %c0_22 = arith.constant 0 : index
    %c0_23 = arith.constant 0 : index
    %32 = vector.load %arg11[%c0_21, %c0_22, %c0_23] : memref<18x18x32xf32, #tpu.memory_space<vmem>>, vector<18x18x32xf32>
    tpu.vector_store %arg11[%c0_21, %c0_22, %c0_23], %31 {strides = array<i32>} : memref<18x18x32xf32, #tpu.memory_space<vmem>>, vector<18x18x32xf32>,
    %33 = vector.shape_cast %24 : vector<256x32xf32> to vector<16x16x32xf32>
    %c1 = arith.constant 1 : index
    %c1_24 = arith.constant 1 : index
    %c0_25 = arith.constant 0 : index
    %34 = vector.load %arg11[%c1, %c1_24, %c0_25] : memref<18x18x32xf32, #tpu.memory_space<vmem>>, vector<16x16x32xf32>
    tpu.vector_store %arg11[%c1, %c1_24, %c0_25], %33 {strides = array<i32>} : memref<18x18x32xf32, #tpu.memory_space<vmem>>, vector<16x16x32xf32>,
    %c0_26 = arith.constant 0 : index
    %c0_27 = arith.constant 0 : index
    %c0_28 = arith.constant 0 : index
    %35 = vector.load %arg11[%c0_26, %c0_27, %c0_28] : memref<18x18x32xf32, #tpu.memory_space<vmem>>, vector<16x18x32xf32>
    %36 = arith.truncf %35 : vector<16x18x32xf32> to vector<16x18x32xbf16>
    %37 = vector.extract_strided_slice %36 {offsets = [0, 0, 0], sizes = [16, 16, 32], strides = [1, 1, 1]} : vector<16x18x32xbf16> to vector<16x16x32xbf16>
    %38 = vector.extract_strided_slice %36 {offsets = [0, 1, 0], sizes = [16, 16, 32], strides = [1, 1, 1]} : vector<16x18x32xbf16> to vector<16x16x32xbf16>
    %39 = vector.extract_strided_slice %36 {offsets = [0, 2, 0], sizes = [16, 16, 32], strides = [1, 1, 1]} : vector<16x18x32xbf16> to vector<16x16x32xbf16>
    %40 = tpu.concatenate %37, %38, %39 in 2 : vector<16x16x32xbf16>, vector<16x16x32xbf16>, vector<16x16x32xbf16> -> vector<16x16x96xbf16>
    %41 = vector.shape_cast %40 : vector<16x16x96xbf16> to vector<256x96xbf16>
    %c0_29 = arith.constant 0 : index
    %c0_30 = arith.constant 0 : index
    %c0_31 = arith.constant 0 : index
    %42 = vector.load %arg6[%c0_29, %c0_30, %c0_31] : memref<3x96x32xbf16, #tpu.memory_space<vmem>>, vector<1x96x32xbf16>
    %43 = vector.shape_cast %42 : vector<1x96x32xbf16> to vector<96x32xbf16>
    %cst_32 = arith.constant dense<0.000000e+00> : vector<256x32xf32>
    %44 = tpu.matmul %41, %43, %cst_32 {dimension_numbers = #tpu.dot_dimension_numbers<[1], [0], [0], [1], [0, 0, 1, 1], [], []>} : vector<256x96xbf16>, vector<96x32xbf16>, vector<256x32xf32> -> vector<256x32xf32>
    %c0_33 = arith.constant 0 : index
    %c0_34 = arith.constant 0 : index
    %45 = vector.load %arg12[%c0_33, %c0_34] : memref<256x32xf32, #tpu.memory_space<vmem>>, vector<256x32xf32>
    tpu.vector_store %arg12[%c0_33, %c0_34], %44 {strides = array<i32>} : memref<256x32xf32, #tpu.memory_space<vmem>>, vector<256x32xf32>,
    %c1_35 = arith.constant 1 : index
    %c0_36 = arith.constant 0 : index
    %c0_37 = arith.constant 0 : index
    %46 = vector.load %arg11[%c1_35, %c0_36, %c0_37] : memref<18x18x32xf32, #tpu.memory_space<vmem>>, vector<16x18x32xf32>
    %47 = arith.truncf %46 : vector<16x18x32xf32> to vector<16x18x32xbf16>
    %48 = vector.extract_strided_slice %47 {offsets = [0, 0, 0], sizes = [16, 16, 32], strides = [1, 1, 1]} : vector<16x18x32xbf16> to vector<16x16x32xbf16>
    %49 = vector.extract_strided_slice %47 {offsets = [0, 1, 0], sizes = [16, 16, 32], strides = [1, 1, 1]} : vector<16x18x32xbf16> to vector<16x16x32xbf16>
    %50 = vector.extract_strided_slice %47 {offsets = [0, 2, 0], sizes = [16, 16, 32], strides = [1, 1, 1]} : vector<16x18x32xbf16> to vector<16x16x32xbf16>
    %51 = tpu.concatenate %48, %49, %50 in 2 : vector<16x16x32xbf16>, vector<16x16x32xbf16>, vector<16x16x32xbf16> -> vector<16x16x96xbf16>
    %52 = vector.shape_cast %51 : vector<16x16x96xbf16> to vector<256x96xbf16>
    %c1_38 = arith.constant 1 : index
    %c0_39 = arith.constant 0 : index
    %c0_40 = arith.constant 0 : index
    %53 = vector.load %arg6[%c1_38, %c0_39, %c0_40] : memref<3x96x32xbf16, #tpu.memory_space<vmem>>, vector<1x96x32xbf16>
    %54 = vector.shape_cast %53 : vector<1x96x32xbf16> to vector<96x32xbf16>
    %cst_41 = arith.constant dense<0.000000e+00> : vector<256x32xf32>
    %55 = tpu.matmul %52, %54, %cst_41 {dimension_numbers = #tpu.dot_dimension_numbers<[1], [0], [0], [1], [0, 0, 1, 1], [], []>} : vector<256x96xbf16>, vector<96x32xbf16>, vector<256x32xf32> -> vector<256x32xf32>
    %c0_42 = arith.constant 0 : index
    %c0_43 = arith.constant 0 : index
    %56 = vector.load %arg12[%c0_42, %c0_43] : memref<256x32xf32, #tpu.memory_space<vmem>>, vector<256x32xf32>
    %57 = arith.addf %56, %55 : vector<256x32xf32>
    %c0_44 = arith.constant 0 : index
    %c0_45 = arith.constant 0 : index
    %58 = vector.load %arg12[%c0_44, %c0_45] : memref<256x32xf32, #tpu.memory_space<vmem>>, vector<256x32xf32>
    tpu.vector_store %arg12[%c0_44, %c0_45], %57 {strides = array<i32>} : memref<256x32xf32, #tpu.memory_space<vmem>>, vector<256x32xf32>,
    %c2 = arith.constant 2 : index
    %c0_46 = arith.constant 0 : index
    %c0_47 = arith.constant 0 : index
    %59 = vector.load %arg11[%c2, %c0_46, %c0_47] : memref<18x18x32xf32, #tpu.memory_space<vmem>>, vector<16x18x32xf32>
    %60 = arith.truncf %59 : vector<16x18x32xf32> to vector<16x18x32xbf16>
    %61 = vector.extract_strided_slice %60 {offsets = [0, 0, 0], sizes = [16, 16, 32], strides = [1, 1, 1]} : vector<16x18x32xbf16> to vector<16x16x32xbf16>
    %62 = vector.extract_strided_slice %60 {offsets = [0, 1, 0], sizes = [16, 16, 32], strides = [1, 1, 1]} : vector<16x18x32xbf16> to vector<16x16x32xbf16>
    %63 = vector.extract_strided_slice %60 {offsets = [0, 2, 0], sizes = [16, 16, 32], strides = [1, 1, 1]} : vector<16x18x32xbf16> to vector<16x16x32xbf16>
    %64 = tpu.concatenate %61, %62, %63 in 2 : vector<16x16x32xbf16>, vector<16x16x32xbf16>, vector<16x16x32xbf16> -> vector<16x16x96xbf16>
    %65 = vector.shape_cast %64 : vector<16x16x96xbf16> to vector<256x96xbf16>
    %c2_48 = arith.constant 2 : index
    %c0_49 = arith.constant 0 : index
    %c0_50 = arith.constant 0 : index
    %66 = vector.load %arg6[%c2_48, %c0_49, %c0_50] : memref<3x96x32xbf16, #tpu.memory_space<vmem>>, vector<1x96x32xbf16>
    %67 = vector.shape_cast %66 : vector<1x96x32xbf16> to vector<96x32xbf16>
    %cst_51 = arith.constant dense<0.000000e+00> : vector<256x32xf32>
    %68 = tpu.matmul %65, %67, %cst_51 {dimension_numbers = #tpu.dot_dimension_numbers<[1], [0], [0], [1], [0, 0, 1, 1], [], []>} : vector<256x96xbf16>, vector<96x32xbf16>, vector<256x32xf32> -> vector<256x32xf32>
    %c0_52 = arith.constant 0 : index
    %c0_53 = arith.constant 0 : index
    %69 = vector.load %arg12[%c0_52, %c0_53] : memref<256x32xf32, #tpu.memory_space<vmem>>, vector<256x32xf32>
    %70 = arith.addf %69, %68 : vector<256x32xf32>
    %c0_54 = arith.constant 0 : index
    %c0_55 = arith.constant 0 : index
    %71 = vector.load %arg12[%c0_54, %c0_55] : memref<256x32xf32, #tpu.memory_space<vmem>>, vector<256x32xf32>
    tpu.vector_store %arg12[%c0_54, %c0_55], %70 {strides = array<i32>} : memref<256x32xf32, #tpu.memory_space<vmem>>, vector<256x32xf32>,
    %c0_56 = arith.constant 0 : index
    %c0_57 = arith.constant 0 : index
    %72 = vector.load %arg12[%c0_56, %c0_57] : memref<256x32xf32, #tpu.memory_space<vmem>>, vector<256x32xf32>
    %c0_58 = arith.constant 0 : index
    %c0_59 = arith.constant 0 : index
    %73 = vector.load %arg7[%c0_58, %c0_59] : memref<1x32xf32, #tpu.memory_space<vmem>>, vector<1x32xf32>
    %74 = vector.shape_cast %73 : vector<1x32xf32> to vector<32xf32>
    %75 = vector.shape_cast %74 : vector<32xf32> to vector<1x32xf32>
    %76 = vector.broadcast %75 : vector<1x32xf32> to vector<256x32xf32>
    %77 = arith.addf %72, %76 : vector<256x32xf32>
    %cst_60 = arith.constant 0.000000e+00 : f32
    %78 = vector.broadcast %cst_60 : f32 to vector<256x32xf32>
    %79 = arith.maximumf %77, %78 : vector<256x32xf32>
    %80 = arith.truncf %79 : vector<256x32xf32> to vector<256x32xbf16>
    %c0_61 = arith.constant 0 : index
    %c0_62 = arith.constant 0 : index
    %81 = vector.load %arg8[%c0_61, %c0_62] : memref<32x128xbf16, #tpu.memory_space<vmem>>, vector<32x128xbf16>
    %cst_63 = arith.constant dense<0.000000e+00> : vector<256x128xf32>
    %82 = tpu.matmul %80, %81, %cst_63 {dimension_numbers = #tpu.dot_dimension_numbers<[1], [0], [0], [1], [0, 0, 1, 1], [], []>} : vector<256x32xbf16>, vector<32x128xbf16>, vector<256x128xf32> -> vector<256x128xf32>
    %c0_64 = arith.constant 0 : index
    %c0_65 = arith.constant 0 : index
    %c0_66 = arith.constant 0 : index
    %c0_67 = arith.constant 0 : index
    %83 = vector.load %arg10[%c0_64, %c0_65, %c0_66, %c0_67] : memref<1x16x16x128xf32, #tpu.memory_space<vmem>>, vector<1x16x16x128xf32>
    %84 = vector.shape_cast %83 : vector<1x16x16x128xf32> to vector<16x16x128xf32>
    %85 = vector.shape_cast %82 : vector<256x128xf32> to vector<16x16x128xf32>
    %86 = arith.addf %84, %85 : vector<16x16x128xf32>
    %c0_68 = arith.constant 0 : index
    %c0_69 = arith.constant 0 : index
    %c0_70 = arith.constant 0 : index
    %c0_71 = arith.constant 0 : index
    %87 = vector.load %arg10[%c0_68, %c0_69, %c0_70, %c0_71] : memref<1x16x16x128xf32, #tpu.memory_space<vmem>>, vector<1x16x16x128xf32>
    %88 = vector.shape_cast %87 : vector<1x16x16x128xf32> to vector<16x16x128xf32>
    %89 = vector.shape_cast %86 : vector<16x16x128xf32> to vector<1x16x16x128xf32>
    tpu.vector_store %arg10[%c0_68, %c0_69, %c0_70, %c0_71], %89 {strides = array<i32>} : memref<1x16x16x128xf32, #tpu.memory_space<vmem>>, vector<1x16x16x128xf32>,
    return
  }
  func.func @transform_0(%arg0: i32) -> (i32, i32, i32, i32) {
    %c0_i32 = arith.constant 0 : i32
    %c0_i32_0 = arith.constant 0 : i32
    %c0_i32_1 = arith.constant 0 : i32
    %c0_i32_2 = arith.constant 0 : i32
    return %arg0, %c0_i32, %c0_i32_0, %c0_i32_1 : i32, i32, i32, i32
  }
  func.func @transform_1(%arg0: i32) -> (i32, i32) {
    %c0_i32 = arith.constant 0 : i32
    %c0_i32_0 = arith.constant 0 : i32
    %c0_i32_1 = arith.constant 0 : i32
    return %c0_i32, %c0_i32_0 : i32, i32
  }
  func.func @transform_2(%arg0: i32) -> (i32, i32) {
    %c0_i32 = arith.constant 0 : i32
    %c0_i32_0 = arith.constant 0 : i32
    %c0_i32_1 = arith.constant 0 : i32
    return %c0_i32, %c0_i32_0 : i32, i32
  }
  func.func @transform_3(%arg0: i32) -> (i32, i32) {
    %c0_i32 = arith.constant 0 : i32
    %c0_i32_0 = arith.constant 0 : i32
    %c0_i32_1 = arith.constant 0 : i32
    return %c0_i32, %c0_i32_0 : i32, i32
  }
  func.func @transform_4(%arg0: i32) -> (i32, i32) {
    %c0_i32 = arith.constant 0 : i32
    %c0_i32_0 = arith.constant 0 : i32
    %c0_i32_1 = arith.constant 0 : i32
    return %c0_i32, %c0_i32_0 : i32, i32
  }
  func.func @transform_5(%arg0: i32) -> (i32, i32, i32) {
    %c0_i32 = arith.constant 0 : i32
    %c0_i32_0 = arith.constant 0 : i32
    %c0_i32_1 = arith.constant 0 : i32
    %c0_i32_2 = arith.constant 0 : i32
    return %c0_i32, %c0_i32_0, %c0_i32_1 : i32, i32, i32
  }
  func.func @transform_6(%arg0: i32) -> (i32, i32) {
    %c0_i32 = arith.constant 0 : i32
    %c0_i32_0 = arith.constant 0 : i32
    %c0_i32_1 = arith.constant 0 : i32
    return %c0_i32, %c0_i32_0 : i32, i32
  }
  func.func @transform_7(%arg0: i32) -> (i32, i32) {
    %c0_i32 = arith.constant 0 : i32
    %c0_i32_0 = arith.constant 0 : i32
    %c0_i32_1 = arith.constant 0 : i32
    return %c0_i32, %c0_i32_0 : i32, i32
  }
  func.func @transform_8(%arg0: i32) -> (i32, i32) {
    %c0_i32 = arith.constant 0 : i32
    %c0_i32_0 = arith.constant 0 : i32
    %c0_i32_1 = arith.constant 0 : i32
    return %c0_i32, %c0_i32_0 : i32, i32
  }
  func.func @transform_9(%arg0: i32) -> (i32, i32, i32, i32) {
    %c0_i32 = arith.constant 0 : i32
    %c0_i32_0 = arith.constant 0 : i32
    %c0_i32_1 = arith.constant 0 : i32
    %c0_i32_2 = arith.constant 0 : i32
    return %arg0, %c0_i32, %c0_i32_0, %c0_i32_1 : i32, i32, i32, i32
  }
}

</mosaic_0001>

<bundles_post_ra>
// kernel: tpu_custom_call.1
= control target key start
LH: loop header
LB: loop body
LE: loop exit
PB: predicated region body
PF: predicated region fallthrough
CT: control target
= control target key end

     0   :  { %s7056_s0 = inlined_call_operand.hbm [shape: f32[2,16,16,64], index: 0, kind: input, shape index: {}]   ;;  %s7057_s1 = inlined_call_operand.hbm [shape: f32[1,64], index: 1, kind: input, shape index: {}]   ;;  %s7058_s2 = inlined_call_operand.hbm [shape: f32[1,64], index: 2, kind: input, shape index: {}]   ;;  %s7059_s3 = inlined_call_operand.hbm [shape: bf16[64,32], index: 3, kind: input, shape index: {}]   ;;  %s7060_s4 = inlined_call_operand.hbm [shape: f32[1,32], index: 4, kind: input, shape index: {}]   ;;  %s7061_s5 = inlined_call_operand.hbm [shape: bf16[3,96,32], index: 5, kind: input, shape index: {}]   ;;  %s7062_s6 = inlined_call_operand.hbm [shape: f32[1,32], index: 6, kind: input, shape index: {}]   ;;  %s7063_s7 = inlined_call_operand.hbm [shape: bf16[32,128], index: 7, kind: input, shape index: {}]   ;;  %s7064_s8 = inlined_call_operand.hbm [shape: bf16[64,128], index: 8, kind: input, shape index: {}]   ;;  %s7065_s9 = inlined_call_operand.hbm [shape: f32[2,16,16,128], index: 9, kind: output, shape index: {}]  }
   0x1   :  { %7069 = sst [smem:[#allocation26_spill]] %s7057_s1 }
   0x2   :  { %7070 = sst [smem:[#allocation27_spill]] %s7059_s3 }
   0x3   :  { %14 = vsyncpa [#allocation5], 0 }
   0x4   :  { %16 = vsyncpa [#allocation5 + $0x1], 0 }
   0x5   :  { %17 = vsyncpa [#allocation8], 0 }
   0x6   :  { %18 = vsyncpa [#allocation11], 0 }
   0x7   :  { %19 = vsyncpa [#allocation14], 0 }
   0x8   :  { %20 = vsyncpa [#allocation17], 0 }
   0x9   :  { %21 = vsyncpa [#allocation6], 0 }
   0xa   :  { %23 = vsyncpa [#allocation6 + $0x1], 0  ;;  %s5344_s30 = smov 0   ;;  %s5346_s10 = smov 0  }
   0xb   :  { %s5348_s11 = smov 0   ;;  %s5350_s12 = smov 0  }
   0xc LB: > { %s5275_s13 = smov [#allocation7]   ;;  %s5365_s15 = sadd.s32 4294967295, %s5273_s12   ;;  %s5273_s12 = sphi %s5350_s12, %s7097_s12   ;;  %s5269_s11 = sphi %s5348_s11, %s7096_s11   ;;  %s5265_s10 = sphi %s5346_s10, %s7095_s10   ;;  %s5261_s30 = sphi %s5344_s30, %s7094_s30  }
   0xd   : > { %s267_s14 = sshll.u32 %s5275_s13, 4  ;;  %p4210_p0 = scmp.ge.s32.totalorder %s5273_s12, 1  ;;  %s5370_s14 = int_to_ptr.vmem [resolvable:$true] %s267_s14 }
   0xe   : > { %p7066_p1 = scmp.eq.s32.totalorder %s5365_s15, 0  ;;  %p254_p2 = scmp.lt.s32.totalorder %s5273_s12, 3 }
   0xf   : > { %s5276_s17 = smov [#allocation10]   ;;  %s5277_s20 = smov [#allocation13]  }
  0x10   : > { %p5372_p3 = pnand %p4210_p0, %p254_p2  ;;  %s288_s18 = sshll.u32 %s5276_s17, 4  ;;  %s5379_s18 = int_to_ptr.vmem [resolvable:$true] %s288_s18 }
  0x11   : > { %s312_s21 = sshll.u32 %s5277_s20, 4  ;;  %s7073_s1 = sld [smem:[#allocation26_spill]]  ;;  %s5387_s21 = int_to_ptr.vmem [resolvable:$true] %s312_s21 }
  0x12   : > { %s7071_s16 = scalar_select %p5372_p3, 1, 0 }
  0x13   : > { %p4809_p5 = pneg %p5372_p3 }
  0x15   : > { %p5383_p6 = pnand %p4809_p5, %p7066_p1 }
  0x17   : > { %s4937_s24 = scalar_lea.hbm %s7073_s1, 16  ;;  %p5397_p8 = pneg %p5383_p6 }
  0x18   : > { %p4938_p7 = scmp.ne.s32.totalorder %s7073_s1, %s4937_s24  ;;  %p4944_p11 = scmp.lt.u32.totalorder %s4937_s24, %s7073_s1 }
  0x1a   : > { %p4940_p9 = pnand %p5397_p8, %p4938_p7 }
  0x1c   : > { %p4941_p10 = pneg %p4940_p9 }
  0x1e   : > { %p4946_p12 = pnand %p4944_p11, %p4941_p10 }
  0x20   : > { %4949 = shalt.err (!%p4946_p12)
}
  0x21   : > { %s4950_s13 = scalar_lea.vmem %s5370_s14, 16  ;;  %s4957_s17 = scalar_lea.vmem %s5370_s14, 32 }
  0x22   : > { %p4951_p13 = scmp.ne.s32.totalorder %s5370_s14, %s4950_s13  ;;  %p4958_p5 = scmp.lt.s32.totalorder %s5370_s14, %s5370_s14 }
  0x23   : > { %p4959_p7 = scmp.lt.s32.totalorder %s4957_s17, %s4950_s13 }
  0x24   : > { %p4953_p0 = pnand %p4951_p13, %p5397_p8 }
  0x25   : > { %p4960_p9 = por %p4959_p7, %p4958_p5 }
  0x26   : > { %p4954_p2 = pneg %p4953_p0 }
  0x28   : > { %p4961_p4 = pnand %p4960_p9, %p4954_p2 }
  0x2a   : > { %4964 = shalt.err (!%p4961_p4)
}
  0x2b   : > { %4812 = dma.hbm_to_vmem [thread:$0]  (!%p5383_p6), %s7073_s1, 16, %s5370_s14, [#allocation8]  }
  0x2c   : > { %s7075_s3 = sld [smem:[#allocation27_spill]] }
  0x32   : > { %s4965_s25 = scalar_lea.hbm %s7075_s3, 512 }
  0x33   : > { %p4966_p10 = scmp.ne.s32.totalorder %s7075_s3, %s4965_s25  ;;  %p4972_p4 = scmp.lt.u32.totalorder %s4965_s25, %s7075_s3 }
  0x35   : > { %p4968_p11 = pnand %p4966_p10, %p5397_p8 }
  0x37   : > { %p4969_p12 = pneg %p4968_p11 }
  0x39   : > { %p4974_p13 = pnand %p4972_p4, %p4969_p12 }
  0x3b   : > { %4977 = shalt.err (!%p4974_p13)
}
  0x3c   : > { %s4978_s14 = scalar_lea.vmem %s5379_s18, 512  ;;  %p4986_p7 = scmp.lt.s32.totalorder %s5379_s18, %s5379_s18 }
  0x3d   : > { %p4979_p0 = scmp.ne.s32.totalorder %s5379_s18, %s4978_s14  ;;  %p4987_p9 = scmp.lt.s32.totalorder %s4978_s14, %s4978_s14 }
  0x3f   : > { %p4981_p2 = pnand %p4979_p0, %p5397_p8  ;;  %p4988_p10 = por %p4987_p9, %p4986_p7 }
  0x41   : > { %p4982_p5 = pneg %p4981_p2 }
  0x43   : > { %p4989_p11 = pnand %p4988_p10, %p4982_p5 }
  0x45   : > { %4992 = shalt.err (!%p4989_p11)
}
  0x46   : > { %s5278_s17 = smov 64   ;;  %s5279_s20 = smov 4  }
  0x47   : > { %4818 = dma.hbm_to_vmem [thread:$0]  (!%p5383_p6), %s7075_s3, 512, %s5379_s18, [#allocation11], %s5278_s17, %s5278_s17, %s5279_s20  }
  0x48   : > { %s4993_s26 = scalar_lea.hbm %s7061_s5, 2304 }
  0x49   : > { %p4994_p12 = scmp.ne.s32.totalorder %s7061_s5, %s4993_s26  ;;  %p5000_p0 = scmp.lt.u32.totalorder %s4993_s26, %s7061_s5 }
  0x4b   : > { %p4996_p4 = pnand %p4994_p12, %p5397_p8 }
  0x4d   : > { %p4997_p13 = pneg %p4996_p4 }
  0x4f   : > { %p5002_p2 = pnand %p5000_p0, %p4997_p13 }
  0x51   : > { %5005 = shalt.err (!%p5002_p2)
}
  0x52   : > { %s5006_s18 = scalar_lea.vmem %s5387_s21, 2304  ;;  %p5014_p10 = scmp.lt.s32.totalorder %s5387_s21, %s5387_s21 }
  0x53   : > { %p5007_p5 = scmp.ne.s32.totalorder %s5387_s21, %s5006_s18  ;;  %p5015_p11 = scmp.lt.s32.totalorder %s5006_s18, %s5006_s18 }
  0x55   : > { %p5009_p7 = pnand %p5007_p5, %p5397_p8  ;;  %p5016_p12 = por %p5015_p11, %p5014_p10 }
  0x57   : > { %p5010_p9 = pneg %p5009_p7 }
  0x59   : > { %p5017_p4 = pnand %p5016_p12, %p5010_p9 }
  0x5b   : > { %5020 = shalt.err (!%p5017_p4)
}
  0x5c   : > { %4824 = dma.hbm_to_vmem [thread:$0]  (!%p5383_p6), %s7061_s5, 2304, %s5387_s21, [#allocation14], %s5278_s17, %s5278_s17, %s5279_s20  }
  0x5d   : > { %s5280_s24 = smov [#allocation16]   ;;  %s5281_s26 = smov [#allocation9]  }
  0x5e   : > { %s336_s25 = sshll.u32 %s5280_s24, 4  ;;  %s278_s28 = sshll.u32 %s5281_s26, 4  ;;  %s337_s25 = int_to_ptr.vmem [resolvable:$true] %s336_s25  ;;  %s279_s28 = int_to_ptr.vmem [resolvable:$true] %s278_s28 }
  0x5f   : > { %s5021_s14 = scalar_lea.hbm %s7063_s7, 256 }
  0x60   : > { %p5022_p13 = scmp.ne.s32.totalorder %s7063_s7, %s5021_s14  ;;  %p5028_p5 = scmp.lt.u32.totalorder %s5021_s14, %s7063_s7 }
  0x62   : > { %p5024_p0 = pnand %p5022_p13, %p5397_p8 }
  0x64   : > { %p5025_p2 = pneg %p5024_p0 }
  0x66   : > { %p5030_p7 = pnand %p5028_p5, %p5025_p2 }
  0x68   : > { %5033 = shalt.err (!%p5030_p7)
}
  0x69   : > { %s5034_s21 = scalar_lea.vmem %s337_s25, 256  ;;  %p5042_p12 = scmp.lt.s32.totalorder %s337_s25, %s337_s25 }
  0x6a   : > { %p5035_p9 = scmp.ne.s32.totalorder %s337_s25, %s5034_s21  ;;  %p5043_p4 = scmp.lt.s32.totalorder %s5034_s21, %s5034_s21 }
  0x6c   : > { %p5037_p10 = pnand %p5035_p9, %p5397_p8  ;;  %p5044_p1 = por %p5043_p4, %p5042_p12 }
  0x6e   : > { %p5038_p11 = pneg %p5037_p10 }
  0x70   : > { %p5045_p3 = pnand %p5044_p1, %p5038_p11 }
  0x72   : > { %5048 = shalt.err (!%p5045_p3)
}
  0x73   : > { %4830 = dma.hbm_to_vmem [thread:$0]  (!%p5383_p6), %s7063_s7, 256, %s337_s25, [#allocation17], %s5278_s17, %s5278_s17, %s5279_s20  }
  0x74   : > { %s5049_s26 = scalar_lea.hbm %s7058_s2, 16 }
  0x75   : > { %p5050_p1 = scmp.ne.s32.totalorder %s7058_s2, %s5049_s26  ;;  %p5056_p0 = scmp.lt.u32.totalorder %s5049_s26, %s7058_s2 }
  0x77   : > { %p5052_p3 = pnand %p5050_p1, %p5397_p8 }
  0x79   : > { %p5053_p13 = pneg %p5052_p3 }
  0x7b   : > { %p5058_p2 = pnand %p5056_p0, %p5053_p13 }
  0x7d   : > { %5061 = shalt.err (!%p5058_p2)
}
  0x7e   : > { %s5062_s22 = scalar_lea.vmem %s279_s28, 16  ;;  %s5069_s25 = scalar_lea.vmem %s279_s28, 32 }
  0x7f   : > { %p5063_p5 = scmp.ne.s32.totalorder %s279_s28, %s5062_s22  ;;  %p5070_p10 = scmp.lt.s32.totalorder %s279_s28, %s279_s28 }
  0x80   : > { %p5071_p11 = scmp.lt.s32.totalorder %s5069_s25, %s5062_s22 }
  0x81   : > { %p5065_p7 = pnand %p5063_p5, %p5397_p8 }
  0x82   : > { %p5072_p12 = por %p5071_p11, %p5070_p10 }
  0x83   : > { %p5066_p9 = pneg %p5065_p7 }
  0x85   : > { %p5073_p4 = pnand %p5072_p12, %p5066_p9 }
  0x87   : > { %5076 = shalt.err (!%p5073_p4)
}
  0x88   : > { %4815 = dma.hbm_to_vmem [thread:$0]  (!%p5383_p6), %s7058_s2, 16, %s279_s28, [#allocation8]  }
  0x89   : > { %s5282_s3 = smov [#allocation12]   ;;  %s5283_s24 = smov [#allocation15]  }
  0x8a   : > { %s302_s23 = sshll.u32 %s5282_s3, 4  ;;  %s326_s26 = sshll.u32 %s5283_s24, 4  ;;  %s303_s23 = int_to_ptr.vmem [resolvable:$true] %s302_s23  ;;  %s327_s26 = int_to_ptr.vmem [resolvable:$true] %s326_s26 }
  0x8b   : > { %s5077_s14 = scalar_lea.hbm %s7060_s4, 16 }
  0x8c   : > { %p5078_p1 = scmp.ne.s32.totalorder %s7060_s4, %s5077_s14  ;;  %p5084_p0 = scmp.lt.u32.totalorder %s5077_s14, %s7060_s4 }
  0x8e   : > { %p5080_p3 = pnand %p5078_p1, %p5397_p8 }
  0x90   : > { %p5081_p13 = pneg %p5080_p3 }
  0x92   : > { %p5086_p2 = pnand %p5084_p0, %p5081_p13 }
  0x94   : > { %5089 = shalt.err (!%p5086_p2)
}
  0x95   : > { %s5090_s28 = scalar_lea.vmem %s303_s23, 16  ;;  %s5097_s1 = scalar_lea.vmem %s303_s23, 32 }
  0x96   : > { %p5091_p5 = scmp.ne.s32.totalorder %s303_s23, %s5090_s28  ;;  %p5098_p10 = scmp.lt.s32.totalorder %s303_s23, %s303_s23 }
  0x97   : > { %p5099_p11 = scmp.lt.s32.totalorder %s5097_s1, %s5090_s28 }
  0x98   : > { %p5093_p7 = pnand %p5091_p5, %p5397_p8 }
  0x99   : > { %p5100_p12 = por %p5099_p11, %p5098_p10 }
  0x9a   : > { %p5094_p9 = pneg %p5093_p7 }
  0x9c   : > { %p5101_p4 = pnand %p5100_p12, %p5094_p9 }
  0x9e   : > { %5104 = shalt.err (!%p5101_p4)
}
  0x9f   : > { %4821 = dma.hbm_to_vmem [thread:$0]  (!%p5383_p6), %s7060_s4, 16, %s303_s23, [#allocation11]  }
  0xa0   : > { %s5105_s14 = scalar_lea.hbm %s7062_s6, 16 }
  0xa1   : > { %p5106_p1 = scmp.ne.s32.totalorder %s7062_s6, %s5105_s14  ;;  %p5112_p0 = scmp.lt.u32.totalorder %s5105_s14, %s7062_s6 }
  0xa3   : > { %p5108_p3 = pnand %p5106_p1, %p5397_p8 }
  0xa5   : > { %p5109_p13 = pneg %p5108_p3 }
  0xa7   : > { %p5114_p2 = pnand %p5112_p0, %p5109_p13 }
  0xa9   : > { %5117 = shalt.err (!%p5114_p2)
}
  0xaa   : > { %s5118_s28 = scalar_lea.vmem %s327_s26, 16  ;;  %s5125_s23 = scalar_lea.vmem %s327_s26, 32 }
  0xab   : > { %p5119_p5 = scmp.ne.s32.totalorder %s327_s26, %s5118_s28  ;;  %p5126_p10 = scmp.lt.s32.totalorder %s327_s26, %s327_s26 }
  0xac   : > { %p5127_p11 = scmp.lt.s32.totalorder %s5125_s23, %s5118_s28 }
  0xad   : > { %p5121_p7 = pnand %p5119_p5, %p5397_p8 }
  0xae   : > { %p5128_p12 = por %p5127_p11, %p5126_p10 }
  0xaf   : > { %p5122_p9 = pneg %p5121_p7 }
  0xb1   : > { %p5129_p4 = pnand %p5128_p12, %p5122_p9 }
  0xb3   : > { %5132 = shalt.err (!%p5129_p4)
}
  0xb4   : > { %4827 = dma.hbm_to_vmem [thread:$0]  (!%p5383_p6), %s7062_s6, 16, %s327_s26, [#allocation14]  }
  0xb5   : > { %s5284_s24 = smov [#allocation18]   ;;  %s5133_s18 = scalar_lea.hbm %s7064_s8, 512 }
  0xb6   : > { %s349_s29 = sshll.u32 %s5284_s24, 4  ;;  %p5134_p1 = scmp.ne.s32.totalorder %s7064_s8, %s5133_s18  ;;  %s350_s29 = int_to_ptr.vmem [resolvable:$true] %s349_s29 }
  0xb7   : > { %p5140_p0 = scmp.lt.u32.totalorder %s5133_s18, %s7064_s8 }
  0xb8   : > { %p5136_p3 = pnand %p5134_p1, %p5397_p8 }
  0xba   : > { %p5137_p13 = pneg %p5136_p3 }
  0xbc   : > { %p5142_p2 = pnand %p5140_p0, %p5137_p13 }
  0xbe   : > { %5145 = shalt.err (!%p5142_p2)
}
  0xbf   : > { %s5146_s26 = scalar_lea.vmem %s350_s29, 512  ;;  %p5154_p10 = scmp.lt.s32.totalorder %s350_s29, %s350_s29 }
  0xc0   : > { %p5147_p5 = scmp.ne.s32.totalorder %s350_s29, %s5146_s26  ;;  %p5155_p11 = scmp.lt.s32.totalorder %s5146_s26, %s5146_s26 }
  0xc2   : > { %p5149_p7 = pnand %p5147_p5, %p5397_p8  ;;  %p5156_p12 = por %p5155_p11, %p5154_p10 }
  0xc4   : > { %p5150_p9 = pneg %p5149_p7 }
  0xc6   : > { %p5157_p4 = pnand %p5156_p12, %p5150_p9 }
  0xc8   : > { %5160 = shalt.err (!%p5157_p4)
}
  0xc9   : > { %4833 = dma.hbm_to_vmem [thread:$0]  (!%p5383_p6), %s7064_s8, 512, %s350_s29, [#allocation17], %s5278_s17, %s5278_s17, %s5279_s20  }
  0xca   : > { %s4209_s19 = sadd.s32 4294967294, %s5273_s12   ;;  %s5569_s27 = sadd.s32 1, %s5273_s12  }
  0xcb   : > { %s33_s3 = ssub.s32 %s5273_s12, %s5569_s27  ;;  %s36_s24 = sadd.s32 1, %s5269_s11 }
  0xcc   : > { %p34_p8 = scmp.eq.s32.totalorder %s33_s3, 0  ;;  %p43_p1 = scmp.ne.s32.totalorder %s5269_s11, %s5265_s10 }
  0xcd   : > { %p44_p3 = scmp.eq.s32.totalorder %s5273_s12, 0  ;;  %p49_p13 = scmp.ne.s32.totalorder %s5265_s10, %s5261_s30 }
  0xce   : > { %s5580_s13 = scalar_select %p34_p8, %s5269_s11, %s36_s24  }
  0xcf   : > { %p5582_p0 = por %p44_p3, %p43_p1  ;;  %p7077_p2 = scmp.eq.s32.totalorder %s5365_s15, 0 }
  0xd0   : > { %p241_p5 = scmp.eq.s32.totalorder %s5365_s15, 1  ;;  %p247_p7 = scmp.eq.s32.totalorder %s4209_s19, 1 }
  0xd1   : > { %p5588_p6 = por %p7077_p2, %p49_p13  ;;  %p4850_p9 = scmp.lt.s32.totalorder %s5273_s12, 2 }
  0xd2   : > { %s363_s20 = sand.u32 1, %s5269_s11   ;;  %p5595_p10 = por %p241_p5, %p43_p1 }
  0xd3   : > { %p5599_p11 = por %p247_p7, %p49_p13  ;;  %s4220_s22 = sshll.u32 %s363_s20, 8 }
  0xd4   : > { %s7079_s29 = scalar_select %p5595_p10, 1, 0 }
  0xd5   : > { %s7080_s18 = scalar_select %p5599_p11, 1, 0 }
  0xd6   : > { %s4367_s25 = sshll.u32 %s5273_s12, 12  ;;  %s367_s23 = scalar_lea.vmem [#allocation4], %s4220_s22 }
  0xd7   : > { %s5607_s26 = scalar_lea.hbm %s7056_s0, %s4367_s25  ;;  %s374_s1 = sshll.u32 %s367_s23, 4  ;;  %s5609_s1 = int_to_ptr.vmem [resolvable:$true] %s374_s1 }
  0xd8   : > { %p5613_p12 = pnand %p4850_p9, %p5582_p0  ;;  %s5617_s3 = scalar_lea.sflag [#allocation5], %s363_s20 }
  0xd9   : > { %s5161_s24 = scalar_lea.hbm %s5607_s26, 4096  ;;  %s5166_s14 = scalar_lea.hbm %s7056_s0, 8192 }
  0xda   : > { %p5162_p4 = scmp.ne.s32.totalorder %s5607_s26, %s5161_s24  ;;  %p5163_p8 = pneg %p5613_p12 }
  0xdb   : > { %p5167_p13 = scmp.lt.u32.totalorder %s5607_s26, %s7056_s0  ;;  %p5168_p0 = scmp.lt.u32.totalorder %s5166_s14, %s5161_s24 }
  0xdc   : > { %p5164_p1 = pnand %p5163_p8, %p5162_p4  ;;  %p5170_p5 = scmp.lt.u32.totalorder %s5161_s24, %s5607_s26 }
  0xdd   : > { %p5169_p2 = por %p5168_p0, %p5167_p13 }
  0xde   : > { %p5165_p3 = pneg %p5164_p1 }
  0xdf   : > { %p5171_p7 = por %p5170_p5, %p5169_p2 }
  0xe1   : > { %p5172_p9 = pnand %p5171_p7, %p5165_p3 }
  0xe3   : > { %5175 = shalt.err (!%p5172_p9)
}
  0xe4   : > { %s5176_s20 = scalar_lea.vmem %s5609_s1, 4096  ;;  %s5285_s23 = smov [#allocation4]  }
  0xe5   : > { %p5177_p4 = scmp.ne.s32.totalorder %s5609_s1, %s5176_s20  ;;  %s5181_s22 = sshll.u32 %s5285_s23, 4  ;;  %s5182_s22 = int_to_ptr.vmem [resolvable:$false] %s5181_s22 }
  0xe6   : > { %s5183_s25 = scalar_lea.vmem %s5182_s22, 8192  ;;  %p5184_p10 = scmp.lt.s32.totalorder %s5609_s1, %s5182_s22 }
  0xe7   : > { %p5179_p1 = pnand %p5177_p4, %p5163_p8  ;;  %p5185_p13 = scmp.lt.s32.totalorder %s5183_s25, %s5176_s20 }
  0xe9   : > { %p5180_p11 = pneg %p5179_p1  ;;  %p5186_p0 = por %p5185_p13, %p5184_p10 }
  0xeb   : > { %p5187_p2 = pnand %p5186_p0, %p5180_p11 }
  0xed   : > { %5190 = shalt.err (!%p5187_p2)
}
  0xee   : > { %s5286_s24 = smov 128   ;;  %s5287_s14 = smov 8  }
  0xef   : > { %4837 = dma.hbm_to_vmem [thread:$0]  (!%p5613_p12), %s5607_s26, 4096, %s5609_s1, %s5617_s3, %s5286_s24, %s5286_s24, %s5287_s14  }
  0xf0   : > { %p7082_p8 = scmp.ne.s32.totalorder %s7071_s16, 0 }
  0xf1   : > { %s5648_s21 = sand.u32 (!%p7082_p8), 1, %s5265_s10  }
  0xf2   : > { %386 = sbr.rel (%p7082_p8) target bundleno = 1275 (0x4fb), region = 56  ;;  %s4224_s28 = sshll.u32 (!%p7082_p8), %s5648_s21, 8 }
  0xf3   : > { %s389_s20 = scalar_lea.sflag (!%p7082_p8), [#allocation5], %s5648_s21  ;;  %s5654_s23 = scalar_lea.vmem (!%p7082_p8), [#allocation4], %s4224_s28 }
  0xf9   : > { %5236 = dma.done.wait (%p5588_p6), %s389_s20, 4096  }
  0xfa   : > { %5238 = vsyncadd (%p5588_p6), %s389_s20, 4294963200  ;;  %p7083_p10 = scmp.eq.s32.totalorder %s5365_s15, 0 }
  0xfc   : > { %5240 = dma.done.wait (%p7083_p10), [#allocation8], 32   ;;  %p7084_p11 = pmov %p7083_p10 }
  0xfd   : > { %p7085_p12 = pmov %p7083_p10 }
  0xfe   : > { %5242 = vsyncadd (%p7084_p11), [#allocation8], 4294967264 }
  0xff   : > { %5244 = dma.done.wait (%p7085_p12), [#allocation11], 528   ;;  %p7086_p3 = pmov %p7083_p10 }
 0x101   : > { %5246 = vsyncadd (%p7086_p3), [#allocation11], 4294966768  ;;  %p7087_p5 = pmov %p7086_p3 }
 0x102   : > { %p7088_p7 = pmov %p7086_p3 }
 0x103   : > { %5248 = dma.done.wait (%p7087_p5), [#allocation14], 2320  }
 0x104   : > { %5250 = vsyncadd (%p7088_p7), [#allocation14], 4294964976  ;;  %p7089_p6 = pmov %p7086_p3 }
 0x105   : > { %p7090_p9 = pmov %p7086_p3 }
 0x106   : > { %5252 = dma.done.wait (%p7089_p6), [#allocation17], 768  }
 0x107   : > { %5254 = vsyncadd (%p7090_p9), [#allocation17], 4294966528  ;;  %v4909_v0 = vld [vmem:[#allocation10] sm:$0xff]   ;;  %v4910_v1 = vld [vmem:[#allocation10 + $0x8] sm:$0xff]   ;;  %vm657_vm0 = vcmask 523264   ;;  %vm1124_vm1 = vcmask 261120  }
 0x108   : > { %4493 = vmatprep.subr.bf16.mxu0 %v4909_v0  ;;  %v4911_v2 = vld [vmem:[#allocation10 + $0x10] sm:$0xff]   ;;  %v460_v3 = vld [vmem:[%s5654_s23] sm:$0xff]  ;;  %v461_v4 = vld [vmem:[%s5654_s23 + $0x8] sm:$0xff]  ;;  %vm1127_vm2 = vcmask 254976   ;;  %vm1293_vm3 = vsmask.f32 7424 }
 0x109   : > { %4494 = vmatpush3.bf16.msra.mxu0 %v4909_v0  ;;  %v5678_v5 = vld [vmem:[#allocation7] ss:$0 sm:$0xff]  ;;  %v5682_v8 = vld [vmem:[#allocation9] ss:$0 sm:$0xff]  ;;  %v462_v9 = vld [vmem:[%s5654_s23 + $0x10] sm:$0xff]  ;;  %vm1550_vm4 = vcmask 1046528  }
 0x10a   : > { %4495 = vmatprep.subr.bf16.mxu0 %v4910_v1  ;;  %v499_v6 = vmul.f32 %v5678_v5, %v460_v3  ;;  %v500_v7 = vmul.f32 %v5678_v5, %v461_v4  ;;  %v463_v10 = vld [vmem:[%s5654_s23 + $0x18] sm:$0xff]  ;;  %v501_v11 = vmul.f32 %v5678_v5, %v462_v9  ;;  %v464_v13 = vld [vmem:[%s5654_s23 + $0x20] sm:$0xff]  ;;  %v465_v14 = vld [vmem:[%s5654_s23 + $0x28] sm:$0xff]  ;;  %s5289_s16 = smov 32   ;;  %s5290_s17 = smov 64   ;;  %vm1743_vm5 = vcmask 785408  }
 0x10b   : > { %v502_v12 = vmul.f32 %v5678_v5, %v463_v10  ;;  %v503_v17 = vmul.f32 %v5678_v5, %v464_v13  ;;  %v504_v18 = vmul.f32 %v5678_v5, %v465_v14  ;;  %v466_v19 = vld [vmem:[%s5654_s23 + $0x30] sm:$0xff]  ;;  %v467_v20 = vld [vmem:[%s5654_s23 + $0x38] sm:$0xff]  ;;  %v468_v24 = vld [vmem:[%s5654_s23 + $0x40] sm:$0xff]  ;;  %s6971_s26 = scalar_lea.vmem [#allocation19], %s4224_s28  ;;  %s4368_s1 = sshll.u32 %s5365_s15, 12 }
 0x10c   : > { %v538_v15 = vadd.f32 %v5682_v8, %v499_v6  ;;  %v539_v16 = vadd.f32 %v5682_v8, %v500_v7  ;;  %v4912_v21 = vld [vmem:[#allocation10 + $0x18] sm:$0xff]   ;;  %v540_v22 = vadd.f32 %v5682_v8, %v501_v11  ;;  %v469_v29 = vld [vmem:[%s5654_s23 + $0x48] sm:$0xff]  ;;  %v505_v32 = vmul.f32 %v5678_v5, %v466_v19  ;;  %v470_v42 = vld [vmem:[%s5654_s23 + $0x50] sm:$0xff]  ;;  %s4060_s19 = sshll.u32 %s6971_s26, 4  ;;  %s7007_s25 = scalar_lea.hbm %s7065_s9, %s4368_s1  ;;  %s7009_s19 = int_to_ptr.vmem [resolvable:$true] %s4060_s19 }
 0x10d   : > { %4496 = vmatpush3.bf16.msra.mxu0 %v4910_v1  ;;  %v541_v23 = vadd.f32 %v5682_v8, %v502_v12  ;;  %v542_v27 = vadd.f32 %v5682_v8, %v503_v17  ;;  %v543_v28 = vadd.f32 %v5682_v8, %v504_v18  ;;  %v506_v33 = vmul.f32 %v5678_v5, %v467_v20  ;;  %v471_v43 = vld [vmem:[%s5654_s23 + $0x58] sm:$0xff]  ;;  %v472_v47 = vld [vmem:[%s5654_s23 + $0x60] sm:$0xff]  ;;  %v473_v48 = vld [vmem:[%s5654_s23 + $0x68] sm:$0xff]  ;;  %s4047_s15 = scalar_lea.sflag [#allocation6], %s5648_s21  ;;  %s5191_s24 = scalar_lea.vmem %s7009_s19, 4096 }
 0x10e   : > { %4497 = vmatprep.subr.bf16.mxu0 %v4911_v2  ;;  %v570_v25 = vmax.f32 %v538_v15, 0.0  ;;  %v571_v26 = vmax.f32 %v539_v16, 0.0  ;;  %v572_v30 = vmax.f32 %v540_v22, 0.0  ;;  %v507_v37 = vmul.f32 %v5678_v5, %v468_v24  ;;  %v474_v57 = vld [vmem:[%s5654_s23 + $0x70] sm:$0xff]  ;;  %v475_v58 = vld [vmem:[%s5654_s23 + $0x78] sm:$0xff]  ;;  %v476_v59 = vld [vmem:[%s5654_s23 + $0x80] sm:$0xff]  ;;  %p5192_p4 = scmp.ne.s32.totalorder %s7009_s19, %s5191_s24 }
 0x10f   : > { %v573_v31 = vmax.f32 %v541_v23, 0.0  ;;  %v574_v35 = vmax.f32 %v542_v27, 0.0  ;;  %v575_v36 = vmax.f32 %v543_v28, 0.0  ;;  %v508_v38 = vmul.f32 %v5678_v5, %v469_v29  ;;  %v478_v15 = vld [vmem:[%s5654_s23 + $0x90] sm:$0xff]  ;;  %v479_v19 = vld [vmem:[%s5654_s23 + $0x98] sm:$0xff]  ;;  %v481_v22 = vld [vmem:[%s5654_s23 + $0xa8] sm:$0xff] }
 0x110   : > { %v602_v34 = vpack.c.bf16 %v571_v26, %v570_v25  ;;  %v544_v40 = vadd.f32 %v5682_v8, %v505_v32  ;;  %v545_v41 = vadd.f32 %v5682_v8, %v506_v33  ;;  %v546_v45 = vadd.f32 %v5682_v8, %v507_v37  ;;  %v482_v37 = vld [vmem:[%s5654_s23 + $0xb0] sm:$0xff]  ;;  %p7091_p1 = scmp.ne.s32.totalorder %s7079_s29, 0  ;;  %s5291_s14 = smov [#allocation19]  }
 0x111   : > { %4498 = vmatpush3.bf16.msra.mxu0 %v4911_v2  ;;  %v5707_v39 = vpack.c.bf16 %v573_v31, %v572_v30  ;;  %v5714_v44 = vpack.c.bf16 %v575_v36, %v574_v35  ;;  %v547_v46 = vadd.f32 %v5682_v8, %v508_v38  ;;  %v509_v51 = vmul.f32 %v5678_v5, %v470_v42  ;;  %v477_v2 = vld [vmem:[%s5654_s23 + $0x88] sm:$0xff]  ;;  %v483_v38 = vld [vmem:[%s5654_s23 + $0xb8] sm:$0xff]  ;;  %s5195_s28 = sshll.u32 %s5291_s14, 4  ;;  %s5196_s28 = int_to_ptr.vmem [resolvable:$false] %s5195_s28 }
 0x112   : > { %4499 = vmatprep.subr.bf16.mxu0 %v4912_v21  ;;  %4501 = vmatprep.mubr.msk.bf16.mxu0 %vm657_vm0, %v602_v34  ;;  %v576_v49 = vmax.f32 %v544_v40, 0.0  ;;  %v577_v50 = vmax.f32 %v545_v41, 0.0  ;;  %v510_v52 = vmul.f32 %v5678_v5, %v471_v43  ;;  %v578_v53 = vmax.f32 %v546_v45, 0.0  ;;  %v484_v40 = vld [vmem:[%s5654_s23 + $0xc0] sm:$0xff]  ;;  %v485_v41 = vld [vmem:[%s5654_s23 + $0xc8] sm:$0xff]  ;;  %p5193_p13 = pnand %p5192_p4, %p7091_p1  ;;  %s5197_s20 = scalar_lea.vmem %s5196_s28, 8192 }
 0x113   : > { %4541 = vmatprep.mubr.msk.bf16.mxu1 %vm657_vm0, %v602_v34  ;;  %v579_v54 = vmax.f32 %v547_v46, 0.0  ;;  %v511_v55 = vmul.f32 %v5678_v5, %v472_v47  ;;  %v512_v56 = vmul.f32 %v5678_v5, %v473_v48  ;;  %v548_v61 = vadd.f32 %v5682_v8, %v509_v51  ;;  %p5198_p2 = scmp.lt.s32.totalorder %s7009_s19, %s5196_s28  ;;  %p5199_p8 = scmp.lt.s32.totalorder %s5197_s20, %s5191_s24 }
 0x114   : > { %v5731_v60 = vpack.c.bf16 %v577_v50, %v576_v49  ;;  %v549_v62 = vadd.f32 %v5682_v8, %v510_v52  ;;  %v513_v3 = vmul.f32 %v5678_v5, %v474_v57  ;;  %v514_v4 = vmul.f32 %v5678_v5, %v475_v58  ;;  %v486_v57 = vld [vmem:[%s5654_s23 + $0xd0] sm:$0xff]  ;;  %v487_v58 = vld [vmem:[%s5654_s23 + $0xd8] sm:$0xff]  ;;  %p5194_p0 = pneg %p5193_p13 }
 0x115   : > { %4500 = vmatpush3.bf16.msra.mxu0 %v4912_v21  ;;  %v5735_v63 = vpack.c.bf16 %v579_v54, %v578_v53  ;;  %v550_v0 = vadd.f32 %v5682_v8, %v511_v55  ;;  %v551_v1 = vadd.f32 %v5682_v8, %v512_v56  ;;  %v580_v6 = vmax.f32 %v548_v61, 0.0  ;;  %v480_v21 = vld [vmem:[%s5654_s23 + $0xa0] sm:$0xff]  ;;  %v489_v61 = vld [vmem:[%s5654_s23 + $0xe8] sm:$0xff]  ;;  %p5200_p10 = por %p5199_p8, %p5198_p2 }
 0x116   : > { %v581_v7 = vmax.f32 %v549_v62, 0.0  ;;  %v515_v9 = vmul.f32 %v5678_v5, %v476_v59  ;;  %v516_v10 = vmul.f32 %v5678_v5, %v477_v2  ;;  %v552_v13 = vadd.f32 %v5682_v8, %v513_v3  ;;  %v488_v59 = vld [vmem:[%s5654_s23 + $0xe0] sm:$0xff] }
 0x117   : > { %v582_v11 = vmax.f32 %v550_v0, 0.0  ;;  %v583_v12 = vmax.f32 %v551_v1, 0.0  ;;  %v553_v14 = vadd.f32 %v5682_v8, %v514_v4  ;;  %v517_v27 = vmul.f32 %v5678_v5, %v478_v15  ;;  %v490_v15 = vld [vmem:[%s5654_s23 + $0xf0] sm:$0xff]  ;;  %p5201_p11 = pnand %p5200_p10, %p5194_p0 }
 0x118   : > { %4502 = vmatmul.mubr.msk.bf16.vlgmr.msra.gmra.mrb[0].mxu0 %vm657_vm0, %v5707_v39  ;;  %v5751_v16 = vpack.c.bf16 %v581_v7, %v580_v6  ;;  %v554_v17 = vadd.f32 %v5682_v8, %v515_v9  ;;  %v555_v18 = vadd.f32 %v5682_v8, %v516_v10  ;;  %v584_v23 = vmax.f32 %v552_v13, 0.0 }
 0x119   : > { %4505 = vmatprep.mubr.msk.bf16.mxu0 %vm657_vm0, %v5714_v44  ;;  %v5756_v20 = vpack.c.bf16 %v583_v12, %v582_v11  ;;  %v585_v24 = vmax.f32 %v553_v14, 0.0  ;;  %v518_v28 = vmul.f32 %v5678_v5, %v479_v19  ;;  %v519_v29 = vmul.f32 %v5678_v5, %v480_v21 }
 0x11a   : > { %v586_v25 = vmax.f32 %v554_v17, 0.0  ;;  %v587_v26 = vmax.f32 %v555_v18, 0.0  ;;  %v520_v30 = vmul.f32 %v5678_v5, %v481_v22  ;;  %v556_v32 = vadd.f32 %v5682_v8, %v517_v27  ;;  %v491_v17 = vld [vmem:[%s5654_s23 + $0xf8] sm:$0xff] }
 0x11b   : > { %v5768_v31 = vpack.c.bf16 %v585_v24, %v584_v23  ;;  %v557_v33 = vadd.f32 %v5682_v8, %v518_v28  ;;  %v558_v35 = vadd.f32 %v5682_v8, %v519_v29  ;;  %v521_v45 = vmul.f32 %v5678_v5, %v482_v37 }
 0x11c   : > { %v5772_v34 = vpack.c.bf16 %v587_v26, %v586_v25  ;;  %v559_v36 = vadd.f32 %v5682_v8, %v520_v30  ;;  %v588_v42 = vmax.f32 %v556_v32, 0.0  ;;  %v522_v46 = vmul.f32 %v5678_v5, %v483_v38 }
 0x11d   : > { %v589_v43 = vmax.f32 %v557_v33, 0.0  ;;  %v590_v47 = vmax.f32 %v558_v35, 0.0  ;;  %v523_v49 = vmul.f32 %v5678_v5, %v484_v40  ;;  %v524_v50 = vmul.f32 %v5678_v5, %v485_v41 }
 0x11e   : > { %v591_v48 = vmax.f32 %v559_v36, 0.0  ;;  %v560_v52 = vadd.f32 %v5682_v8, %v521_v45  ;;  %v561_v53 = vadd.f32 %v5682_v8, %v522_v46  ;;  %v525_v1 = vmul.f32 %v5678_v5, %v486_v57 }
 0x11f   : > { %v5788_v51 = vpack.c.bf16 %v589_v43, %v588_v42  ;;  %v562_v55 = vadd.f32 %v5682_v8, %v523_v49  ;;  %v563_v56 = vadd.f32 %v5682_v8, %v524_v50  ;;  %v526_v2 = vmul.f32 %v5678_v5, %v487_v58  ;;  %v4913_v50 = vld [vmem:[#allocation18] sm:$0xff]  }
 0x120   : > { %4506 = vmatmul.mubr.msk.bf16.gmra.mrb[4].mxu0 %vm657_vm0, %v5731_v60  ;;  %v5792_v54 = vpack.c.bf16 %v591_v48, %v590_v47  ;;  %v592_v62 = vmax.f32 %v560_v52, 0.0  ;;  %v593_v0 = vmax.f32 %v561_v53, 0.0  ;;  %v527_v6 = vmul.f32 %v5678_v5, %v488_v59  ;;  %4533 = vmatprep.subr.bf16.mxu1 %v4913_v50  ;;  %v4914_v52 = vld [vmem:[#allocation18 + $0x8] sm:$0xff]   ;;  %v4915_v53 = vld [vmem:[#allocation18 + $0x10] sm:$0xff]  }
 0x121   : > { %4509 = vmatprep.mubr.msk.bf16.mxu0 %vm657_vm0, %v5735_v63  ;;  %v594_v3 = vmax.f32 %v562_v55, 0.0  ;;  %v595_v4 = vmax.f32 %v563_v56, 0.0  ;;  %v528_v7 = vmul.f32 %v5678_v5, %v489_v61  ;;  %v564_v10 = vadd.f32 %v5682_v8, %v525_v1  ;;  %4534 = vmatpush3.bf16.msra.mxu1 %v4913_v50  ;;  %v4916_v55 = vld [vmem:[#allocation18 + $0x18] sm:$0xff]  }
 0x122   : > { %v5808_v9 = vpack.c.bf16 %v593_v0, %v592_v62  ;;  %v565_v11 = vadd.f32 %v5682_v8, %v526_v2  ;;  %v566_v13 = vadd.f32 %v5682_v8, %v527_v6  ;;  %v529_v21 = vmul.f32 %v5678_v5, %v490_v15  ;;  %4535 = vmatprep.subr.bf16.mxu1 %v4914_v52  ;;  %v5908_v56 = vld [vmem:[#allocation12] ss:$0 sm:$0xff] }
 0x123   : > { %v5812_v12 = vpack.c.bf16 %v595_v4, %v594_v3  ;;  %v567_v14 = vadd.f32 %v5682_v8, %v528_v7  ;;  %v596_v18 = vmax.f32 %v564_v10, 0.0  ;;  %v530_v22 = vmul.f32 %v5678_v5, %v491_v17  ;;  %v4917_v3 = vld [vmem:[#allocation13] sm:$0xff]  }
 0x124   : > { %v597_v19 = vmax.f32 %v565_v11, 0.0  ;;  %v598_v23 = vmax.f32 %v566_v13, 0.0  ;;  %v568_v26 = vadd.f32 %v5682_v8, %v529_v21  ;;  %v5288_v32 = vmov 0.0   ;;  %4573 = vmatprep.subr.bf16.mxu0 %v4917_v3  ;;  %v4918_v21 = vld [vmem:[#allocation13 + $0x8] sm:$0xff]  }
 0x125   : > { %v599_v24 = vmax.f32 %v567_v14, 0.0  ;;  %v569_v27 = vadd.f32 %v5682_v8, %v530_v22  ;;  %1132 = vst.msk [vmem:[#allocation2 + $0x30] sm:$0xff] %vm1124_vm1, %v5288_v32  ;;  %1133 = vst.msk [vmem:[#allocation2 + $0x38] sm:$0xff] %vm1124_vm1, %v5288_v32  ;;  %4536 = vmatpush3.bf16.msra.mxu1 %v4914_v52  ;;  %4574 = vmatpush3.bf16.msra.mxu0 %v4917_v3  ;;  %v4919_v22 = vld [vmem:[#allocation13 + $0x30] sm:$0xff]  }
 0x126   : > { %v5824_v25 = vpack.c.bf16 %v597_v19, %v596_v18  ;;  %v600_v29 = vmax.f32 %v568_v26, 0.0  ;;  %1125 = vst.msk [vmem:[#allocation2] sm:$0xff] %vm1124_vm1, %v5288_v32  ;;  %1126 = vst.msk [vmem:[#allocation2 + $0x8] sm:$0xff] %vm1124_vm1, %v5288_v32  ;;  %4537 = vmatprep.subr.bf16.mxu1 %v4915_v53  ;;  %4575 = vmatprep.subr.bf16.mxu0 %v4918_v21 }
 0x127   : > { %v5828_v28 = vpack.c.bf16 %v599_v24, %v598_v23  ;;  %v601_v30 = vmax.f32 %v569_v27, 0.0  ;;  %1129 = vst.msk [vmem:[#allocation2 + $0x18] sm:$0xff] %vm1124_vm1, %v5288_v32  ;;  %1130 = vst.msk [vmem:[#allocation2 + $0x20] sm:$0xff] %vm1124_vm1, %v5288_v32 }
 0x128   : > { %4510 = vmatmul.mubr.msk.bf16.gmra.mrb[8].mxu0 %vm657_vm0, %v5751_v16  ;;  %1135 = vst.msk [vmem:[#allocation2 + $0x48] sm:$0xff] %vm1124_vm1, %v5288_v32  ;;  %1136 = vst.msk [vmem:[#allocation2 + $0x50] sm:$0xff] %vm1124_vm1, %v5288_v32 }
 0x129   : > { %4513 = vmatprep.mubr.msk.bf16.mxu0 %vm657_vm0, %v5756_v20  ;;  %v5834_v5 = vpack.c.bf16 %v601_v30, %v600_v29  ;;  %1138 = vst.msk [vmem:[#allocation2 + $0x60] sm:$0xff] %vm1124_vm1, %v5288_v32  ;;  %1139 = vst.msk [vmem:[#allocation2 + $0x68] sm:$0xff] %vm1124_vm1, %v5288_v32  ;;  %4538 = vmatpush3.bf16.msra.mxu1 %v4915_v53 }
 0x12a   : > { %1141 = vst.msk [vmem:[#allocation2 + $0x78] sm:$0xff] %vm1124_vm1, %v5288_v32  ;;  %1142 = vst.msk [vmem:[#allocation2 + $0x80] sm:$0xff] %vm1124_vm1, %v5288_v32  ;;  %4539 = vmatprep.subr.bf16.mxu1 %v4916_v55  ;;  %4576 = vmatpush3.bf16.msra.mxu0 %v4918_v21 }
 0x12b   : > { %1144 = vst.msk [vmem:[#allocation2 + $0x90] sm:$0xff] %vm1124_vm1, %v5288_v32  ;;  %1145 = vst.msk [vmem:[#allocation2 + $0x98] sm:$0xff] %vm1124_vm1, %v5288_v32 }
 0x12c   : > { %1147 = vst.msk [vmem:[#allocation2 + $0xa8] sm:$0xff] %vm1124_vm1, %v5288_v32  ;;  %1148 = vst.msk [vmem:[#allocation2 + $0xb0] sm:$0xff] %vm1124_vm1, %v5288_v32 }
 0x12d   : > { %1150 = vst.msk [vmem:[#allocation2 + $0xc0] sm:$0xff] %vm1124_vm1, %v5288_v32  ;;  %1151 = vst.msk [vmem:[#allocation2 + $0xc8] sm:$0xff] %vm1124_vm1, %v5288_v32  ;;  %v1213_v8 = vld [vmem:[#allocation2] sm:$0xff]  ;;  %v1214_v33 = vld [vmem:[#allocation2 + $0x8] sm:$0xff]  ;;  %4540 = vmatpush3.bf16.msra.mxu1 %v4916_v55 }
 0x12e   : > { %1153 = vst.msk [vmem:[#allocation2 + $0xd8] sm:$0xff] %vm1124_vm1, %v5288_v32  ;;  %1154 = vst.msk [vmem:[#allocation2 + $0xe0] sm:$0xff] %vm1124_vm1, %v5288_v32  ;;  %v1261_v35 = vpack.c.bf16 %v1214_v33, %v1213_v8  ;;  %4617 = vmatprep.subr.bf16.mxu1 %v4919_v22 }
 0x12f   : > { %1156 = vst.msk [vmem:[#allocation2 + $0xf0] sm:$0xff] %vm1124_vm1, %v5288_v32  ;;  %1157 = vst.msk [vmem:[#allocation2 + $0xf8] sm:$0xff] %vm1124_vm1, %v5288_v32 }
 0x130   : > { %4514 = vmatmul.mubr.msk.bf16.gmra.mrb[12].mxu0 %vm657_vm0, %v5768_v31  ;;  %1159 = vst.msk [vmem:[#allocation2 + $0x108] sm:$0xff] %vm1124_vm1, %v5288_v32  ;;  %1160 = vst.msk [vmem:[#allocation2 + $0x110] sm:$0xff] %vm1124_vm1, %v5288_v32  ;;  %v1297_v38 = vshll.u32 %v1261_v35, 16  ;;  %v1295_v40 = vshrl.u32 %v1261_v35, 16  ;;  %v1551_v46 = vrot.slane %v1261_v35, 1  ;;  %4542 = vmatmul.mubr.msk.bf16.vlgmr.msra.gmra.mrb[0].mxu1 %vm657_vm0, %v5707_v39 }
 0x131   : > { %4517 = vmatprep.mubr.msk.bf16.mxu0 %vm657_vm0, %v5772_v34  ;;  %1162 = vst.msk [vmem:[#allocation2 + $0x120] sm:$0xff] %vm1124_vm1, %v5288_v32  ;;  %1163 = vst.msk [vmem:[#allocation2 + $0x128] sm:$0xff] %vm1124_vm1, %v5288_v32  ;;  %4545 = vmatprep.mubr.msk.bf16.mxu1 %vm657_vm0, %v5714_v44 }
 0x132   : > { %1165 = vst.msk [vmem:[#allocation2 + $0x138] sm:$0xff] %vm1124_vm1, %v5288_v32  ;;  %1166 = vst.msk [vmem:[#allocation2 + $0x140] sm:$0xff] %vm1124_vm1, %v5288_v32  ;;  %v1299_v41 = vrot.slane %v1297_v38, 1  ;;  %4618 = vmatpush3.bf16.msra.mxu1 %v4919_v22 }
 0x133   : > { %1168 = vst.msk [vmem:[#allocation2 + $0x150] sm:$0xff] %vm1124_vm1, %v5288_v32  ;;  %1169 = vst.msk [vmem:[#allocation2 + $0x158] sm:$0xff] %vm1124_vm1, %v5288_v32 }
 0x134   : > { %1171 = vst.msk [vmem:[#allocation2 + $0x168] sm:$0xff] %vm1124_vm1, %v5288_v32  ;;  %1172 = vst.msk [vmem:[#allocation2 + $0x170] sm:$0xff] %vm1124_vm1, %v5288_v32  ;;  %v1300_v43 = vor.u32 %v1299_v41, %v1295_v40  ;;  %v4920_v40 = vld [vmem:[#allocation13 + $0x10] sm:$0xff]  }
 0x135   : > { %1174 = vst.msk [vmem:[#allocation2 + $0x180] sm:$0xff] %vm1124_vm1, %v5288_v32  ;;  %1175 = vst.msk [vmem:[#allocation2 + $0x188] sm:$0xff] %vm1124_vm1, %v5288_v32  ;;  %4577 = vmatprep.subr.bf16.mxu0 %v4920_v40 }
 0x136   : > { %1177 = vst.msk [vmem:[#allocation2 + $0x198] sm:$0xff] %vm1124_vm1, %v5288_v32  ;;  %1178 = vst.msk [vmem:[#allocation2 + $0x1a0] sm:$0xff] %vm1124_vm1, %v5288_v32  ;;  %4578 = vmatpush3.bf16.msra.mxu0 %v4920_v40 }
 0x137   : > { %1134 = vst.msk [vmem:[#allocation2 + $0x40] sm:$0x3] %vm1127_vm2, %v5288_v32  ;;  %1128 = vst.msk [vmem:[#allocation2 + $0x10] sm:$0x3] %vm1127_vm2, %v5288_v32 }
 0x138   : > { %4518 = vmatmul.mubr.msk.bf16.gmra.mrb[16].mxu0 %vm657_vm0, %v5788_v51  ;;  %1131 = vst.msk [vmem:[#allocation2 + $0x28] sm:$0x3] %vm1127_vm2, %v5288_v32  ;;  %1137 = vst.msk [vmem:[#allocation2 + $0x58] sm:$0x3] %vm1127_vm2, %v5288_v32  ;;  %4546 = vmatmul.mubr.msk.bf16.gmra.mrb[4].mxu1 %vm657_vm0, %v5731_v60 }
 0x139   : > { %4521 = vmatprep.mubr.msk.bf16.mxu0 %vm657_vm0, %v5792_v54  ;;  %1140 = vst.msk [vmem:[#allocation2 + $0x70] sm:$0x3] %vm1127_vm2, %v5288_v32  ;;  %1143 = vst.msk [vmem:[#allocation2 + $0x88] sm:$0x3] %vm1127_vm2, %v5288_v32  ;;  %4549 = vmatprep.mubr.msk.bf16.mxu1 %vm657_vm0, %v5735_v63 }
 0x13a   : > { %1146 = vst.msk [vmem:[#allocation2 + $0xa0] sm:$0x3] %vm1127_vm2, %v5288_v32  ;;  %1149 = vst.msk [vmem:[#allocation2 + $0xb8] sm:$0x3] %vm1127_vm2, %v5288_v32 }
 0x13b   : > { %1152 = vst.msk [vmem:[#allocation2 + $0xd0] sm:$0x3] %vm1127_vm2, %v5288_v32  ;;  %1155 = vst.msk [vmem:[#allocation2 + $0xe8] sm:$0x3] %vm1127_vm2, %v5288_v32 }
 0x13c   : > { %1158 = vst.msk [vmem:[#allocation2 + $0x100] sm:$0x3] %vm1127_vm2, %v5288_v32  ;;  %1161 = vst.msk [vmem:[#allocation2 + $0x118] sm:$0x3] %vm1127_vm2, %v5288_v32 }
 0x13d   : > { %1164 = vst.msk [vmem:[#allocation2 + $0x130] sm:$0x3] %vm1127_vm2, %v5288_v32  ;;  %1167 = vst.msk [vmem:[#allocation2 + $0x148] sm:$0x3] %vm1127_vm2, %v5288_v32 }
 0x13e   : > { %1170 = vst.msk [vmem:[#allocation2 + $0x160] sm:$0x3] %vm1127_vm2, %v5288_v32  ;;  %1173 = vst.msk [vmem:[#allocation2 + $0x178] sm:$0x3] %vm1127_vm2, %v5288_v32  ;;  %v1215_v36 = vld [vmem:[#allocation2 + $0x10] sm:$0x3] }
 0x13f   : > { %1176 = vst.msk [vmem:[#allocation2 + $0x190] sm:$0x3] %vm1127_vm2, %v5288_v32  ;;  %1179 = vst.msk [vmem:[#allocation2 + $0x1a8] sm:$0x3] %vm1127_vm2, %v5288_v32  ;;  %v1262_v37 = vpack.c.bf16 %v1215_v36, %v1215_v36 }
 0x140   : > { %4522 = vmatmul.mubr.msk.bf16.gmra.mrb[20].mxu0 %vm657_vm0, %v5808_v9  ;;  %4550 = vmatmul.mubr.msk.bf16.gmra.mrb[8].mxu1 %vm657_vm0, %v5751_v16 }
 0x141   : > { %4525 = vmatprep.mubr.msk.bf16.mxu0 %vm657_vm0, %v5812_v12  ;;  %v1302_v42 = vshll.u32 %v1262_v37, 16  ;;  %v1552_v47 = vrot.slane %v1262_v37, 1  ;;  %4553 = vmatprep.mubr.msk.bf16.mxu1 %vm657_vm0, %v5756_v20 }
 0x143   : > { %v1304_v45 = vrot.slane %v1302_v42, 1  ;;  %v1553_v49 = vsel %vm1550_vm4, %v1551_v46, %v1552_v47 }
 0x144   : > { %1599 = vrot.lane.b32.xlu1 %v1553_v49, %s5290_s17 }
 0x145   : > { %v1305_v48 = vsel %vm1293_vm3, %v1300_v43, %v1304_v45 }
 0x146   : > { %1486 = vrot.lane.b32.xlu0 %v1305_v48, %s5289_s16 }
 0x148   : > { %4526 = vmatmul.mubr.msk.bf16.gmra.mrb[24].mxu0 %vm657_vm0, %v5824_v25  ;;  %4554 = vmatmul.mubr.msk.bf16.gmra.mrb[12].mxu1 %vm657_vm0, %v5768_v31 }
 0x149   : > { %4529 = vmatprep.mubr.msk.bf16.mxu0 %vm657_vm0, %v5828_v28  ;;  %4557 = vmatprep.mubr.msk.bf16.mxu1 %vm657_vm0, %v5772_v34 }
 0x150   : > { %4530 = vmatmul.mubr.msk.bf16.gmra.mrb[28].mxu0 %vm657_vm0, %v5834_v5  ;;  %4558 = vmatmul.mubr.msk.bf16.gmra.mrb[16].mxu1 %vm657_vm0, %v5788_v51 }
 0x151   : > { %4561 = vmatprep.mubr.msk.bf16.mxu1 %vm657_vm0, %v5792_v54 }
 0x158   : > { %4562 = vmatmul.mubr.msk.bf16.gmra.mrb[20].mxu1 %vm657_vm0, %v5808_v9  ;;  %v4921_v9 = vld [vmem:[#allocation13 + $0x38] sm:$0xff]  }
 0x159   : > { %4565 = vmatprep.mubr.msk.bf16.mxu1 %vm657_vm0, %v5812_v12  ;;  %4619 = vmatprep.subr.bf16.mxu1 %v4921_v9 }
 0x15a   : > { %4620 = vmatpush3.bf16.msra.mxu1 %v4921_v9 }
 0x160   : > { %4566 = vmatmul.mubr.msk.bf16.gmra.mrb[24].mxu1 %vm657_vm0, %v5824_v25 }
 0x161   : > { %4569 = vmatprep.mubr.msk.bf16.mxu1 %vm657_vm0, %v5828_v28 }
 0x168   : > { %4570 = vmatmul.mubr.msk.bf16.gmra.mrb[28].mxu1 %vm657_vm0, %v5834_v5 }
 0x1b6   : > { %v1600_v62 = vpop.permute.xlu1 %1599 }
 0x1b8   : > { %v1487_v58 = vpop.permute.xlu0 %1486 }
 0x1b9   : > { %v1632_v61 = vsel %vm1124_vm1, %v1261_v35, %v1487_v58 }
 0x1ba   : > { %v1664_v1 = vsel %vm657_vm0, %v1632_v61, %v1600_v62 }
 0x1bb   : > { %4585 = vmatprep.mubr.msk.bf16.mxu0 %vm1743_vm5, %v1664_v1 }
 0x1eb   : > { %v4503_v39 = vpop.f32.mrb[0].mxu0 }
 0x1ec   : > { %v749_v44 = vadd.f32 %v4503_v39, %v5908_v56  ;;  %v740_v60 = vpop.f32.mrb[1].mxu0 }
 0x1ed   : > { %v741_v63 = vadd.f32 %v5908_v56, %v740_v60  ;;  %v4504_v57 = vpop.f32.mrb[2].mxu0 }
 0x1ee   : > { %v869_v16 = vmax.f32 %v749_v44, 0.0  ;;  %v752_v59 = vadd.f32 %v4504_v57, %v5908_v56  ;;  %v743_v20 = vpop.f32.mrb[3].mxu0 }
 0x1ef   : > { %v867_v0 = vmax.f32 %v741_v63, 0.0  ;;  %v744_v31 = vadd.f32 %v5908_v56, %v743_v20 }
 0x1f0   : > { %1183 = vst.msk [vmem:[#allocation2 + $0x31] sm:$0xff] %vm1124_vm1, %v869_v16  ;;  %v870_v34 = vmax.f32 %v752_v59, 0.0  ;;  %v4922_v59 = vld [vmem:[#allocation13 + $0x18] sm:$0xff]  }
 0x1f1   : > { %1181 = vst.msk [vmem:[#allocation2 + $0x19] sm:$0xff] %vm1124_vm1, %v867_v0  ;;  %v868_v2 = vmax.f32 %v744_v31, 0.0  ;;  %v4923_v31 = vld [vmem:[#allocation13 + $0x40] sm:$0xff]   ;;  %4579 = vmatprep.subr.bf16.mxu0 %v4922_v59 }
 0x1f2   : > { %1184 = vst.msk [vmem:[#allocation2 + $0x39] sm:$0xff] %vm1124_vm1, %v870_v34  ;;  %4621 = vmatprep.subr.bf16.mxu1 %v4923_v31  ;;  %4580 = vmatpush3.bf16.msra.mxu0 %v4922_v59 }
 0x1f3   : > { %1182 = vst.msk [vmem:[#allocation2 + $0x21] sm:$0xff] %vm1124_vm1, %v868_v2  ;;  %v4507_v4 = vpop.f32.mrb[4].mxu0  ;;  %4622 = vmatpush3.bf16.msra.mxu1 %v4923_v31 }
 0x1f4   : > { %v765_v6 = vadd.f32 %v4507_v4, %v5908_v56  ;;  %v756_v7 = vpop.f32.mrb[5].mxu0 }
 0x1f5   : > { %v757_v10 = vadd.f32 %v5908_v56, %v756_v7  ;;  %v4508_v11 = vpop.f32.mrb[6].mxu0 }
 0x1f6   : > { %v873_v13 = vmax.f32 %v765_v6, 0.0  ;;  %v768_v14 = vadd.f32 %v4508_v11, %v5908_v56  ;;  %v759_v15 = vpop.f32.mrb[7].mxu0 }
 0x1f7   : > { %v871_v51 = vmax.f32 %v757_v10, 0.0  ;;  %v760_v17 = vadd.f32 %v5908_v56, %v759_v15  ;;  %v1219_v18 = vld [vmem:[#allocation2 + $0x30] sm:$0xff] }
 0x1f8   : > { %1187 = vst.msk [vmem:[#allocation2 + $0x61] sm:$0xff] %vm1124_vm1, %v873_v13  ;;  %v874_v19 = vmax.f32 %v768_v14, 0.0  ;;  %v1216_v54 = vld [vmem:[#allocation2 + $0x18] sm:$0xff] }
 0x1f9   : > { %1185 = vst.msk [vmem:[#allocation2 + $0x49] sm:$0xff] %vm1124_vm1, %v871_v51  ;;  %v872_v23 = vmax.f32 %v760_v17, 0.0  ;;  %v1220_v24 = vld [vmem:[#allocation2 + $0x38] sm:$0xff]  ;;  %v1221_v26 = vld [vmem:[#allocation2 + $0x40] sm:$0x3] }
 0x1fa   : > { %v1974_v27 = vld [vmem:[#allocation2 + $0x40] sm:$0x3]  ;;  %1188 = vst.msk [vmem:[#allocation2 + $0x69] sm:$0xff] %vm1124_vm1, %v874_v19  ;;  %v5936_v29 = vpack.c.bf16 %v1220_v24, %v1219_v18  ;;  %v5938_v30 = vpack.c.bf16 %v1221_v26, %v1221_v26  ;;  %v1218_v8 = vld [vmem:[#allocation2 + $0x28] sm:$0x3]  ;;  %v4924_v24 = vld [vmem:[#allocation13 + $0x20] sm:$0xff]  }
 0x1fb   : > { %v1217_v32 = vld [vmem:[#allocation2 + $0x20] sm:$0xff]  ;;  %v2020_v33 = vpack.c.bf16 %v1974_v27, %v1974_v27  ;;  %1186 = vst.msk [vmem:[#allocation2 + $0x51] sm:$0xff] %vm1124_vm1, %v872_v23  ;;  %v5945_v37 = vpack.c.bf16 %v1218_v8, %v1218_v8  ;;  %v4511_v38 = vpop.f32.mrb[8].mxu0  ;;  %v1971_v60 = vld [vmem:[#allocation2 + $0x28] sm:$0x3]  ;;  %4581 = vmatprep.subr.bf16.mxu0 %v4924_v24 }
 0x1fc   : > { %v2790_v35 = vld [vmem:[#allocation2 + $0x40] sm:$0x3]  ;;  %v5943_v36 = vpack.c.bf16 %v1217_v32, %v1216_v54  ;;  %v5948_v41 = vrot.slane %v5936_v29, 1  ;;  %v1558_v42 = vrot.slane %v5938_v30, 1  ;;  %v772_v46 = vpop.f32.mrb[9].mxu0  ;;  %v2064_v49 = vshll.u32 %v5936_v29, 16  ;;  %4582 = vmatpush3.bf16.msra.mxu0 %v4924_v24 }
 0x1fd   : > { %v2309_v43 = vrot.slane %v2020_v33, 1  ;;  %v5951_v45 = vpack.c.bf16 %v2790_v35, %v2790_v35  ;;  %v1555_v48 = vrot.slane %v5945_v37, 1  ;;  %v2069_v50 = vshll.u32 %v2020_v33, 16  ;;  %v4512_v52 = vpop.f32.mrb[10].mxu0  ;;  %v4925_v27 = vld [vmem:[#allocation13 + $0x48] sm:$0xff]  }
 0x1fe   : > { %v1554_v47 = vrot.slane %v5943_v36, 1  ;;  %v1559_v53 = vsel %vm1550_vm4, %v5948_v41, %v1558_v42  ;;  %v2062_v55 = vshrl.u32 %v5936_v29, 16  ;;  %v781_v39 = vadd.f32 %v4511_v38, %v5908_v56  ;;  %v775_v44 = vpop.f32.mrb[11].mxu0  ;;  %4623 = vmatprep.subr.bf16.mxu1 %v4925_v27 }
 0x1ff   : > { %1603 = vrot.lane.b32.xlu0 %v1559_v53, %s5290_s17  ;;  %v2310_v63 = vsel %vm1550_vm4, %v5948_v41, %v2309_v43  ;;  %v2066_v57 = vrot.slane %v2064_v49, 1  ;;  %v773_v58 = vadd.f32 %v5908_v56, %v772_v46  ;;  %v1978_v16 = vld [vmem:[#allocation2 + $0x60] sm:$0xff]  ;;  %v3125_v20 = vrot.slane %v5951_v45, 1  ;;  %4624 = vmatpush3.bf16.msra.mxu1 %v4925_v27 }
 0x200   : > { %v1556_v12 = vsel %vm1550_vm4, %v1554_v47, %v1555_v48  ;;  %v877_v61 = vmax.f32 %v781_v39, 0.0  ;;  %v784_v62 = vadd.f32 %v4512_v52, %v5908_v56  ;;  %v776_v0 = vadd.f32 %v5908_v56, %v775_v44  ;;  %v1222_v14 = vld [vmem:[#allocation2 + $0x48] sm:$0xff] }
 0x201   : > { %1601 = vrot.lane.b32.xlu1 %v1556_v12, %s5290_s17  ;;  %v5973_v1 = vor.u32 %v2066_v57, %v2062_v55  ;;  %v2071_v34 = vrot.slane %v2069_v50, 1  ;;  %v875_v2 = vmax.f32 %v773_v58, 0.0  ;;  %v1979_v3 = vld [vmem:[#allocation2 + $0x68] sm:$0xff]  ;;  %v1980_v4 = vld [vmem:[#allocation2 + $0x70] sm:$0x3]  ;;  %v5975_v6 = vpack.c.bf16 %v1971_v60, %v1971_v60 }
 0x202   : > { %1191 = vst.msk [vmem:[#allocation2 + $0x91] sm:$0xff] %vm1124_vm1, %v877_v61  ;;  %v5978_v7 = vpack.c.bf16 %v1979_v3, %v1978_v16  ;;  %v5980_v10 = vpack.c.bf16 %v1980_v4, %v1980_v4  ;;  %v878_v11 = vmax.f32 %v784_v62, 0.0  ;;  %v876_v13 = vmax.f32 %v776_v0, 0.0  ;;  %v1223_v15 = vld [vmem:[#allocation2 + $0x50] sm:$0xff]  ;;  %v1224_v51 = vld [vmem:[#allocation2 + $0x58] sm:$0x3] }
 0x203   : > { %2355 = vrot.lane.b32.xlu0 %v2310_v63, %s5290_s17  ;;  %v2072_v17 = vsel %vm1293_vm3, %v5973_v1, %v2071_v34  ;;  %1189 = vst.msk [vmem:[#allocation2 + $0x79] sm:$0xff] %vm1124_vm1, %v875_v2  ;;  %v5988_v18 = vpack.c.bf16 %v1223_v15, %v1222_v14  ;;  %v5990_v19 = vpack.c.bf16 %v1224_v51, %v1224_v51  ;;  %v2793_v54 = vld [vmem:[#allocation2 + $0x58] sm:$0x3]  ;;  %v4515_v21 = vpop.f32.mrb[12].mxu0  ;;  %v2306_v33 = vrot.slane %v5975_v6, 1  ;;  %v4927_v46 = vld [vmem:[#allocation13 + $0x50] sm:$0xff]  }
 0x204   : > { %v5994_v22 = vrot.slane %v5978_v7, 1  ;;  %v2315_v25 = vrot.slane %v5980_v10, 1  ;;  %1192 = vst.msk [vmem:[#allocation2 + $0x99] sm:$0xff] %vm1124_vm1, %v878_v11  ;;  %1190 = vst.msk [vmem:[#allocation2 + $0x81] sm:$0xff] %vm1124_vm1, %v876_v13  ;;  %v788_v23 = vpop.f32.mrb[13].mxu0  ;;  %v3126_v32 = vsel %vm1550_vm4, %v5948_v41, %v3125_v20  ;;  %v6011_v42 = vpack.c.bf16 %v2793_v54, %v2793_v54  ;;  %v4926_v41 = vld [vmem:[#allocation13 + $0x28] sm:$0xff]   ;;  %4625 = vmatprep.subr.bf16.mxu1 %v4927_v46 }
 0x205   : > { %2243 = vrot.lane.b32.xlu1 %v2072_v17, %s5289_s16  ;;  %v4516_v26 = vpop.f32.mrb[14].mxu0  ;;  %v6008_v38 = vrot.slane %v5988_v18, 1  ;;  %v1561_v40 = vrot.slane %v5990_v19, 1  ;;  %v2088_v28 = vshll.u32 %v5978_v7, 16  ;;  %v1326_v43 = vshll.u32 %v5938_v30, 16  ;;  %4583 = vmatprep.subr.bf16.mxu0 %v4926_v41  ;;  %v4928_v58 = vld [vmem:[#allocation13 + $0x58] sm:$0xff]  }
 0x206   : > { %v2316_v8 = vsel %vm1550_vm4, %v5994_v22, %v2315_v25  ;;  %v791_v35 = vpop.f32.mrb[15].mxu0  ;;  %v2307_v9 = vsel %vm1550_vm4, %v1554_v47, %v2306_v33  ;;  %v1309_v48 = vshll.u32 %v5943_v36, 16  ;;  %v3128_v30 = vrot.slane %v6011_v42, 1  ;;  %4584 = vmatpush3.bf16.msra.mxu0 %v4926_v41  ;;  %4626 = vmatpush3.bf16.msra.mxu1 %v4927_v46  ;;  %v1227_v15 = vld [vmem:[#allocation2 + $0x70] sm:$0x3] }
 0x207   : > { %3172 = vrot.lane.b32.xlu0 %v3126_v32, %s5290_s17  ;;  %v1562_v49 = vsel %vm1550_vm4, %v6008_v38, %v1561_v40  ;;  %v2090_v50 = vrot.slane %v2088_v28, 1  ;;  %v1333_v52 = vshll.u32 %v5988_v18, 16  ;;  %v1328_v47 = vrot.slane %v1326_v43, 1  ;;  %4627 = vmatprep.subr.bf16.mxu1 %v4928_v58 }
 0x208   : > { %v2876_v53 = vshll.u32 %v5951_v45, 16  ;;  %v797_v55 = vadd.f32 %v4515_v21, %v5908_v56  ;;  %v2086_v5 = vshrl.u32 %v5978_v7, 16  ;;  %v2093_v39 = vshll.u32 %v5980_v10, 16 }
 0x209   : > { %2359 = vrot.lane.b32.xlu1 %v2316_v8, %s5290_s17  ;;  %v1329_v60 = vsel %vm1293_vm3, %v5973_v1, %v1328_v47  ;;  %v1311_v12 = vrot.slane %v1309_v48, 1  ;;  %v3129_v45 = vsel %vm1550_vm4, %v6008_v38, %v3128_v30  ;;  %v1335_v59 = vrot.slane %v1333_v52, 1  ;;  %v1984_v8 = vld [vmem:[#allocation2 + $0x90] sm:$0xff] }
 0x20a   : > { %v881_v63 = vmax.f32 %v797_v55, 0.0  ;;  %v6041_v16 = vor.u32 %v2090_v50, %v2086_v5  ;;  %v789_v20 = vadd.f32 %v5908_v56, %v788_v23  ;;  %v2878_v62 = vrot.slane %v2876_v53, 1  ;;  %4628 = vmatpush3.bf16.msra.mxu1 %v4928_v58  ;;  %v1228_v30 = vld [vmem:[#allocation2 + $0x78] sm:$0xff] }
 0x20b   : > { %2353 = vrot.lane.b32.xlu0 %v2307_v9, %s5290_s17  ;;  %v6032_v44 = vpop.f32.mrb[16].mxu0  ;;  %v1307_v0 = vshrl.u32 %v5943_v36, 16  ;;  %v1314_v31 = vshll.u32 %v5945_v37, 16  ;;  %v800_v34 = vadd.f32 %v4516_v26, %v5908_v56  ;;  %v2095_v3 = vrot.slane %v2093_v39, 1  ;;  %v1985_v33 = vld [vmem:[#allocation2 + $0x98] sm:$0xff]  ;;  %v1229_v50 = vld [vmem:[#allocation2 + $0x80] sm:$0xff] }
 0x20c   : > { %v6036_v57 = vpop.f32.mrb[17].mxu0  ;;  %1195 = vst.msk [vmem:[#allocation2 + $0xc1] sm:$0xff] %vm1124_vm1, %v881_v63  ;;  %v1331_v4 = vshrl.u32 %v5988_v18, 16  ;;  %v1338_v10 = vshll.u32 %v5990_v19, 16  ;;  %v879_v11 = vmax.f32 %v789_v20, 0.0  ;;  %v2879_v13 = vsel %vm1293_vm3, %v5973_v1, %v2878_v62 }
 0x20d   : > { %1605 = vrot.lane.b32.xlu1 %v1562_v49, %s5290_s17  ;;  %v6044_v61 = vpop.f32.mrb[18].mxu0  ;;  %v1312_v14 = vor.u32 %v1311_v12, %v1307_v0  ;;  %v882_v51 = vmax.f32 %v800_v34, 0.0  ;;  %v792_v37 = vadd.f32 %v5908_v56, %v791_v35  ;;  %v2096_v17 = vsel %vm1293_vm3, %v6041_v16, %v2095_v3  ;;  %v1986_v19 = vld [vmem:[#allocation2 + $0xa0] sm:$0x3]  ;;  %v1230_v9 = vld [vmem:[#allocation2 + $0x88] sm:$0x3] }
 0x20e   : > { %v6051_v2 = vpop.f32.mrb[19].mxu0  ;;  %v6061_v54 = vor.u32 %v1335_v59, %v1331_v4  ;;  %1193 = vst.msk [vmem:[#allocation2 + $0xa9] sm:$0xff] %vm1124_vm1, %v879_v11  ;;  %v1316_v1 = vrot.slane %v1314_v31, 1  ;;  %v2057_v25 = vshll.u32 %v5975_v6, 16  ;;  %v1340_v26 = vrot.slane %v1338_v10, 1 }
 0x20f   : > { %1490 = vrot.lane.b32.xlu0 %v1329_v60, %s5289_s16  ;;  %1196 = vst.msk [vmem:[#allocation2 + $0xc9] sm:$0xff] %vm1124_vm1, %v882_v51  ;;  %v880_v23 = vmax.f32 %v792_v37, 0.0  ;;  %v2888_v27 = vshll.u32 %v6011_v42, 16  ;;  %v6072_v32 = vpack.c.bf16 %v1227_v15, %v1227_v15  ;;  %v6077_v28 = vpack.c.bf16 %v1986_v19, %v1986_v19  ;;  %v2796_v42 = vld [vmem:[#allocation2 + $0x70] sm:$0x3] }
 0x210   : > { %v1317_v40 = vsel %vm1293_vm3, %v1312_v14, %v1316_v1  ;;  %v1341_v41 = vsel %vm1293_vm3, %v6061_v54, %v1340_v26  ;;  %v2059_v43 = vrot.slane %v2057_v25, 1  ;;  %v6086_v46 = vpack.c.bf16 %v1985_v33, %v1984_v8  ;;  %v1977_v5 = vld [vmem:[#allocation2 + $0x58] sm:$0x3]  ;;  %v2799_v39 = vld [vmem:[#allocation2 + $0x88] sm:$0x3] }
 0x211   : > { %3174 = vrot.lane.b32.xlu1 %v3129_v45, %s5290_s17  ;;  %1194 = vst.msk [vmem:[#allocation2 + $0xb1] sm:$0xff] %vm1124_vm1, %v880_v23  ;;  %v2890_v48 = vrot.slane %v2888_v27, 1  ;;  %v1564_v49 = vrot.slane %v6072_v32, 1  ;;  %v2321_v53 = vrot.slane %v6077_v28, 1  ;;  %v6094_v55 = vpack.c.bf16 %v2796_v42, %v2796_v42 }
 0x212   : > { %v2060_v52 = vsel %vm1293_vm3, %v1312_v14, %v2059_v43  ;;  %v6091_v47 = vrot.slane %v6086_v46, 1  ;;  %v6099_v12 = vpack.c.bf16 %v1230_v9, %v1230_v9  ;;  %v813_v63 = vadd.f32 %v6032_v44, %v5908_v56 }
 0x213   : > { %3060 = vrot.lane.b32.xlu0 %v2879_v13, %s5289_s16  ;;  %v6064_v21 = vpop.f32.mrb[20].mxu0  ;;  %v2891_v60 = vsel %vm1293_vm3, %v6061_v54, %v2890_v48  ;;  %v805_v58 = vadd.f32 %v5908_v56, %v6036_v57  ;;  %v6108_v59 = vpack.c.bf16 %v1229_v50, %v1228_v30  ;;  %v6112_v62 = vpack.c.bf16 %v1977_v5, %v1977_v5 }
 0x214   : > { %v6069_v24 = vpop.f32.mrb[21].mxu0  ;;  %v6114_v0 = vpack.c.bf16 %v2799_v39, %v2799_v39  ;;  %v885_v31 = vmax.f32 %v813_v63, 0.0  ;;  %v1565_v44 = vsel %vm1550_vm4, %v5994_v22, %v1564_v49  ;;  %v2322_v57 = vsel %vm1550_vm4, %v6091_v47, %v2321_v53  ;;  %v1233_v39 = vld [vmem:[#allocation2 + $0xa0] sm:$0x3] }
 0x215   : > { %2247 = vrot.lane.b32.xlu1 %v2096_v17, %s5289_s16  ;;  %v6074_v35 = vpop.f32.mrb[22].mxu0  ;;  %v883_v34 = vmax.f32 %v805_v58, 0.0  ;;  %v3131_v4 = vrot.slane %v6094_v55, 1  ;;  %v816_v10 = vadd.f32 %v6044_v61, %v5908_v56  ;;  %v6129_v13 = vrot.slane %v6108_v59, 1 }
 0x216   : > { %v6080_v6 = vpop.f32.mrb[23].mxu0  ;;  %v1567_v14 = vrot.slane %v6099_v12, 1  ;;  %v2112_v15 = vshll.u32 %v6086_v46, 16  ;;  %1199 = vst.msk [vmem:[#allocation2 + $0xf1] sm:$0xff] %vm1124_vm1, %v885_v31  ;;  %v808_v51 = vadd.f32 %v5908_v56, %v6051_v2  ;;  %v1350_v61 = vshll.u32 %v6072_v32, 16 }
 0x217   : > { %1488 = vrot.lane.b32.xlu0 %v1317_v40, %s5289_s16  ;;  %1197 = vst.msk [vmem:[#allocation2 + $0xd9] sm:$0xff] %vm1124_vm1, %v883_v34  ;;  %v886_v37 = vmax.f32 %v816_v10, 0.0  ;;  %v2312_v17 = vrot.slane %v6112_v62, 1  ;;  %v3134_v19 = vrot.slane %v6114_v0, 1  ;;  %v2110_v1 = vshrl.u32 %v6086_v46, 16 }
 0x218   : > { %v884_v25 = vmax.f32 %v808_v51, 0.0  ;;  %v3132_v23 = vsel %vm1550_vm4, %v5994_v22, %v3131_v4  ;;  %v2117_v26 = vshll.u32 %v6077_v28, 16  ;;  %v829_v2 = vadd.f32 %v6064_v21, %v5908_v56 }
 0x219   : > { %1492 = vrot.lane.b32.xlu1 %v1341_v41, %s5289_s16  ;;  %1200 = vst.msk [vmem:[#allocation2 + $0xf9] sm:$0xff] %vm1124_vm1, %v886_v37  ;;  %v821_v27 = vadd.f32 %v5908_v56, %v6069_v24  ;;  %v1568_v32 = vsel %vm1550_vm4, %v6129_v13, %v1567_v14  ;;  %v2114_v8 = vrot.slane %v2112_v15, 1  ;;  %v1357_v33 = vshll.u32 %v6108_v59, 16  ;;  %v1991_v37 = vld [vmem:[#allocation2 + $0xc8] sm:$0xff] }
 0x21a   : > { %1198 = vst.msk [vmem:[#allocation2 + $0xe1] sm:$0xff] %vm1124_vm1, %v884_v25  ;;  %v832_v22 = vadd.f32 %v6074_v35, %v5908_v56  ;;  %v889_v21 = vmax.f32 %v829_v2, 0.0  ;;  %v2313_v41 = vsel %vm1550_vm4, %v6008_v38, %v2312_v17  ;;  %v1352_v42 = vrot.slane %v1350_v61, 1  ;;  %v1990_v61 = vld [vmem:[#allocation2 + $0xc0] sm:$0xff] }
 0x21b   : > { %2241 = vrot.lane.b32.xlu0 %v2060_v52, %s5289_s16  ;;  %v6105_v45 = vpop.f32.mrb[24].mxu0  ;;  %v887_v28 = vmax.f32 %v821_v27, 0.0  ;;  %v824_v9 = vadd.f32 %v5908_v56, %v6080_v6  ;;  %v3135_v35 = vsel %vm1550_vm4, %v6129_v13, %v3134_v19  ;;  %v2119_v49 = vrot.slane %v2117_v26, 1  ;;  %v1235_v26 = vld [vmem:[#allocation2 + $0xb0] sm:$0xff] }
 0x21c   : > { %v6110_v20 = vpop.f32.mrb[25].mxu0  ;;  %v890_v43 = vmax.f32 %v832_v22, 0.0  ;;  %v2900_v30 = vshll.u32 %v6094_v55, 16  ;;  %v1355_v50 = vshrl.u32 %v6108_v59, 16  ;;  %1203 = vst.msk [vmem:[#allocation2 + $0x121] sm:$0xff] %vm1124_vm1, %v889_v21  ;;  %v6177_v52 = vor.u32 %v2114_v8, %v2110_v1 }
 0x21d   : > { %3062 = vrot.lane.b32.xlu1 %v2891_v60, %s5289_s16  ;;  %v6116_v3 = vpop.f32.mrb[26].mxu0  ;;  %1201 = vst.msk [vmem:[#allocation2 + $0x109] sm:$0xff] %vm1124_vm1, %v887_v28  ;;  %v1359_v6 = vrot.slane %v1357_v33, 1  ;;  %v1362_v53 = vshll.u32 %v6099_v12, 16  ;;  %v888_v5 = vmax.f32 %v824_v9, 0.0  ;;  %v1353_v55 = vsel %vm1293_vm3, %v6041_v16, %v1352_v42  ;;  %v6226_v28 = vld [vmem:[#allocation13 + $0x60] sm:$0xff]  }
 0x21e   : > { %v6125_v11 = vpop.f32.mrb[27].mxu0  ;;  %1204 = vst.msk [vmem:[#allocation2 + $0x129] sm:$0xff] %vm1124_vm1, %v890_v43  ;;  %v2902_v60 = vrot.slane %v2900_v30, 1  ;;  %v2912_v63 = vshll.u32 %v6114_v0, 16  ;;  %v845_v58 = vadd.f32 %v6105_v45, %v5908_v56  ;;  %v837_v12 = vadd.f32 %v5908_v56, %v6110_v20  ;;  %v1992_v0 = vld [vmem:[#allocation2 + $0xd0] sm:$0x3]  ;;  %4661 = vmatprep.subr.bf16.mxu0 %v6226_v28 }
 0x21f   : > { %1607 = vrot.lane.b32.xlu0 %v1565_v44, %s5290_s17  ;;  %1202 = vst.msk [vmem:[#allocation2 + $0x111] sm:$0xff] %vm1124_vm1, %v888_v5  ;;  %v2120_v31 = vsel %vm1293_vm3, %v6177_v52, %v2119_v49  ;;  %v6193_v34 = vor.u32 %v1359_v6, %v1355_v50  ;;  %v1364_v44 = vrot.slane %v1362_v53, 1  ;;  %v6197_v4 = vpack.c.bf16 %v1233_v39, %v1233_v39  ;;  %v1983_v22 = vld [vmem:[#allocation2 + $0x88] sm:$0x3] }
 0x220   : > { %v893_v10 = vmax.f32 %v845_v58, 0.0  ;;  %v891_v45 = vmax.f32 %v837_v12, 0.0  ;;  %v848_v20 = vadd.f32 %v6116_v3, %v5908_v56  ;;  %v840_v14 = vadd.f32 %v5908_v56, %v6125_v11  ;;  %v1236_v11 = vld [vmem:[#allocation2 + $0xb8] sm:$0x3] }
 0x221   : > { %2363 = vrot.lane.b32.xlu1 %v2322_v57, %s5290_s17  ;;  %v2081_v57 = vshll.u32 %v6112_v62, 16  ;;  %v2903_v15 = vsel %vm1293_vm3, %v6041_v16, %v2902_v60  ;;  %v2914_v51 = vrot.slane %v2912_v63, 1  ;;  %v2802_v62 = vld [vmem:[#allocation2 + $0xa0] sm:$0x3]  ;;  %v1365_v3 = vsel %vm1293_vm3, %v6193_v34, %v1364_v44 }
 0x222   : > { %1207 = vst.msk [vmem:[#allocation2 + $0x151] sm:$0xff] %vm1124_vm1, %v893_v10  ;;  %1205 = vst.msk [vmem:[#allocation2 + $0x139] sm:$0xff] %vm1124_vm1, %v891_v45  ;;  %v894_v17 = vmax.f32 %v848_v20, 0.0  ;;  %v6210_v19 = vpack.c.bf16 %v1992_v0, %v1992_v0  ;;  %v892_v1 = vmax.f32 %v840_v14, 0.0  ;;  %v1570_v25 = vrot.slane %v6197_v4, 1 }
 0x223   : > { %3176 = vrot.lane.b32.xlu0 %v3132_v23, %s5290_s17  ;;  %v6157_v40 = vpop.f32.mrb[28].mxu0  ;;  %v2083_v16 = vrot.slane %v2081_v57, 1  ;;  %v1234_v23 = vld [vmem:[#allocation2 + $0xa8] sm:$0xff]  ;;  %v6215_v2 = vpack.c.bf16 %v1991_v37, %v1990_v61  ;;  %v2845_v27 = vpack.c.bf16 %v2802_v62, %v2802_v62  ;;  %v2915_v8 = vsel %vm1293_vm3, %v6193_v34, %v2914_v51  ;;  %v1240_v62 = vld [vmem:[#allocation2 + $0xd8] sm:$0xff] }
 0x224   : > { %v6160_v24 = vpop.f32.mrb[29].mxu0  ;;  %1208 = vst.msk [vmem:[#allocation2 + $0x159] sm:$0xff] %vm1124_vm1, %v894_v17  ;;  %1206 = vst.msk [vmem:[#allocation2 + $0x141] sm:$0xff] %vm1124_vm1, %v892_v1  ;;  %v6222_v33 = vpack.c.bf16 %v1236_v11, %v1236_v11  ;;  %v861_v21 = vadd.f32 %v6157_v40, %v5908_v56  ;;  %v2327_v42 = vrot.slane %v6210_v19, 1  ;;  %v6233_v43 = vpack.c.bf16 %v1235_v26, %v1234_v23  ;;  %v1241_v17 = vld [vmem:[#allocation2 + $0xe0] sm:$0xff] }
 0x225   : > { %1609 = vrot.lane.b32.xlu1 %v1568_v32, %s5290_s17  ;;  %v6166_v48 = vpop.f32.mrb[30].mxu0  ;;  %v2084_v32 = vsel %vm1293_vm3, %v6061_v54, %v2083_v16  ;;  %v2805_v54 = vld [vmem:[#allocation2 + $0xb8] sm:$0x3]  ;;  %v853_v9 = vadd.f32 %v5908_v56, %v6160_v24  ;;  %v1571_v40 = vsel %vm1550_vm4, %v6091_v47, %v1570_v25  ;;  %v3137_v30 = vrot.slane %v2845_v27, 1  ;;  %v1239_v11 = vld [vmem:[#allocation2 + $0xd0] sm:$0x3] }
 0x226   : > { %v6174_v38 = vpop.f32.mrb[31].mxu0  ;;  %v864_v49 = vadd.f32 %v6166_v48, %v5908_v56  ;;  %v6244_v50 = vrot.slane %v6233_v43, 1  ;;  %v2026_v6 = vpack.c.bf16 %v1983_v22, %v1983_v22  ;;  %v1573_v5 = vrot.slane %v6222_v33, 1 }
 0x227   : > { %2357 = vrot.lane.b32.xlu0 %v2313_v41, %s5290_s17  ;;  %v6230_v41 = vrot.slane %v6215_v2, 1  ;;  %v895_v53 = vmax.f32 %v853_v9, 0.0  ;;  %v2847_v24 = vpack.c.bf16 %v2805_v54, %v2805_v54  ;;  %v856_v39 = vadd.f32 %v5908_v56, %v6174_v38 }
 0x228   : > { %v2136_v60 = vshll.u32 %v6215_v2, 16  ;;  %v2318_v58 = vrot.slane %v2026_v6, 1  ;;  %v3138_v12 = vsel %vm1550_vm4, %v6091_v47, %v3137_v30  ;;  %v1574_v56 = vsel %vm1550_vm4, %v6244_v50, %v1573_v5 }
 0x229   : > { %3178 = vrot.lane.b32.xlu1 %v3135_v35, %s5290_s17  ;;  %v897_v35 = vmax.f32 %v861_v21, 0.0  ;;  %v2328_v48 = vsel %vm1550_vm4, %v6230_v41, %v2327_v42  ;;  %1209 = vst.msk [vmem:[#allocation2 + $0x169] sm:$0xff] %vm1124_vm1, %v895_v53  ;;  %v896_v63 = vmax.f32 %v856_v39, 0.0  ;;  %v3140_v38 = vrot.slane %v2847_v24, 1  ;;  %v1989_v21 = vld [vmem:[#allocation2 + $0xb8] sm:$0x3] }
 0x22a   : > { %v2134_v44 = vshrl.u32 %v6215_v2, 16  ;;  %v2138_v57 = vrot.slane %v2136_v60, 1  ;;  %v2141_v0 = vshll.u32 %v6210_v19, 16  ;;  %v1381_v10 = vshll.u32 %v6233_v43, 16  ;;  %v1247_v60 = vld [vmem:[#allocation2 + $0x110] sm:$0xff] }
 0x22b   : > { %1494 = vrot.lane.b32.xlu0 %v1353_v55, %s5289_s16  ;;  %1211 = vst.msk [vmem:[#allocation2 + $0x181] sm:$0xff] %vm1124_vm1, %v897_v35  ;;  %v898_v55 = vmax.f32 %v864_v49, 0.0  ;;  %1210 = vst.msk [vmem:[#allocation2 + $0x171] sm:$0xff] %vm1124_vm1, %v896_v63  ;;  %v2319_v47 = vsel %vm1550_vm4, %v6129_v13, %v2318_v58  ;;  %v3141_v45 = vsel %vm1550_vm4, %v6244_v50, %v3140_v38  ;;  %v2924_v20 = vshll.u32 %v2845_v27, 16  ;;  %v1242_v27 = vld [vmem:[#allocation2 + $0xe8] sm:$0x3] }
 0x22c   : > { %v1379_v14 = vshrl.u32 %v6233_v43, 16  ;;  %v2143_v51 = vrot.slane %v2141_v0, 1  ;;  %v1383_v61 = vrot.slane %v1381_v10, 1  ;;  %v1386_v37 = vshll.u32 %v6222_v33, 16  ;;  %v1997_v35 = vld [vmem:[#allocation2 + $0xf8] sm:$0xff] }
 0x22d   : > { %2251 = vrot.lane.b32.xlu1 %v2120_v31, %s5289_s16  ;;  %1212 = vst.msk [vmem:[#allocation2 + $0x189] sm:$0xff] %vm1124_vm1, %v898_v55  ;;  %v1374_v31 = vshll.u32 %v6197_v4, 16  ;;  %v2105_v19 = vshll.u32 %v2026_v6, 16  ;;  %v6280_v1 = vpack.c.bf16 %v1241_v17, %v1240_v62  ;;  %v2936_v26 = vshll.u32 %v2847_v24, 16  ;;  %v1998_v58 = vld [vmem:[#allocation2 + $0x100] sm:$0x3] }
 0x22e   : > { %v6285_v25 = vor.u32 %v1383_v61, %v1379_v14  ;;  %v1388_v23 = vrot.slane %v1386_v37, 1  ;;  %v1280_v22 = vpack.c.bf16 %v1242_v27, %v1242_v27  ;;  %v2030_v30 = vpack.c.bf16 %v1989_v21, %v1989_v21  ;;  %v1245_v14 = vld [vmem:[#allocation2 + $0x100] sm:$0x3] }
 0x22f   : > { %3064 = vrot.lane.b32.xlu0 %v2903_v15, %s5289_s16  ;;  %v1376_v4 = vrot.slane %v1374_v31, 1  ;;  %v6274_v15 = vor.u32 %v2138_v57, %v2134_v44  ;;  %v2107_v33 = vrot.slane %v2105_v19, 1  ;;  %v1405_v42 = vshll.u32 %v6280_v1, 16 }
 0x230   : > { %v1389_v54 = vsel %vm1293_vm3, %v6285_v25, %v1388_v23  ;;  %v2938_v9 = vrot.slane %v2936_v26, 1  ;;  %v1403_v6 = vshrl.u32 %v6280_v1, 16  ;;  %v1410_v5 = vshll.u32 %v1280_v22, 16  ;;  %v1254_v26 = vld [vmem:[#allocation2 + $0x148] sm:$0x3] }
 0x231   : > { %1496 = vrot.lane.b32.xlu1 %v1365_v3, %s5289_s16  ;;  %v1377_v13 = vsel %vm1293_vm3, %v6177_v52, %v1376_v4  ;;  %v2926_v3 = vrot.slane %v2924_v20, 1  ;;  %v2144_v16 = vsel %vm1293_vm3, %v6274_v15, %v2143_v51  ;;  %v1407_v53 = vrot.slane %v1405_v42, 1 }
 0x232   : > { %v2939_v24 = vsel %vm1293_vm3, %v6285_v25, %v2938_v9  ;;  %v6302_v55 = vrot.slane %v6280_v1, 1  ;;  %v1579_v39 = vrot.slane %v1280_v22, 1  ;;  %v1412_v31 = vrot.slane %v1410_v5, 1  ;;  %v1249_v22 = vld [vmem:[#allocation2 + $0x120] sm:$0xff]  ;;  %v1252_v9 = vld [vmem:[#allocation2 + $0x138] sm:$0xff] }
 0x233   : > { %2245 = vrot.lane.b32.xlu0 %v2084_v32, %s5289_s16  ;;  %v1278_v32 = vpack.c.bf16 %v1239_v11, %v1239_v11  ;;  %v6309_v38 = vor.u32 %v1407_v53, %v1403_v6  ;;  %v2129_v20 = vshll.u32 %v2030_v30, 16  ;;  %v1255_v11 = vld [vmem:[#allocation2 + $0x150] sm:$0xff]  ;;  %v1257_v6 = vld [vmem:[#allocation2 + $0x160] sm:$0x3] }
 0x234   : > { %v1580_v0 = vsel %vm1550_vm4, %v6302_v55, %v1579_v39 }
 0x235   : > { %3066 = vrot.lane.b32.xlu1 %v2915_v8, %s5289_s16  ;;  %v2927_v8 = vsel %vm1293_vm3, %v6177_v52, %v2926_v3  ;;  %v1576_v49 = vrot.slane %v1278_v32, 1  ;;  %v2108_v52 = vsel %vm1293_vm3, %v6193_v34, %v2107_v33  ;;  %v1248_v34 = vld [vmem:[#allocation2 + $0x118] sm:$0x3]  ;;  %v1398_v44 = vshll.u32 %v1278_v32, 16 }
 0x236   : > { %v1284_v10 = vpack.c.bf16 %v1248_v34, %v1248_v34  ;;  %v1413_v51 = vsel %vm1293_vm3, %v6309_v38, %v1412_v31  ;;  %v2131_v23 = vrot.slane %v2129_v20, 1  ;;  %v1251_v34 = vld [vmem:[#allocation2 + $0x130] sm:$0x3] }
 0x237   : > { %1611 = vrot.lane.b32.xlu0 %v1571_v40, %s5290_s17  ;;  %v1996_v40 = vld [vmem:[#allocation2 + $0xf0] sm:$0xff]  ;;  %v1400_v61 = vrot.slane %v1398_v44, 1 }
 0x238   : > { %v6304_v63 = vpack.c.bf16 %v1997_v35, %v1996_v40  ;;  %v1585_v17 = vrot.slane %v1284_v10, 1  ;;  %v1434_v33 = vshll.u32 %v1284_v10, 16  ;;  %v1253_v40 = vld [vmem:[#allocation2 + $0x140] sm:$0xff]  ;;  %v1250_v35 = vld [vmem:[#allocation2 + $0x128] sm:$0xff]  ;;  %v2132_v53 = vsel %vm1293_vm3, %v6285_v25, %v2131_v23 }
 0x239   : > { %2367 = vrot.lane.b32.xlu1 %v2328_v48, %s5290_s17  ;;  %v1246_v48 = vld [vmem:[#allocation2 + $0x108] sm:$0xff]  ;;  %v1401_v27 = vsel %vm1293_vm3, %v6274_v15, %v1400_v61  ;;  %v1286_v10 = vpack.c.bf16 %v1251_v34, %v1251_v34 }
 0x23a   : > { %v6311_v57 = vpack.c.bf16 %v1247_v60, %v1246_v48  ;;  %v6346_v5 = vrot.slane %v6304_v63, 1  ;;  %v1436_v48 = vrot.slane %v1434_v33, 1  ;;  %v6350_v60 = vpack.c.bf16 %v1253_v40, %v1252_v9  ;;  %v1260_v40 = vld [vmem:[#allocation2 + $0x178] sm:$0x3] }
 0x23b   : > { %3180 = vrot.lane.b32.xlu0 %v3138_v12, %s5290_s17  ;;  %v1577_v12 = vsel %vm1550_vm4, %v6230_v41, %v1576_v49  ;;  %v1292_v34 = vpack.c.bf16 %v1260_v40, %v1260_v40 }
 0x23c   : > { %v6325_v37 = vrot.slane %v6311_v57, 1  ;;  %v1429_v62 = vshll.u32 %v6311_v57, 16  ;;  %v1427_v32 = vshrl.u32 %v6311_v57, 16  ;;  %v6362_v44 = vrot.slane %v6350_v60, 1 }
 0x23d   : > { %1613 = vrot.lane.b32.xlu1 %v1574_v56, %s5290_s17  ;;  %v2324_v56 = vrot.slane %v2030_v30, 1 }
 0x23e   : > { %v1586_v21 = vsel %vm1550_vm4, %v6325_v37, %v1585_v17  ;;  %v1995_v17 = vld [vmem:[#allocation2 + $0xe8] sm:$0x3] }
 0x23f   : > { %2361 = vrot.lane.b32.xlu0 %v2319_v47, %s5290_s17  ;;  %v6316_v47 = vpack.c.bf16 %v1998_v58, %v1998_v58  ;;  %v2325_v4 = vsel %vm1550_vm4, %v6244_v50, %v2324_v56  ;;  %v1282_v50 = vpack.c.bf16 %v1245_v14, %v1245_v14  ;;  %v6352_v58 = vpack.c.bf16 %v1250_v35, %v1249_v22 }
 0x240   : > { %v6357_v56 = vpack.c.bf16 %v1257_v6, %v1257_v6  ;;  %v2034_v33 = vpack.c.bf16 %v1995_v17, %v1995_v17 }
 0x241   : > { %3182 = vrot.lane.b32.xlu1 %v3141_v45, %s5290_s17  ;;  %v2160_v45 = vshll.u32 %v6304_v63, 16  ;;  %v2165_v19 = vshll.u32 %v6316_v47, 16  ;;  %v1422_v30 = vshll.u32 %v1282_v50, 16  ;;  %v1441_v20 = vshll.u32 %v6352_v58, 16 }
 0x242   : > { %v1470_v61 = vshll.u32 %v6357_v56, 16  ;;  %v1439_v23 = vshrl.u32 %v6352_v58, 16  ;;  %v2330_v17 = vrot.slane %v2034_v33, 1 }
 0x243   : > { %1498 = vrot.lane.b32.xlu0 %v1377_v13, %s5289_s16  ;;  %v2158_v13 = vshrl.u32 %v6304_v63, 16  ;;  %v2162_v3 = vrot.slane %v2160_v45, 1  ;;  %v1424_v31 = vrot.slane %v1422_v30, 1 }
 0x245   : > { %2255 = vrot.lane.b32.xlu1 %v2144_v16, %s5289_s16  ;;  %v1256_v16 = vld [vmem:[#allocation2 + $0x158] sm:$0xff]  ;;  %v6338_v42 = vor.u32 %v2162_v3, %v2158_v13 }
 0x246   : > { %v6340_v49 = vpack.c.bf16 %v1256_v16, %v1255_v11  ;;  %v6379_v11 = vrot.slane %v6352_v58, 1  ;;  %v1588_v16 = vrot.slane %v1286_v10, 1 }
 0x247   : > { %3068 = vrot.lane.b32.xlu0 %v2927_v8, %s5289_s16  ;;  %v1431_v8 = vrot.slane %v1429_v62, 1  ;;  %v1453_v62 = vshll.u32 %v6350_v60, 16  ;;  %v1425_v13 = vsel %vm1293_vm3, %v6338_v42, %v1424_v31 }
 0x248   : > { %v1465_v25 = vshll.u32 %v6340_v49, 16  ;;  %v1463_v14 = vshrl.u32 %v6340_v49, 16  ;;  %v1589_v35 = vsel %vm1550_vm4, %v6379_v11, %v1588_v16 }
 0x249   : > { %1500 = vrot.lane.b32.xlu1 %v1389_v54, %s5289_s16  ;;  %v2167_v54 = vrot.slane %v2165_v19, 1  ;;  %v6348_v39 = vor.u32 %v1431_v8, %v1427_v32  ;;  %v1258_v19 = vld [vmem:[#allocation2 + $0x168] sm:$0xff]  ;;  %v1451_v32 = vshrl.u32 %v6350_v60, 16 }
 0x24b   : > { %2249 = vrot.lane.b32.xlu0 %v2108_v52, %s5289_s16  ;;  %v1288_v52 = vpack.c.bf16 %v1254_v26, %v1254_v26  ;;  %v1446_v26 = vshll.u32 %v1286_v10, 16 }
 0x24d   : > { %3070 = vrot.lane.b32.xlu1 %v2939_v24, %s5289_s16  ;;  %v1582_v24 = vrot.slane %v1282_v50, 1  ;;  %v1259_v50 = vld [vmem:[#allocation2 + $0x170] sm:$0xff]  ;;  %v1458_v8 = vshll.u32 %v1288_v52, 16  ;;  %v1448_v6 = vrot.slane %v1446_v26, 1 }
 0x24e   : > { %v6386_v9 = vpack.c.bf16 %v1259_v50, %v1258_v19 }
 0x24f   : > { %1615 = vrot.lane.b32.xlu0 %v1577_v12, %s5290_s17  ;;  %v2168_v12 = vsel %vm1293_vm3, %v6338_v42, %v2167_v54  ;;  %v1583_v45 = vsel %vm1550_vm4, %v6346_v5, %v1582_v24  ;;  %v1455_v54 = vrot.slane %v1453_v62, 1 }
 0x250   : > { %v1475_v10 = vshrl.u32 %v6386_v9, 16 }
 0x251   : > { %1617 = vrot.lane.b32.xlu1 %v1580_v0, %s5290_s17  ;;  %v1591_v0 = vrot.slane %v1288_v52, 1  ;;  %v2153_v52 = vshll.u32 %v2034_v33, 16 }
 0x253   : > { %2365 = vrot.lane.b32.xlu0 %v2325_v4, %s5290_s17  ;;  %v1437_v4 = vsel %vm1293_vm3, %v6348_v39, %v1436_v48  ;;  %v1592_v3 = vsel %vm1550_vm4, %v6362_v44, %v1591_v0  ;;  %v6396_v48 = vor.u32 %v1455_v54, %v1451_v32  ;;  %v2155_v31 = vrot.slane %v2153_v52, 1 }
 0x254   : > { %v6403_v0 = vrot.slane %v6386_v9, 1  ;;  %v6425_v32 = vrot.slane %v6340_v49, 1  ;;  %v2333_v54 = vrot.slane %v6316_v47, 1 }
 0x255   : > { %1504 = vrot.lane.b32.xlu1 %v1413_v51, %s5289_s16  ;;  %v1467_v51 = vrot.slane %v1465_v25, 1  ;;  %v2156_v62 = vsel %vm1293_vm3, %v6309_v38, %v2155_v31 }
 0x257   : > { %1502 = vrot.lane.b32.xlu0 %v1401_v27, %s5289_s16  ;;  %v1443_v27 = vrot.slane %v1441_v20, 1  ;;  %v6384_v22 = vor.u32 %v1467_v51, %v1463_v14  ;;  %v1482_v14 = vshll.u32 %v1292_v34, 16  ;;  %v2808_v51 = vld [vmem:[#allocation2 + $0xd0] sm:$0x3] }
 0x259   : > { %1621 = vrot.lane.b32.xlu1 %v1586_v21, %s5290_s17  ;;  %v1472_v21 = vrot.slane %v1470_v61, 1  ;;  %v6391_v30 = vor.u32 %v1443_v27, %v1439_v23  ;;  %v2811_v61 = vld [vmem:[#allocation2 + $0xe8] sm:$0x3]  ;;  %v1484_v50 = vrot.slane %v1482_v14, 1  ;;  %v2331_v27 = vsel %vm1550_vm4, %v6302_v55, %v2330_v17  ;;  %v2817_v17 = vld [vmem:[#allocation2 + $0x118] sm:$0x3] }
 0x25a   : > { %v2851_v16 = vpack.c.bf16 %v2811_v61, %v2811_v61 }
 0x25b   : > { %2253 = vrot.lane.b32.xlu0 %v2132_v53, %s5289_s16  ;;  %v1460_v53 = vrot.slane %v1458_v8, 1  ;;  %v1473_v24 = vsel %vm1293_vm3, %v6384_v22, %v1472_v21  ;;  %v1449_v25 = vsel %vm1293_vm3, %v6391_v30, %v1448_v6  ;;  %v1594_v8 = vrot.slane %v6357_v56, 1  ;;  %v2004_v6 = vld [vmem:[#allocation2 + $0x130] sm:$0x3] }
 0x25c   : > { %v2960_v40 = vshll.u32 %v2851_v16, 16 }
 0x25d   : > { %2259 = vrot.lane.b32.xlu1 %v2168_v12, %s5289_s16  ;;  %v1477_v12 = vshll.u32 %v6386_v9, 16  ;;  %v1595_v56 = vsel %vm1550_vm4, %v6425_v32, %v1594_v8  ;;  %v2855_v8 = vpack.c.bf16 %v2817_v17, %v2817_v17 }
 0x25e   : > { %v2962_v47 = vrot.slane %v2960_v40, 1 }
 0x25f   : > { %1619 = vrot.lane.b32.xlu0 %v1583_v45, %s5290_s17  ;;  %v1461_v45 = vsel %vm1293_vm3, %v6396_v48, %v1460_v53  ;;  %v1479_v20 = vrot.slane %v1477_v12, 1  ;;  %v2334_v12 = vsel %vm1550_vm4, %v6346_v5, %v2333_v54 }
 0x260   : > { %v2963_v14 = vsel %vm1293_vm3, %v6309_v38, %v2962_v47 }
 0x261   : > { %1508 = vrot.lane.b32.xlu1 %v1437_v4, %s5289_s16  ;;  %v1597_v4 = vrot.slane %v1292_v34, 1  ;;  %v6415_v19 = vor.u32 %v1479_v20, %v1475_v10 }
 0x263   : > { %1506 = vrot.lane.b32.xlu0 %v1425_v13, %s5289_s16  ;;  %v2849_v13 = vpack.c.bf16 %v2808_v51, %v2808_v51  ;;  %v1485_v21 = vsel %vm1293_vm3, %v6415_v19, %v1484_v50  ;;  %v3146_v51 = vrot.slane %v2851_v16, 1 }
 0x265   : > { %1625 = vrot.lane.b32.xlu1 %v1592_v3, %s5290_s17  ;;  %v1598_v3 = vsel %vm1550_vm4, %v6403_v0, %v1597_v4  ;;  %v2948_v33 = vshll.u32 %v2849_v13, 16  ;;  %v3143_v4 = vrot.slane %v2849_v13, 1  ;;  %v3147_v38 = vsel %vm1550_vm4, %v6302_v55, %v3146_v51  ;;  %v2010_v55 = vld [vmem:[#allocation2 + $0x160] sm:$0x3] }
 0x266   : > { %v6478_v51 = vpack.c.bf16 %v2010_v55, %v2010_v55 }
 0x267   : > { %1623 = vrot.lane.b32.xlu0 %v1589_v35, %s5290_s17  ;;  %v2001_v35 = vld [vmem:[#allocation2 + $0x118] sm:$0x3] }
 0x268   : > { %v2038_v34 = vpack.c.bf16 %v2001_v35, %v2001_v35 }
 0x269   : > { %1514 = vrot.lane.b32.xlu1 %v1473_v24, %s5289_s16  ;;  %v2950_v24 = vrot.slane %v2948_v33, 1 }
 0x26a   : > { %v2177_v20 = vshll.u32 %v2038_v34, 16  ;;  %v2336_v40 = vrot.slane %v2038_v34, 1 }
 0x26b   : > { %1510 = vrot.lane.b32.xlu0 %v1449_v25, %s5289_s16  ;;  %v2040_v25 = vpack.c.bf16 %v2004_v6, %v2004_v6 }
 0x26c   : > { %v2179_v13 = vrot.slane %v2177_v20, 1  ;;  %v2337_v34 = vsel %vm1550_vm4, %v6325_v37, %v2336_v40 }
 0x26d   : > { %1512 = vrot.lane.b32.xlu1 %v1461_v45, %s5289_s16  ;;  %v2951_v45 = vsel %vm1293_vm3, %v6274_v15, %v2950_v24  ;;  %v2189_v61 = vshll.u32 %v2040_v25, 16  ;;  %v3144_v15 = vsel %vm1550_vm4, %v6230_v41, %v3143_v4  ;;  %v2339_v6 = vrot.slane %v2040_v25, 1  ;;  %v2007_v24 = vld [vmem:[#allocation2 + $0x148] sm:$0x3] }
 0x26e   : > { %v2180_v54 = vsel %vm1293_vm3, %v6348_v39, %v2179_v13  ;;  %v6473_v20 = vpack.c.bf16 %v2007_v24, %v2007_v24 }
 0x26f   : > { %2257 = vrot.lane.b32.xlu0 %v2156_v62, %s5289_s16  ;;  %v2814_v62 = vld [vmem:[#allocation2 + $0x100] sm:$0x3]  ;;  %v2191_v16 = vrot.slane %v2189_v61, 1  ;;  %v2340_v25 = vsel %vm1550_vm4, %v6379_v11, %v2339_v6 }
 0x270   : > { %v2201_v40 = vshll.u32 %v6473_v20, 16 }
 0x271   : > { %1629 = vrot.lane.b32.xlu1 %v1598_v3, %s5290_s17  ;;  %v6418_v23 = vpop.permute.xlu0 %1603  ;;  %v2192_v41 = vsel %vm1293_vm3, %v6391_v30, %v2191_v16 }
 0x273   : > { %v6420_v26 = vpop.permute.xlu1 %1601  ;;  %2369 = vrot.lane.b32.xlu0 %v2331_v27, %s5290_s17  ;;  %v2853_v27 = vpack.c.bf16 %v2814_v62, %v2814_v62 }
 0x275   : > { %1516 = vrot.lane.b32.xlu1 %v1485_v21, %s5289_s16  ;;  %v6433_v53 = vpop.permute.xlu0 %2355  ;;  %v2972_v35 = vshll.u32 %v2853_v27, 16 }
 0x277   : > { %v6435_v52 = vpop.permute.xlu1 %2243  ;;  %1627 = vrot.lane.b32.xlu0 %v1595_v56, %s5290_s17  ;;  %v2984_v56 = vshll.u32 %v2855_v8, 16  ;;  %v2974_v4 = vrot.slane %v2972_v35, 1  ;;  %v2820_v35 = vld [vmem:[#allocation2 + $0x130] sm:$0x3] }
 0x278   : > { %v2388_v6 = vsel %vm1124_vm1, %v5936_v29, %v6435_v52 }
 0x279   : > { %2371 = vrot.lane.b32.xlu1 %v2334_v12, %s5290_s17  ;;  %v3173_v31 = vpop.permute.xlu0 %3172  ;;  %v2975_v16 = vsel %vm1293_vm3, %v6338_v42, %v2974_v4  ;;  %v2014_v4 = vld [vmem:[#allocation2 + $0x180] sm:$0xff] }
 0x27b   : > { %v6443_v10 = vpop.permute.xlu1 %2359  ;;  %3072 = vrot.lane.b32.xlu0 %v2951_v45, %s5289_s16 }
 0x27d   : > { %3074 = vrot.lane.b32.xlu1 %v2963_v14, %s5289_s16  ;;  %v6451_v3 = vpop.permute.xlu0 %2353  ;;  %v2986_v14 = vrot.slane %v2984_v56, 1  ;;  %v6505_v56 = vpack.c.bf16 %v2820_v35, %v2820_v35 }
 0x27f   : > { %v6453_v50 = vpop.permute.xlu1 %1605  ;;  %3184 = vrot.lane.b32.xlu0 %v3144_v15, %s5290_s17  ;;  %v3149_v15 = vrot.slane %v2853_v27, 1  ;;  %v2987_v27 = vsel %vm1293_vm3, %v6348_v39, %v2986_v14 }
 0x281   : > { %3186 = vrot.lane.b32.xlu1 %v3147_v38, %s5290_s17  ;;  %v1491_v33 = vpop.permute.xlu0 %1490  ;;  %v3150_v55 = vsel %vm1550_vm4, %v6346_v5, %v3149_v15  ;;  %v2420_v5 = vsel %vm657_vm0, %v2388_v6, %v6433_v53  ;;  %v4932_v15 = vld [vmem:[#allocation13 + $0x78] sm:$0xff]   ;;  %v2826_v6 = vld [vmem:[#allocation2 + $0x160] sm:$0x3] }
 0x282   : > { %v1636_v62 = vsel %vm1124_vm1, %v5936_v29, %v1491_v33  ;;  %v2213_v33 = vshll.u32 %v6478_v51, 16 }
 0x283   : > { %v3175_v21 = vpop.permute.xlu1 %3174  ;;  %2261 = vrot.lane.b32.xlu0 %v2180_v54, %s5289_s16  ;;  %v3152_v54 = vrot.slane %v2855_v8, 1  ;;  %v1668_v42 = vsel %vm657_vm0, %v1636_v62, %v6418_v23  ;;  %v2823_v8 = vld [vmem:[#allocation2 + $0x148] sm:$0x3]  ;;  %v2342_v62 = vrot.slane %v6473_v20, 1  ;;  %v2016_v20 = vld [vmem:[#allocation2 + $0x190] sm:$0x3] }
 0x285   : > { %2263 = vrot.lane.b32.xlu1 %v2192_v41, %s5289_s16  ;;  %v3061_v12 = vpop.permute.xlu0 %3060  ;;  %v3153_v23 = vsel %vm1550_vm4, %v6325_v37, %v3152_v54  ;;  %v2343_v35 = vsel %vm1550_vm4, %v6362_v44, %v2342_v62 }
 0x286   : > { %v3205_v47 = vsel %vm1124_vm1, %v5936_v29, %v3061_v12  ;;  %v2203_v12 = vrot.slane %v2201_v40, 1  ;;  %v4931_v29 = vld [vmem:[#allocation13 + $0x70] sm:$0xff]  }
 0x287   : > { %v6469_v45 = vpop.permute.xlu1 %2247  ;;  %2373 = vrot.lane.b32.xlu0 %v2337_v34, %s5290_s17  ;;  %v6481_v61 = vsel %vm657_vm0, %v3205_v47, %v3173_v31  ;;  %v4930_v31 = vld [vmem:[#allocation13 + $0x68] sm:$0xff]   ;;  %v2215_v47 = vrot.slane %v2213_v33, 1 }
 0x288   : > { %v2204_v53 = vsel %vm1293_vm3, %v6396_v48, %v2203_v12 }
 0x289   : > { %2375 = vrot.lane.b32.xlu1 %v2340_v25, %s5290_s17  ;;  %v1489_v17 = vpop.permute.xlu0 %1488  ;;  %v2015_v25 = vld [vmem:[#allocation2 + $0x188] sm:$0xff] }
 0x28a   : > { %v1634_v13 = vsel %vm1124_vm1, %v5943_v36, %v1489_v17  ;;  %v2996_v17 = vshll.u32 %v6505_v56, 16  ;;  %v6544_v54 = vpack.c.bf16 %v2015_v25, %v2014_v4 }
 0x28b   : > { %v1493_v38 = vpop.permute.xlu1 %1492  ;;  %v1666_v41 = vsel %vm657_vm0, %v1634_v13, %v6420_v26  ;;  %3076 = vrot.lane.b32.xlu0 %v2975_v16, %s5289_s16  ;;  %v2216_v13 = vsel %vm1293_vm3, %v6384_v22, %v2215_v47 }
 0x28c   : > { %4586 = vmatmul.mubr.msk.bf16.vlgmr.msra.gmra.mrb[32].mxu0 %vm1743_vm5, %v1666_v41  ;;  %v1638_v37 = vsel %vm1124_vm1, %v5988_v18, %v1493_v38  ;;  %v2013_v41 = vld [vmem:[#allocation2 + $0x178] sm:$0x3]  ;;  %v2230_v47 = vshrl.u32 %v6544_v54, 16 }
 0x28d   : > { %3078 = vrot.lane.b32.xlu1 %v2987_v27, %s5289_s16  ;;  %4589 = vmatprep.mubr.msk.bf16.mxu0 %vm1743_vm5, %v1668_v42  ;;  %v2242_v26 = vpop.permute.xlu0 %2241  ;;  %v1670_v38 = vsel %vm657_vm0, %v1638_v37, %v6453_v50  ;;  %v4933_v50 = vld [vmem:[#allocation13 + $0x80] sm:$0xff]   ;;  %v6557_v42 = vpack.c.bf16 %v2016_v20, %v2016_v20  ;;  %v2350_v20 = vrot.slane %v6544_v54, 1 }
 0x28e   : > { %4662 = vmatpush3.bf16.msra.mxu0 %v6226_v28  ;;  %v2386_v39 = vsel %vm1124_vm1, %v5943_v36, %v2242_v26  ;;  %v6519_v36 = vpack.c.bf16 %v2823_v8, %v2823_v8  ;;  %v2232_v8 = vshll.u32 %v6544_v54, 16 }
 0x28f   : > { %v3063_v24 = vpop.permute.xlu1 %3062  ;;  %4663 = vmatprep.subr.bf16.mxu0 %v4930_v31  ;;  %3188 = vrot.lane.b32.xlu0 %v3150_v55, %s5290_s17  ;;  %v2418_v28 = vsel %vm657_vm0, %v2386_v39, %v6451_v3  ;;  %v2046_v39 = vpack.c.bf16 %v2013_v41, %v2013_v41  ;;  %v2237_v37 = vshll.u32 %v6557_v42, 16 }
 0x290   : > { %v3207_v52 = vsel %vm1124_vm1, %v5988_v18, %v3063_v24  ;;  %4629 = vmatprep.mubr.msk.bf16.mxu1 %vm1743_vm5, %v2418_v28  ;;  %v3008_v16 = vshll.u32 %v6519_v36, 16  ;;  %v3158_v12 = vrot.slane %v6519_v36, 1 }
 0x291   : > { %v6526_v34 = vsel %vm657_vm0, %v3207_v52, %v3175_v21  ;;  %3190 = vrot.lane.b32.xlu1 %v3153_v23, %s5290_s17  ;;  %4630 = vmatmul.mubr.msk.bf16.vlgmr.msra.gmra.mrb[32].mxu1 %vm1743_vm5, %v2420_v5  ;;  %v1608_v3 = vpop.permute.xlu0 %1607  ;;  %v2345_v21 = vrot.slane %v6478_v51, 1  ;;  %v3155_v23 = vrot.slane %v6505_v56, 1  ;;  %v4934_v52 = vld [vmem:[#allocation13 + $0x88] sm:$0xff]   ;;  %v2234_v5 = vrot.slane %v2232_v8, 1 }
 0x292   : > { %4664 = vmatpush3.bf16.msra.mxu0 %v4930_v31  ;;  %v2998_v31 = vrot.slane %v2996_v17, 1  ;;  %v3010_v33 = vrot.slane %v3008_v16, 1  ;;  %v2348_v4 = vrot.slane %v2046_v39, 1  ;;  %v2834_v17 = vld [vmem:[#allocation2 + $0x1a0] sm:$0xff] }
 0x293   : > { %v6531_v14 = vpop.permute.xlu1 %2363  ;;  %4665 = vmatprep.subr.bf16.mxu0 %v4931_v29  ;;  %2265 = vrot.lane.b32.xlu0 %v2204_v53, %s5289_s16  ;;  %v2346_v27 = vsel %vm1550_vm4, %v6425_v32, %v2345_v21  ;;  %v3156_v53 = vsel %vm1550_vm4, %v6379_v11, %v3155_v23  ;;  %v2833_v21 = vld [vmem:[#allocation2 + $0x198] sm:$0xff]  ;;  %v2832_v23 = vld [vmem:[#allocation2 + $0x190] sm:$0x3] }
 0x294   : > { %4590 = vmatmul.mubr.msk.bf16.gmra.mrb[36].mxu0 %vm1743_vm5, %v1670_v38  ;;  %v2999_v55 = vsel %vm1293_vm3, %v6391_v30, %v2998_v31  ;;  %v3011_v28 = vsel %vm1293_vm3, %v6396_v48, %v3010_v33  ;;  %v2829_v30 = vld [vmem:[#allocation2 + $0x178] sm:$0x3]  ;;  %v3159_v48 = vsel %vm1550_vm4, %v6362_v44, %v3158_v12  ;;  %v2239_v38 = vrot.slane %v2237_v37, 1  ;;  %v2835_v33 = vld [vmem:[#allocation2 + $0x1a8] sm:$0x3] }
 0x295   : > { %2267 = vrot.lane.b32.xlu1 %v2216_v13, %s5289_s16  ;;  %v6548_v51 = vpop.permute.xlu0 %3176  ;;  %v6588_v13 = vor.u32 %v2234_v5, %v2230_v47  ;;  %v6590_v16 = vpack.c.bf16 %v2829_v30, %v2829_v30  ;;  %v2349_v44 = vsel %vm1550_vm4, %v6403_v0, %v2348_v4 }
 0x296   : > { %4666 = vmatpush3.bf16.msra.mxu0 %v4931_v29  ;;  %v6569_v29 = vpack.c.bf16 %v2826_v6, %v2826_v6 }
 0x297   : > { %v6550_v40 = vpop.permute.xlu1 %1609  ;;  %4667 = vmatprep.subr.bf16.mxu0 %v4932_v15  ;;  %2377 = vrot.lane.b32.xlu0 %v2343_v35, %s5290_s17  ;;  %v6597_v35 = vpack.c.bf16 %v2834_v17, %v2833_v21  ;;  %v2240_v6 = vsel %vm1293_vm3, %v6588_v13, %v2239_v38 }
 0x298   : > { %v3020_v62 = vshll.u32 %v6569_v29, 16  ;;  %v3161_v17 = vrot.slane %v6569_v29, 1 }
 0x299   : > { %2379 = vrot.lane.b32.xlu1 %v2346_v27, %s5290_s17  ;;  %v6561_v26 = vpop.permute.xlu0 %2357  ;;  %v2225_v27 = vshll.u32 %v2046_v39, 16  ;;  %v2392_v39 = vsel %vm1124_vm1, %v5978_v7, %v6469_v45  ;;  %v3051_v47 = vshll.u32 %v6597_v35, 16 }
 0x29a   : > { %4668 = vmatpush3.bf16.msra.mxu0 %v4932_v15  ;;  %v3022_v41 = vrot.slane %v3020_v62, 1 }
 0x29b   : > { %v6563_v24 = vpop.permute.xlu1 %3178  ;;  %4669 = vmatprep.subr.bf16.mxu0 %v4933_v50  ;;  %3080 = vrot.lane.b32.xlu0 %v2999_v55, %s5289_s16  ;;  %v3032_v55 = vshll.u32 %v6590_v16, 16  ;;  %v2227_v30 = vrot.slane %v2225_v27, 1 }
 0x29c   : > { %v3023_v37 = vsel %vm1293_vm3, %v6384_v22, %v3022_v41 }
 0x29d   : > { %3082 = vrot.lane.b32.xlu1 %v3011_v28, %s5289_s16  ;;  %v1495_v56 = vpop.permute.xlu0 %1494  ;;  %v2867_v28 = vpack.c.bf16 %v2835_v33, %v2835_v33  ;;  %v3034_v4 = vrot.slane %v3032_v55, 1  ;;  %v2228_v21 = vsel %vm1293_vm3, %v6415_v19, %v2227_v30 }
 0x29e   : > { %4670 = vmatpush3.bf16.msra.mxu0 %v4933_v50  ;;  %v1640_v36 = vsel %vm1124_vm1, %v5978_v7, %v1495_v56  ;;  %v2351_v50 = vrot.slane %v6557_v42, 1  ;;  %v2865_v56 = vpack.c.bf16 %v2832_v23, %v2832_v23 }
 0x29f   : > { %v6579_v25 = vpop.permute.xlu1 %2251  ;;  %4671 = vmatprep.subr.bf16.mxu0 %v4934_v52  ;;  %3192 = vrot.lane.b32.xlu0 %v3156_v53, %s5290_s17  ;;  %v1672_v15 = vsel %vm657_vm0, %v1640_v36, %v1608_v3  ;;  %v3049_v53 = vshrl.u32 %v6597_v35, 16  ;;  %v3056_v62 = vshll.u32 %v2867_v28, 16  ;;  %v3170_v27 = vrot.slane %v2867_v28, 1 }
 0x2a0   : > { %4593 = vmatprep.mubr.msk.bf16.mxu0 %vm1743_vm5, %v1672_v15  ;;  %v3044_v15 = vshll.u32 %v2865_v56, 16 }
 0x2a1   : > { %3194 = vrot.lane.b32.xlu1 %v3159_v48, %s5290_s17  ;;  %v3065_v11 = vpop.permute.xlu0 %3064  ;;  %v3053_v48 = vrot.slane %v3051_v47, 1 }
 0x2a2   : > { %4672 = vmatpush3.bf16.msra.mxu0 %v4934_v52  ;;  %v3209_v3 = vsel %vm1124_vm1, %v5978_v7, %v3065_v11  ;;  %v2352_v7 = vsel %vm1550_vm4, %v2350_v20, %v2351_v50  ;;  %v3046_v41 = vrot.slane %v3044_v15, 1  ;;  %v3169_v50 = vrot.slane %v6597_v35, 1 }
 0x2a3   : > { %v1497_v31 = vpop.permute.xlu1 %1496  ;;  %2381 = vrot.lane.b32.xlu0 %v2349_v44, %s5290_s17  ;;  %v6610_v12 = vsel %vm657_vm0, %v3209_v3, %v6548_v51  ;;  %v3054_v11 = vor.u32 %v3053_v48, %v3049_v53  ;;  %v3058_v44 = vrot.slane %v3056_v62, 1 }
 0x2a4   : > { %v1642_v8 = vsel %vm1124_vm1, %v6108_v59, %v1497_v31  ;;  %v3162_v31 = vsel %vm1550_vm4, %v6425_v32, %v3161_v17 }
 0x2a5   : > { %2271 = vrot.lane.b32.xlu1 %v2240_v6, %s5289_s16  ;;  %v1674_v42 = vsel %vm657_vm0, %v1642_v8, %v6550_v40  ;;  %v2246_v52 = vpop.permute.xlu0 %2245  ;;  %v3047_v8 = vsel %vm1293_vm3, %v6588_v13, %v3046_v41  ;;  %v3167_v6 = vrot.slane %v2865_v56, 1 }
 0x2a6   : > { %4594 = vmatmul.mubr.msk.bf16.gmra.mrb[40].mxu0 %vm1743_vm5, %v1674_v42  ;;  %v2390_v5 = vsel %vm1124_vm1, %v5988_v18, %v2246_v52  ;;  %v2424_v18 = vsel %vm657_vm0, %v2392_v39, %v6443_v10  ;;  %v3035_v10 = vsel %vm1293_vm3, %v6415_v19, %v3034_v4 }
 0x2a7   : > { %v3067_v51 = vpop.permute.xlu1 %3066  ;;  %3084 = vrot.lane.b32.xlu0 %v3023_v37, %s5289_s16  ;;  %v2422_v45 = vsel %vm657_vm0, %v2390_v5, %v6561_v26  ;;  %v3168_v42 = vsel %vm1550_vm4, %v2350_v20, %v3167_v6 }
 0x2a8   : > { %v3211_v40 = vsel %vm1124_vm1, %v6108_v59, %v3067_v51  ;;  %4633 = vmatprep.mubr.msk.bf16.mxu1 %vm1743_vm5, %v2422_v45  ;;  %v2396_v51 = vsel %vm1124_vm1, %v6086_v46, %v6579_v25 }
 0x2a9   : > { %2383 = vrot.lane.b32.xlu1 %v2352_v7, %s5290_s17  ;;  %v6638_v22 = vsel %vm657_vm0, %v3211_v40, %v6563_v24  ;;  %4634 = vmatmul.mubr.msk.bf16.gmra.mrb[36].mxu1 %vm1743_vm5, %v2424_v18  ;;  %v1612_v36 = vpop.permute.xlu0 %1611  ;;  %v3164_v24 = vrot.slane %v6590_v16, 1  ;;  %v3059_v16 = vsel %vm1293_vm3, %v3054_v11, %v3058_v44  ;;  %v2428_v45 = vsel %vm657_vm0, %v2396_v51, %v6531_v14 }
 0x2ab   : > { %v6642_v26 = vpop.permute.xlu1 %2367  ;;  %2269 = vrot.lane.b32.xlu0 %v2228_v21, %s5289_s16  ;;  %v3165_v29 = vsel %vm1550_vm4, %v6403_v0, %v3164_v24  ;;  %v3171_v0 = vsel %vm1550_vm4, %v3169_v50, %v3170_v27 }
 0x2ad   : > { %3086 = vrot.lane.b32.xlu1 %v3035_v10, %s5289_s16  ;;  %v3181_v38 = vpop.permute.xlu0 %3180 }
 0x2af   : > { %v1614_v3 = vpop.permute.xlu1 %1613  ;;  %3196 = vrot.lane.b32.xlu0 %v3162_v31, %s5290_s17 }
 0x2b1   : > { %3198 = vrot.lane.b32.xlu1 %v3165_v29, %s5290_s17  ;;  %v2362_v19 = vpop.permute.xlu0 %2361 }
 0x2b3   : > { %v3183_v33 = vpop.permute.xlu1 %3182  ;;  %3088 = vrot.lane.b32.xlu0 %v3047_v8, %s5289_s16 }
 0x2b5   : > { %3090 = vrot.lane.b32.xlu1 %v3059_v16, %s5289_s16  ;;  %v1499_v32 = vpop.permute.xlu0 %1498 }
 0x2b6   : > { %v1644_v55 = vsel %vm1124_vm1, %v6086_v46, %v1499_v32 }
 0x2b7   : > { %v2256_v23 = vpop.permute.xlu1 %2255  ;;  %3200 = vrot.lane.b32.xlu0 %v3168_v42, %s5290_s17  ;;  %v1676_v13 = vsel %vm657_vm0, %v1644_v55, %v1612_v36 }
 0x2b8   : > { %4597 = vmatprep.mubr.msk.bf16.mxu0 %vm1743_vm5, %v1676_v13  ;;  %v2400_v17 = vsel %vm1124_vm1, %v6215_v2, %v2256_v23 }
 0x2b9   : > { %3202 = vrot.lane.b32.xlu1 %v3171_v0, %s5290_s17  ;;  %v3069_v39 = vpop.permute.xlu0 %3068  ;;  %v2432_v11 = vsel %vm657_vm0, %v2400_v17, %v6642_v26 }
 0x2ba   : > { %v3213_v52 = vsel %vm1124_vm1, %v6086_v46, %v3069_v39 }
 0x2bb   : > { %v1501_v28 = vpop.permute.xlu1 %1500  ;;  %v6679_v5 = vsel %vm657_vm0, %v3213_v52, %v3181_v38 }
 0x2bc   : > { %v1646_v47 = vsel %vm1124_vm1, %v6233_v43, %v1501_v28 }
 0x2bd   : > { %v1678_v20 = vsel %vm657_vm0, %v1646_v47, %v1614_v3  ;;  %v2250_v37 = vpop.permute.xlu0 %2249 }
 0x2be   : > { %4598 = vmatmul.mubr.msk.bf16.gmra.mrb[44].mxu0 %vm1743_vm5, %v1678_v20  ;;  %v2394_v30 = vsel %vm1124_vm1, %v6108_v59, %v2250_v37 }
 0x2bf   : > { %v3071_v56 = vpop.permute.xlu1 %3070  ;;  %v2426_v7 = vsel %vm657_vm0, %v2394_v30, %v2362_v19 }
 0x2c0   : > { %v3215_v40 = vsel %vm1124_vm1, %v6233_v43, %v3071_v56  ;;  %4637 = vmatprep.mubr.msk.bf16.mxu1 %vm1743_vm5, %v2426_v7 }
 0x2c1   : > { %v6695_v4 = vsel %vm657_vm0, %v3215_v40, %v3183_v33  ;;  %4638 = vmatmul.mubr.msk.bf16.gmra.mrb[40].mxu1 %vm1743_vm5, %v2428_v45  ;;  %v1616_v46 = vpop.permute.xlu0 %1615 }
 0x2c3   : > { %v1618_v25 = vpop.permute.xlu1 %1617 }
 0x2c5   : > { %v2366_v18 = vpop.permute.xlu0 %2365 }
 0x2c7   : > { %v1505_v59 = vpop.permute.xlu1 %1504 }
 0x2c8   : > { %v1650_v36 = vsel %vm1124_vm1, %v6280_v1, %v1505_v59 }
 0x2c9   : > { %v1503_v53 = vpop.permute.xlu0 %1502  ;;  %v1682_v14 = vsel %vm657_vm0, %v1650_v36, %v1618_v25 }
 0x2ca   : > { %v1648_v48 = vsel %vm1124_vm1, %v6215_v2, %v1503_v53 }
 0x2cb   : > { %v1622_v62 = vpop.permute.xlu1 %1621  ;;  %v1680_v21 = vsel %vm657_vm0, %v1648_v48, %v1616_v46 }
 0x2cc   : > { %4601 = vmatprep.mubr.msk.bf16.mxu0 %vm1743_vm5, %v1680_v21 }
 0x2cd   : > { %4602 = vmatmul.mubr.msk.bf16.gmra.mrb[48].mxu0 %vm1743_vm5, %v1682_v14  ;;  %v2254_v15 = vpop.permute.xlu0 %2253 }
 0x2ce   : > { %v2398_v10 = vsel %vm1124_vm1, %v6233_v43, %v2254_v15 }
 0x2cf   : > { %v2260_v24 = vpop.permute.xlu1 %2259  ;;  %v2430_v38 = vsel %vm657_vm0, %v2398_v10, %v2366_v18 }
 0x2d0   : > { %4641 = vmatprep.mubr.msk.bf16.mxu1 %vm1743_vm5, %v2430_v38  ;;  %v2404_v51 = vsel %vm1124_vm1, %v6304_v63, %v2260_v24 }
 0x2d1   : > { %4642 = vmatmul.mubr.msk.bf16.gmra.mrb[44].mxu1 %vm1743_vm5, %v2432_v11  ;;  %v1620_v44 = vpop.permute.xlu0 %1619 }
 0x2d3   : > { %v1509_v3 = vpop.permute.xlu1 %1508 }
 0x2d4   : > { %v1654_v31 = vsel %vm1124_vm1, %v6311_v57, %v1509_v3 }
 0x2d5   : > { %v1507_v41 = vpop.permute.xlu0 %1506  ;;  %v1686_v16 = vsel %vm657_vm0, %v1654_v31, %v1622_v62 }
 0x2d6   : > { %v1652_v29 = vsel %vm1124_vm1, %v6304_v63, %v1507_v41 }
 0x2d7   : > { %v1626_v43 = vpop.permute.xlu1 %1625  ;;  %v1684_v19 = vsel %vm657_vm0, %v1652_v29, %v1620_v44 }
 0x2d8   : > { %4605 = vmatprep.mubr.msk.bf16.mxu0 %vm1743_vm5, %v1684_v19 }
 0x2d9   : > { %4606 = vmatmul.mubr.msk.bf16.gmra.mrb[52].mxu0 %vm1743_vm5, %v1686_v16  ;;  %v1624_v26 = vpop.permute.xlu0 %1623 }
 0x2db   : > { %v1515_v50 = vpop.permute.xlu1 %1514 }
 0x2dc   : > { %v1660_v47 = vsel %vm1124_vm1, %v6340_v49, %v1515_v50 }
 0x2dd   : > { %v1511_v27 = vpop.permute.xlu0 %1510 }
 0x2de   : > { %v1656_v33 = vsel %vm1124_vm1, %v6352_v58, %v1511_v27 }
 0x2df   : > { %v1513_v8 = vpop.permute.xlu1 %1512  ;;  %v1688_v32 = vsel %vm657_vm0, %v1656_v33, %v1624_v26 }
 0x2e0   : > { %v1658_v6 = vsel %vm1124_vm1, %v6350_v60, %v1513_v8  ;;  %4609 = vmatprep.mubr.msk.bf16.mxu0 %vm1743_vm5, %v1688_v32 }
 0x2e1   : > { %v1690_v0 = vsel %vm657_vm0, %v1658_v6, %v1626_v43  ;;  %v2258_v55 = vpop.permute.xlu0 %2257 }
 0x2e2   : > { %4610 = vmatmul.mubr.msk.bf16.gmra.mrb[56].mxu0 %vm1743_vm5, %v1690_v0  ;;  %v2402_v42 = vsel %vm1124_vm1, %v6280_v1, %v2258_v55 }
 0x2e3   : > { %v1630_v23 = vpop.permute.xlu1 %1629 }
 0x2e5   : > { %v2370_v13 = vpop.permute.xlu0 %2369 }
 0x2e6   : > { %v2434_v39 = vsel %vm657_vm0, %v2402_v42, %v2370_v13 }
 0x2e7   : > { %v1517_v52 = vpop.permute.xlu1 %1516  ;;  %4645 = vmatprep.mubr.msk.bf16.mxu1 %vm1743_vm5, %v2434_v39 }
 0x2e8   : > { %v1662_v28 = vsel %vm1124_vm1, %v6386_v9, %v1517_v52 }
 0x2e9   : > { %v1628_v20 = vpop.permute.xlu0 %1627  ;;  %v1694_v40 = vsel %vm657_vm0, %v1662_v28, %v1630_v23 }
 0x2ea   : > { %v1692_v37 = vsel %vm657_vm0, %v1660_v47, %v1628_v20 }
 0x2eb   : > { %v2372_v30 = vpop.permute.xlu1 %2371  ;;  %4613 = vmatprep.mubr.msk.bf16.mxu0 %vm1743_vm5, %v1692_v37 }
 0x2ec   : > { %v2436_v56 = vsel %vm657_vm0, %v2404_v51, %v2372_v30  ;;  %4614 = vmatmul.mubr.msk.bf16.gmra.mrb[60].mxu0 %vm1743_vm5, %v1694_v40 }
 0x2ed   : > { %4646 = vmatmul.mubr.msk.bf16.gmra.mrb[48].mxu1 %vm1743_vm5, %v2436_v56  ;;  %4673 = vmatprep.mubr.msk.bf16.mxu0 %vm1743_vm5, %v6481_v61  ;;  %v3073_v7 = vpop.permute.xlu0 %3072 }
 0x2ee   : > { %v3217_v15 = vsel %vm1124_vm1, %v6215_v2, %v3073_v7 }
 0x2ef   : > { %v3075_v45 = vpop.permute.xlu1 %3074 }
 0x2f0   : > { %v3219_v11 = vsel %vm1124_vm1, %v6280_v1, %v3075_v45 }
 0x2f1   : > { %v3185_v46 = vpop.permute.xlu0 %3184 }
 0x2f2   : > { %v3249_v10 = vsel %vm657_vm0, %v3217_v15, %v3185_v46 }
 0x2f3   : > { %v3187_v25 = vpop.permute.xlu1 %3186 }
 0x2f4   : > { %4674 = vmatmul.mubr.msk.bf16.vlgmr.msra.gmra.mrb[64].mxu0 %vm1743_vm5, %v6526_v34  ;;  %v3251_v31 = vsel %vm657_vm0, %v3219_v11, %v3187_v25  ;;  %v4936_v25 = vld [vmem:[#allocation16 + $0x8] sm:$0xff]  }
 0x2f5   : > { %4677 = vmatprep.mubr.msk.bf16.mxu0 %vm1743_vm5, %v6610_v12  ;;  %v2262_v18 = vpop.permute.xlu0 %2261 }
 0x2f6   : > { %v2406_v36 = vsel %vm1124_vm1, %v6311_v57, %v2262_v18 }
 0x2f7   : > { %v2264_v59 = vpop.permute.xlu1 %2263 }
 0x2f8   : > { %v2408_v48 = vsel %vm1124_vm1, %v6352_v58, %v2264_v59 }
 0x2f9   : > { %v2374_v53 = vpop.permute.xlu0 %2373 }
 0x2fa   : > { %v2438_v61 = vsel %vm657_vm0, %v2406_v36, %v2374_v53 }
 0x2fb   : > { %v2376_v62 = vpop.permute.xlu1 %2375  ;;  %4649 = vmatprep.mubr.msk.bf16.mxu1 %vm1743_vm5, %v2438_v61 }
 0x2fc   : > { %v2440_v21 = vsel %vm657_vm0, %v2408_v48, %v2376_v62  ;;  %4678 = vmatmul.mubr.msk.bf16.gmra.mrb[68].mxu0 %vm1743_vm5, %v6638_v22 }
 0x2fd   : > { %4650 = vmatmul.mubr.msk.bf16.gmra.mrb[52].mxu1 %vm1743_vm5, %v2440_v21  ;;  %4681 = vmatprep.mubr.msk.bf16.mxu0 %vm1743_vm5, %v6679_v5  ;;  %v3077_v34 = vpop.permute.xlu0 %3076 }
 0x2ff   : > { %v3079_v12 = vpop.permute.xlu1 %3078 }
 0x300   : > { %v3223_v16 = vsel %vm1124_vm1, %v6311_v57, %v3079_v12  ;;  %v4935_v57 = vld [vmem:[#allocation16] sm:$0xff]  }
 0x301   : > { %v3189_v14 = vpop.permute.xlu0 %3188  ;;  %4705 = vmatprep.subr.bf16.mxu1 %v4935_v57 }
 0x302   : > { %4706 = vmatpush3.bf16.msra.mxu1 %v4935_v57 }
 0x303   : > { %v3191_v17 = vpop.permute.xlu1 %3190  ;;  %4707 = vmatprep.subr.bf16.mxu1 %v4936_v25 }
 0x304   : > { %4682 = vmatmul.mubr.msk.bf16.gmra.mrb[72].mxu0 %vm1743_vm5, %v6695_v4  ;;  %v3221_v4 = vsel %vm1124_vm1, %v6304_v63, %v3077_v34  ;;  %v3255_v63 = vsel %vm657_vm0, %v3223_v16, %v3191_v17 }
 0x305   : > { %4685 = vmatprep.mubr.msk.bf16.mxu0 %vm1743_vm5, %v3249_v10  ;;  %v2266_v24 = vpop.permute.xlu0 %2265  ;;  %v3253_v29 = vsel %vm657_vm0, %v3221_v4, %v3189_v14 }
 0x306   : > { %v2410_v22 = vsel %vm1124_vm1, %v6350_v60, %v2266_v24  ;;  %4708 = vmatpush3.bf16.msra.mxu1 %v4936_v25 }
 0x307   : > { %v2268_v38 = vpop.permute.xlu1 %2267 }
 0x308   : > { %v2412_v44 = vsel %vm1124_vm1, %v6340_v49, %v2268_v38 }
 0x309   : > { %v2378_v5 = vpop.permute.xlu0 %2377 }
 0x30a   : > { %v2442_v2 = vsel %vm657_vm0, %v2410_v22, %v2378_v5 }
 0x30b   : > { %v2380_v3 = vpop.permute.xlu1 %2379  ;;  %4653 = vmatprep.mubr.msk.bf16.mxu1 %vm1743_vm5, %v2442_v2 }
 0x30c   : > { %v2444_v41 = vsel %vm657_vm0, %v2412_v44, %v2380_v3  ;;  %4686 = vmatmul.mubr.msk.bf16.gmra.mrb[76].mxu0 %vm1743_vm5, %v3251_v31 }
 0x30d   : > { %4654 = vmatmul.mubr.msk.bf16.gmra.mrb[56].mxu1 %vm1743_vm5, %v2444_v41  ;;  %4689 = vmatprep.mubr.msk.bf16.mxu0 %vm1743_vm5, %v3253_v29  ;;  %v3081_v1 = vpop.permute.xlu0 %3080 }
 0x30e   : > { %v3225_v50 = vsel %vm1124_vm1, %v6352_v58, %v3081_v1 }
 0x30f   : > { %v3083_v43 = vpop.permute.xlu1 %3082 }
 0x310   : > { %v3227_v32 = vsel %vm1124_vm1, %v6350_v60, %v3083_v43 }
 0x311   : > { %v3193_v19 = vpop.permute.xlu0 %3192 }
 0x312   : > { %v3257_v27 = vsel %vm657_vm0, %v3225_v50, %v3193_v19 }
 0x313   : > { %v3195_v26 = vpop.permute.xlu1 %3194 }
 0x314   : > { %4690 = vmatmul.mubr.msk.bf16.gmra.mrb[80].mxu0 %vm1743_vm5, %v3255_v63  ;;  %v3259_v55 = vsel %vm657_vm0, %v3227_v32, %v3195_v26 }
 0x315   : > { %4693 = vmatprep.mubr.msk.bf16.mxu0 %vm1743_vm5, %v3257_v27  ;;  %v2382_v33 = vpop.permute.xlu0 %2381 }
 0x317   : > { %v2272_v8 = vpop.permute.xlu1 %2271 }
 0x318   : > { %v2416_v13 = vsel %vm1124_vm1, %v6544_v54, %v2272_v8 }
 0x319   : > { %v3085_v6 = vpop.permute.xlu0 %3084 }
 0x31a   : > { %v3229_v52 = vsel %vm1124_vm1, %v6340_v49, %v3085_v6 }
 0x31b   : > { %v2384_v0 = vpop.permute.xlu1 %2383 }
 0x31c   : > { %4694 = vmatmul.mubr.msk.bf16.gmra.mrb[84].mxu0 %vm1743_vm5, %v3259_v55  ;;  %v2448_v60 = vsel %vm657_vm0, %v2416_v13, %v2384_v0 }
 0x31d   : > { %v2270_v58 = vpop.permute.xlu0 %2269 }
 0x31e   : > { %v2414_v23 = vsel %vm1124_vm1, %v6386_v9, %v2270_v58 }
 0x31f   : > { %v3087_v42 = vpop.permute.xlu1 %3086  ;;  %v2446_v39 = vsel %vm657_vm0, %v2414_v23, %v2382_v33 }
 0x320   : > { %4657 = vmatprep.mubr.msk.bf16.mxu1 %vm1743_vm5, %v2446_v39  ;;  %v3231_v47 = vsel %vm1124_vm1, %v6386_v9, %v3087_v42 }
 0x321   : > { %4658 = vmatmul.mubr.msk.bf16.gmra.mrb[60].mxu1 %vm1743_vm5, %v2448_v60  ;;  %v3197_v28 = vpop.permute.xlu0 %3196 }
 0x322   : > { %v3261_v20 = vsel %vm657_vm0, %v3229_v52, %v3197_v28 }
 0x323   : > { %v3199_v51 = vpop.permute.xlu1 %3198  ;;  %4697 = vmatprep.mubr.msk.bf16.mxu0 %vm1743_vm5, %v3261_v20 }
 0x324   : > { %v3263_v37 = vsel %vm657_vm0, %v3231_v47, %v3199_v51 }
 0x325   : > { %4698 = vmatmul.mubr.msk.bf16.gmra.mrb[88].mxu0 %vm1743_vm5, %v3263_v37  ;;  %v3089_v30 = vpop.permute.xlu0 %3088 }
 0x326   : > { %v3233_v49 = vsel %vm1124_vm1, %v6544_v54, %v3089_v30 }
 0x327   : > { %v3091_v56 = vpop.permute.xlu1 %3090 }
 0x328   : > { %v3235_v7 = vsel %vm1124_vm1, %v6597_v35, %v3091_v56 }
 0x329   : > { %v3201_v40 = vpop.permute.xlu0 %3200 }
 0x32a   : > { %v3265_v9 = vsel %vm657_vm0, %v3233_v49, %v3201_v40 }
 0x32b   : > { %v3203_v45 = vpop.permute.xlu1 %3202  ;;  %4701 = vmatprep.mubr.msk.bf16.mxu0 %vm1743_vm5, %v3265_v9 }
 0x32c   : > { %v3267_v46 = vsel %vm657_vm0, %v3235_v7, %v3203_v45 }
 0x32d   : > { %4702 = vmatmul.mubr.msk.bf16.gmra.mrb[92].mxu0 %vm1743_vm5, %v3267_v46 }
 0x35f   : > { %v4587_v18 = vpop.f32.mrb[32].mxu0 }
 0x360   : > { %1939 = vst.msk [vmem:[#allocation3 + $0x10] sm:$0xff] %vm1124_vm1, %v4587_v18  ;;  %v1810_v54 = vpop.f32.mrb[33].mxu0 }
 0x361   : > { %1937 = vst.msk [vmem:[#allocation3] sm:$0xff] %vm1124_vm1, %v1810_v54  ;;  %v4588_v59 = vpop.f32.mrb[34].mxu0 }
 0x362   : > { %1940 = vst.msk [vmem:[#allocation3 + $0x18] sm:$0xff] %vm1124_vm1, %v4588_v59  ;;  %v1813_v35 = vpop.f32.mrb[35].mxu0 }
 0x363   : > { %1938 = vst.msk [vmem:[#allocation3 + $0x8] sm:$0xff] %vm1124_vm1, %v1813_v35 }
 0x364   : > { %v4631_v36 = vpop.f32.mrb[32].mxu1 }
 0x365   : > { %v2564_v53 = vpop.f32.mrb[33].mxu1 }
 0x366   : > { %v4632_v48 = vpop.f32.mrb[34].mxu1 }
 0x367   : > { %v2693_v61 = vld [vmem:[#allocation3 + $0x10] sm:$0xff]  ;;  %v4591_v62 = vpop.f32.mrb[36].mxu0  ;;  %v2567_v21 = vpop.f32.mrb[35].mxu1 }
 0x368   : > { %v2725_v34 = vadd.f32 %v4631_v36, %v2693_v61  ;;  %v2691_v12 = vld [vmem:[#allocation3] sm:$0xff]  ;;  %1943 = vst.msk [vmem:[#allocation3 + $0x30] sm:$0xff] %vm1124_vm1, %v4591_v62  ;;  %v1826_v14 = vpop.f32.mrb[37].mxu0 }
 0x369   : > { %v2723_v17 = vadd.f32 %v2691_v12, %v2564_v53  ;;  %v2694_v15 = vld [vmem:[#allocation3 + $0x18] sm:$0xff]  ;;  %1941 = vst.msk [vmem:[#allocation3 + $0x20] sm:$0xff] %vm1124_vm1, %v1826_v14  ;;  %v4592_v10 = vpop.f32.mrb[38].mxu0 }
 0x36a   : > { %2757 = vst.msk [vmem:[#allocation3 + $0x10] sm:$0xff] %vm1124_vm1, %v2725_v34  ;;  %v2726_v24 = vadd.f32 %v4632_v48, %v2694_v15  ;;  %v2692_v38 = vld [vmem:[#allocation3 + $0x8] sm:$0xff]  ;;  %1944 = vst.msk [vmem:[#allocation3 + $0x38] sm:$0xff] %vm1124_vm1, %v4592_v10  ;;  %v1829_v22 = vpop.f32.mrb[39].mxu0 }
 0x36b   : > { %2755 = vst.msk [vmem:[#allocation3] sm:$0xff] %vm1124_vm1, %v2723_v17  ;;  %v2724_v5 = vadd.f32 %v2692_v38, %v2567_v21  ;;  %1942 = vst.msk [vmem:[#allocation3 + $0x28] sm:$0xff] %vm1124_vm1, %v1829_v22 }
 0x36c   : > { %2758 = vst.msk [vmem:[#allocation3 + $0x18] sm:$0xff] %vm1124_vm1, %v2726_v24 }
 0x36d   : > { %2756 = vst.msk [vmem:[#allocation3 + $0x8] sm:$0xff] %vm1124_vm1, %v2724_v5 }
 0x36f   : > { %v2697_v4 = vld [vmem:[#allocation3 + $0x30] sm:$0xff] }
 0x370   : > { %v2695_v1 = vld [vmem:[#allocation3 + $0x20] sm:$0xff] }
 0x371   : > { %v2698_v16 = vld [vmem:[#allocation3 + $0x38] sm:$0xff] }
 0x372   : > { %v2696_v50 = vld [vmem:[#allocation3 + $0x28] sm:$0xff] }
 0x379   : > { %v4595_v11 = vpop.f32.mrb[40].mxu0 }
 0x37a   : > { %1947 = vst.msk [vmem:[#allocation3 + $0x50] sm:$0xff] %vm1124_vm1, %v4595_v11  ;;  %v1842_v44 = vpop.f32.mrb[41].mxu0 }
 0x37b   : > { %1945 = vst.msk [vmem:[#allocation3 + $0x40] sm:$0xff] %vm1124_vm1, %v1842_v44  ;;  %v4596_v2 = vpop.f32.mrb[42].mxu0 }
 0x37c   : > { %1948 = vst.msk [vmem:[#allocation3 + $0x58] sm:$0xff] %vm1124_vm1, %v4596_v2  ;;  %v1845_v3 = vpop.f32.mrb[43].mxu0  ;;  %v4635_v31 = vpop.f32.mrb[36].mxu1 }
 0x37d   : > { %1946 = vst.msk [vmem:[#allocation3 + $0x48] sm:$0xff] %vm1124_vm1, %v1845_v3  ;;  %v2729_v41 = vadd.f32 %v4635_v31, %v2697_v4  ;;  %v2580_v29 = vpop.f32.mrb[37].mxu1 }
 0x37e   : > { %v2727_v43 = vadd.f32 %v2695_v1, %v2580_v29  ;;  %v4636_v19 = vpop.f32.mrb[38].mxu1 }
 0x37f   : > { %2761 = vst.msk [vmem:[#allocation3 + $0x30] sm:$0xff] %vm1124_vm1, %v2729_v41  ;;  %v2730_v26 = vadd.f32 %v4636_v19, %v2698_v16  ;;  %v2583_v63 = vpop.f32.mrb[39].mxu1 }
 0x380   : > { %2759 = vst.msk [vmem:[#allocation3 + $0x20] sm:$0xff] %vm1124_vm1, %v2727_v43  ;;  %v2728_v27 = vadd.f32 %v2696_v50, %v2583_v63  ;;  %v3512_v43 = vld [vmem:[#allocation3 + $0x10] sm:$0xff] }
 0x381   : > { %2762 = vst.msk [vmem:[#allocation3 + $0x38] sm:$0xff] %vm1124_vm1, %v2730_v26  ;;  %v2701_v57 = vld [vmem:[#allocation3 + $0x50] sm:$0xff]  ;;  %v3510_v26 = vld [vmem:[#allocation3] sm:$0xff] }
 0x382   : > { %2760 = vst.msk [vmem:[#allocation3 + $0x28] sm:$0xff] %vm1124_vm1, %v2728_v27  ;;  %v2699_v23 = vld [vmem:[#allocation3 + $0x40] sm:$0xff]  ;;  %v3513_v27 = vld [vmem:[#allocation3 + $0x18] sm:$0xff] }
 0x383   : > { %v2702_v39 = vld [vmem:[#allocation3 + $0x58] sm:$0xff] }
 0x384   : > { %v2700_v28 = vld [vmem:[#allocation3 + $0x48] sm:$0xff] }
 0x391   : > { %v4599_v33 = vpop.f32.mrb[44].mxu0 }
 0x392   : > { %1951 = vst.msk [vmem:[#allocation3 + $0x70] sm:$0xff] %vm1124_vm1, %v4599_v33  ;;  %v1858_v8 = vpop.f32.mrb[45].mxu0 }
 0x393   : > { %1949 = vst.msk [vmem:[#allocation3 + $0x60] sm:$0xff] %vm1124_vm1, %v1858_v8  ;;  %v4600_v6 = vpop.f32.mrb[46].mxu0 }
 0x394   : > { %1952 = vst.msk [vmem:[#allocation3 + $0x78] sm:$0xff] %vm1124_vm1, %v4600_v6  ;;  %v1861_v32 = vpop.f32.mrb[47].mxu0  ;;  %v4639_v0 = vpop.f32.mrb[40].mxu1  ;;  %v3511_v6 = vld [vmem:[#allocation3 + $0x8] sm:$0xff] }
 0x395   : > { %1950 = vst.msk [vmem:[#allocation3 + $0x68] sm:$0xff] %vm1124_vm1, %v1861_v32  ;;  %v2733_v55 = vadd.f32 %v4639_v0, %v2701_v57  ;;  %v2596_v58 = vpop.f32.mrb[41].mxu1 }
 0x396   : > { %v2731_v42 = vadd.f32 %v2699_v23, %v2596_v58  ;;  %v4640_v13 = vpop.f32.mrb[42].mxu1  ;;  %v3516_v58 = vld [vmem:[#allocation3 + $0x30] sm:$0xff] }
 0x397   : > { %2765 = vst.msk [vmem:[#allocation3 + $0x50] sm:$0xff] %vm1124_vm1, %v2733_v55  ;;  %v2734_v60 = vadd.f32 %v4640_v13, %v2702_v39  ;;  %v2599_v52 = vpop.f32.mrb[43].mxu1 }
 0x398   : > { %2763 = vst.msk [vmem:[#allocation3 + $0x40] sm:$0xff] %vm1124_vm1, %v2731_v42  ;;  %v2732_v47 = vadd.f32 %v2700_v28, %v2599_v52  ;;  %v3514_v52 = vld [vmem:[#allocation3 + $0x20] sm:$0xff]  ;;  %v6879_v28 = vld [vmem:[#allocation15] ss:$0 sm:$0xff] }
 0x399   : > { %2766 = vst.msk [vmem:[#allocation3 + $0x58] sm:$0xff] %vm1124_vm1, %v2734_v60  ;;  %v2705_v49 = vld [vmem:[#allocation3 + $0x70] sm:$0xff] }
 0x39a   : > { %2764 = vst.msk [vmem:[#allocation3 + $0x48] sm:$0xff] %vm1124_vm1, %v2732_v47  ;;  %v2703_v9 = vld [vmem:[#allocation3 + $0x60] sm:$0xff] }
 0x39b   : > { %v2706_v25 = vld [vmem:[#allocation3 + $0x78] sm:$0xff] }
 0x39c   : > { %v2704_v59 = vld [vmem:[#allocation3 + $0x68] sm:$0xff] }
 0x3a0   : > { %v4603_v20 = vpop.f32.mrb[48].mxu0 }
 0x3a1   : > { %1955 = vst.msk [vmem:[#allocation3 + $0x90] sm:$0xff] %vm1124_vm1, %v4603_v20  ;;  %v1874_v51 = vpop.f32.mrb[49].mxu0 }
 0x3a2   : > { %1953 = vst.msk [vmem:[#allocation3 + $0x80] sm:$0xff] %vm1124_vm1, %v1874_v51  ;;  %v4604_v37 = vpop.f32.mrb[50].mxu0 }
 0x3a3   : > { %1956 = vst.msk [vmem:[#allocation3 + $0x98] sm:$0xff] %vm1124_vm1, %v4604_v37  ;;  %v1877_v30 = vpop.f32.mrb[51].mxu0 }
 0x3a4   : > { %1954 = vst.msk [vmem:[#allocation3 + $0x88] sm:$0xff] %vm1124_vm1, %v1877_v30  ;;  %v4643_v56 = vpop.f32.mrb[44].mxu1 }
 0x3a5   : > { %v2737_v40 = vadd.f32 %v4643_v56, %v2705_v49  ;;  %v2612_v7 = vpop.f32.mrb[45].mxu1  ;;  %v3517_v56 = vld [vmem:[#allocation3 + $0x38] sm:$0xff] }
 0x3a6   : > { %v2735_v45 = vadd.f32 %v2703_v9, %v2612_v7  ;;  %v4644_v46 = vpop.f32.mrb[46].mxu1 }
 0x3a7   : > { %2769 = vst.msk [vmem:[#allocation3 + $0x70] sm:$0xff] %vm1124_vm1, %v2737_v40  ;;  %v2738_v18 = vadd.f32 %v4644_v46, %v2706_v25  ;;  %v2615_v54 = vpop.f32.mrb[47].mxu1  ;;  %v3515_v25 = vld [vmem:[#allocation3 + $0x28] sm:$0xff] }
 0x3a8   : > { %2767 = vst.msk [vmem:[#allocation3 + $0x60] sm:$0xff] %vm1124_vm1, %v2735_v45  ;;  %v2736_v35 = vadd.f32 %v2704_v59, %v2615_v54  ;;  %v2709_v15 = vld [vmem:[#allocation3 + $0x90] sm:$0xff] }
 0x3a9   : > { %2770 = vst.msk [vmem:[#allocation3 + $0x78] sm:$0xff] %vm1124_vm1, %v2738_v18  ;;  %v2707_v22 = vld [vmem:[#allocation3 + $0x80] sm:$0xff] }
 0x3aa   : > { %2768 = vst.msk [vmem:[#allocation3 + $0x68] sm:$0xff] %vm1124_vm1, %v2736_v35  ;;  %v2710_v2 = vld [vmem:[#allocation3 + $0x98] sm:$0xff] }
 0x3ab   : > { %v2708_v41 = vld [vmem:[#allocation3 + $0x88] sm:$0xff] }
 0x3ac   : > { %v4607_v36 = vpop.f32.mrb[52].mxu0 }
 0x3ad   : > { %1959 = vst.msk [vmem:[#allocation3 + $0xb0] sm:$0xff] %vm1124_vm1, %v4607_v36  ;;  %v1890_v53 = vpop.f32.mrb[53].mxu0 }
 0x3ae   : > { %1957 = vst.msk [vmem:[#allocation3 + $0xa0] sm:$0xff] %vm1124_vm1, %v1890_v53  ;;  %v4608_v48 = vpop.f32.mrb[54].mxu0 }
 0x3af   : > { %1960 = vst.msk [vmem:[#allocation3 + $0xb8] sm:$0xff] %vm1124_vm1, %v4608_v48  ;;  %v1893_v61 = vpop.f32.mrb[55].mxu0 }
 0x3b0   : > { %1958 = vst.msk [vmem:[#allocation3 + $0xa8] sm:$0xff] %vm1124_vm1, %v1893_v61 }
 0x3b4   : > { %v2713_v57 = vld [vmem:[#allocation3 + $0xb0] sm:$0xff] }
 0x3b5   : > { %v4611_v62 = vpop.f32.mrb[56].mxu0  ;;  %v2711_v39 = vld [vmem:[#allocation3 + $0xa0] sm:$0xff] }
 0x3b6   : > { %1963 = vst.msk [vmem:[#allocation3 + $0xd0] sm:$0xff] %vm1124_vm1, %v4611_v62  ;;  %v1906_v21 = vpop.f32.mrb[57].mxu0  ;;  %v2714_v37 = vld [vmem:[#allocation3 + $0xb8] sm:$0xff] }
 0x3b7   : > { %1961 = vst.msk [vmem:[#allocation3 + $0xc0] sm:$0xff] %vm1124_vm1, %v1906_v21  ;;  %v4612_v34 = vpop.f32.mrb[58].mxu0  ;;  %v2712_v45 = vld [vmem:[#allocation3 + $0xa8] sm:$0xff] }
 0x3b8   : > { %1964 = vst.msk [vmem:[#allocation3 + $0xd8] sm:$0xff] %vm1124_vm1, %v4612_v34  ;;  %v1909_v12 = vpop.f32.mrb[59].mxu0 }
 0x3b9   : > { %1962 = vst.msk [vmem:[#allocation3 + $0xc8] sm:$0xff] %vm1124_vm1, %v1909_v12  ;;  %v3520_v12 = vld [vmem:[#allocation3 + $0x50] sm:$0xff] }
 0x3bf   : > { %v4615_v14 = vpop.f32.mrb[60].mxu0 }
 0x3c0   : > { %v4647_v17 = vpop.f32.mrb[48].mxu1  ;;  %1967 = vst.msk [vmem:[#allocation3 + $0xf0] sm:$0xff] %vm1124_vm1, %v4615_v14  ;;  %v1922_v24 = vpop.f32.mrb[61].mxu0 }
 0x3c1   : > { %v2741_v10 = vadd.f32 %v4647_v17, %v2709_v15  ;;  %v2628_v38 = vpop.f32.mrb[49].mxu1  ;;  %1965 = vst.msk [vmem:[#allocation3 + $0xe0] sm:$0xff] %vm1124_vm1, %v1922_v24  ;;  %v4616_v11 = vpop.f32.mrb[62].mxu0  ;;  %v3518_v24 = vld [vmem:[#allocation3 + $0x40] sm:$0xff] }
 0x3c2   : > { %v2739_v5 = vadd.f32 %v2707_v22, %v2628_v38  ;;  %v4648_v44 = vpop.f32.mrb[50].mxu1  ;;  %1968 = vst.msk [vmem:[#allocation3 + $0xf8] sm:$0xff] %vm1124_vm1, %v4616_v11  ;;  %v1925_v31 = vpop.f32.mrb[63].mxu0  ;;  %v3521_v11 = vld [vmem:[#allocation3 + $0x58] sm:$0xff] }
 0x3c3   : > { %2773 = vst.msk [vmem:[#allocation3 + $0x90] sm:$0xff] %vm1124_vm1, %v2741_v10  ;;  %v2742_v3 = vadd.f32 %v4648_v44, %v2710_v2  ;;  %v2631_v4 = vpop.f32.mrb[51].mxu1  ;;  %1966 = vst.msk [vmem:[#allocation3 + $0xe8] sm:$0xff] %vm1124_vm1, %v1925_v31 }
 0x3c4   : > { %2771 = vst.msk [vmem:[#allocation3 + $0x80] sm:$0xff] %vm1124_vm1, %v2739_v5  ;;  %v2740_v29 = vadd.f32 %v2708_v41, %v2631_v4  ;;  %v3519_v4 = vld [vmem:[#allocation3 + $0x48] sm:$0xff] }
 0x3c5   : > { %2774 = vst.msk [vmem:[#allocation3 + $0x98] sm:$0xff] %vm1124_vm1, %v2742_v3 }
 0x3c6   : > { %2772 = vst.msk [vmem:[#allocation3 + $0x88] sm:$0xff] %vm1124_vm1, %v2740_v29 }
 0x3c7   : > { %v4675_v1 = vpop.f32.mrb[64].mxu0 }
 0x3c8   : > { %v3544_v19 = vadd.f32 %v4675_v1, %v3512_v43  ;;  %v3383_v16 = vpop.f32.mrb[65].mxu0 }
 0x3c9   : > { %v3542_v63 = vadd.f32 %v3510_v26, %v3383_v16  ;;  %v4676_v50 = vpop.f32.mrb[66].mxu0 }
 0x3ca   : > { %3576 = vst.msk [vmem:[#allocation3 + $0x10] sm:$0xff] %vm1124_vm1, %v3544_v19  ;;  %v3545_v33 = vadd.f32 %v4676_v50, %v3513_v27  ;;  %v3386_v8 = vpop.f32.mrb[67].mxu0 }
 0x3cb   : > { %3574 = vst.msk [vmem:[#allocation3] sm:$0xff] %vm1124_vm1, %v3542_v63  ;;  %v3543_v32 = vadd.f32 %v3511_v6, %v3386_v8  ;;  %v2717_v8 = vld [vmem:[#allocation3 + $0xd0] sm:$0xff] }
 0x3cc   : > { %3577 = vst.msk [vmem:[#allocation3 + $0x18] sm:$0xff] %vm1124_vm1, %v3545_v33 }
 0x3cd   : > { %3575 = vst.msk [vmem:[#allocation3 + $0x8] sm:$0xff] %vm1124_vm1, %v3543_v32  ;;  %v3524_v32 = vld [vmem:[#allocation3 + $0x70] sm:$0xff] }
 0x3cf   : > { %v4679_v55 = vpop.f32.mrb[68].mxu0 }
 0x3d0   : > { %v4651_v0 = vpop.f32.mrb[52].mxu1  ;;  %v3548_v42 = vadd.f32 %v4679_v55, %v3516_v58  ;;  %v3399_v60 = vpop.f32.mrb[69].mxu0 }
 0x3d1   : > { %v2745_v23 = vadd.f32 %v4651_v0, %v2713_v57  ;;  %v2644_v13 = vpop.f32.mrb[53].mxu1  ;;  %v3546_v20 = vadd.f32 %v3514_v52, %v3399_v60  ;;  %v4680_v30 = vpop.f32.mrb[70].mxu0  ;;  %v3608_v49 = vld [vmem:[#allocation3 + $0x10] sm:$0xff] }
 0x3d2   : > { %v2743_v47 = vadd.f32 %v2711_v39, %v2644_v13  ;;  %v4652_v51 = vpop.f32.mrb[54].mxu1  ;;  %3580 = vst.msk [vmem:[#allocation3 + $0x30] sm:$0xff] %vm1124_vm1, %v3548_v42  ;;  %v3549_v7 = vadd.f32 %v4680_v30, %v3517_v56  ;;  %v3402_v46 = vpop.f32.mrb[71].mxu0  ;;  %v3606_v18 = vld [vmem:[#allocation3] sm:$0xff]  ;;  %v3647_v48 = vadd.f32 %v6879_v28, %v3608_v49  ;;  %v3525_v30 = vld [vmem:[#allocation3 + $0x78] sm:$0xff] }
 0x3d3   : > { %2777 = vst.msk [vmem:[#allocation3 + $0xb0] sm:$0xff] %vm1124_vm1, %v2745_v23  ;;  %v2746_v40 = vadd.f32 %v4652_v51, %v2714_v37  ;;  %v2647_v9 = vpop.f32.mrb[55].mxu1  ;;  %3578 = vst.msk [vmem:[#allocation3 + $0x20] sm:$0xff] %vm1124_vm1, %v3546_v20  ;;  %v3547_v59 = vadd.f32 %v3515_v25, %v3402_v46  ;;  %v3645_v35 = vadd.f32 %v6879_v28, %v3606_v18  ;;  %v3609_v36 = vld [vmem:[#allocation3 + $0x18] sm:$0xff]  ;;  %v2715_v42 = vld [vmem:[#allocation3 + $0xc0] sm:$0xff] }
 0x3d4   : > { %2775 = vst.msk [vmem:[#allocation3 + $0xa0] sm:$0xff] %vm1124_vm1, %v2743_v47  ;;  %v2744_v54 = vadd.f32 %v2712_v45, %v2647_v9  ;;  %3581 = vst.msk [vmem:[#allocation3 + $0x38] sm:$0xff] %vm1124_vm1, %v3549_v7  ;;  %v3607_v53 = vld [vmem:[#allocation3 + $0x8] sm:$0xff]  ;;  %v3648_v61 = vadd.f32 %v6879_v28, %v3609_v36  ;;  %v3679_v38 = vmax.f32 %v3647_v48, 0.0  ;;  %v3522_v39 = vld [vmem:[#allocation3 + $0x60] sm:$0xff] }
 0x3d5   : > { %2778 = vst.msk [vmem:[#allocation3 + $0xb8] sm:$0xff] %vm1124_vm1, %v2746_v40  ;;  %3579 = vst.msk [vmem:[#allocation3 + $0x28] sm:$0xff] %vm1124_vm1, %v3547_v59  ;;  %v3646_v62 = vadd.f32 %v6879_v28, %v3607_v53  ;;  %v3677_v14 = vmax.f32 %v3645_v35, 0.0  ;;  %v2718_v51 = vld [vmem:[#allocation3 + $0xd8] sm:$0xff]  ;;  %v2716_v45 = vld [vmem:[#allocation3 + $0xc8] sm:$0xff] }
 0x3d6   : > { %2776 = vst.msk [vmem:[#allocation3 + $0xa8] sm:$0xff] %vm1124_vm1, %v2744_v54  ;;  %v3680_v21 = vmax.f32 %v3648_v61, 0.0  ;;  %v3523_v25 = vld [vmem:[#allocation3 + $0x68] sm:$0xff] }
 0x3d7   : > { %v4683_v34 = vpop.f32.mrb[72].mxu0  ;;  %v3678_v17 = vmax.f32 %v3646_v62, 0.0 }
 0x3d8   : > { %v3552_v15 = vadd.f32 %v4683_v34, %v3520_v12  ;;  %v3415_v10 = vpop.f32.mrb[73].mxu0  ;;  %v3710_v41 = vpack.c.bf16 %v3680_v21, %v3679_v38  ;;  %v3526_v38 = vld [vmem:[#allocation3 + $0x80] sm:$0xff] }
 0x3d9   : > { %v3550_v22 = vadd.f32 %v3518_v24, %v3415_v10  ;;  %v4684_v5 = vpop.f32.mrb[74].mxu0  ;;  %v3709_v44 = vpack.c.bf16 %v3678_v17, %v3677_v14  ;;  %v3612_v2 = vld [vmem:[#allocation3 + $0x30] sm:$0xff] }
 0x3da   : > { %3584 = vst.msk [vmem:[#allocation3 + $0x50] sm:$0xff] %vm1124_vm1, %v3552_v15  ;;  %v3553_v3 = vadd.f32 %v4684_v5, %v3521_v11  ;;  %v3418_v31 = vpop.f32.mrb[75].mxu0  ;;  %v3610_v29 = vld [vmem:[#allocation3 + $0x20] sm:$0xff]  ;;  %v3651_v26 = vadd.f32 %v6879_v28, %v3612_v2  ;;  %v3528_v14 = vld [vmem:[#allocation3 + $0x90] sm:$0xff] }
 0x3db   : > { %3582 = vst.msk [vmem:[#allocation3 + $0x40] sm:$0xff] %vm1124_vm1, %v3550_v22  ;;  %v3551_v1 = vadd.f32 %v3519_v4, %v3418_v31  ;;  %4709 = vmatprep.mubr.msk.bf16.mxu1 %vm1124_vm1, %v3709_v44  ;;  %v3649_v43 = vadd.f32 %v6879_v28, %v3610_v29  ;;  %v3613_v19 = vld [vmem:[#allocation3 + $0x38] sm:$0xff] }
 0x3dc   : > { %3585 = vst.msk [vmem:[#allocation3 + $0x58] sm:$0xff] %vm1124_vm1, %v3553_v3  ;;  %4710 = vmatmul.mubr.msk.bf16.vlgmr.msra.gmra.mrb[0].mxu1 %vm1124_vm1, %v3710_v41  ;;  %v3611_v16 = vld [vmem:[#allocation3 + $0x28] sm:$0xff]  ;;  %v3652_v63 = vadd.f32 %v6879_v28, %v3613_v19  ;;  %v3683_v60 = vmax.f32 %v3651_v26, 0.0  ;;  %v3529_v44 = vld [vmem:[#allocation3 + $0x98] sm:$0xff] }
 0x3dd   : > { %3583 = vst.msk [vmem:[#allocation3 + $0x48] sm:$0xff] %vm1124_vm1, %v3551_v1  ;;  %v3650_v50 = vadd.f32 %v6879_v28, %v3611_v16  ;;  %v3681_v0 = vmax.f32 %v3649_v43, 0.0  ;;  %v3527_v41 = vld [vmem:[#allocation3 + $0x88] sm:$0xff] }
 0x3de   : > { %v3684_v27 = vmax.f32 %v3652_v63, 0.0 }
 0x3df   : > { %v4687_v6 = vpop.f32.mrb[76].mxu0  ;;  %v3682_v57 = vmax.f32 %v3650_v50, 0.0 }
 0x3e0   : > { %v4655_v33 = vpop.f32.mrb[56].mxu1  ;;  %v3556_v58 = vadd.f32 %v4687_v6, %v3524_v32  ;;  %v3431_v13 = vpop.f32.mrb[77].mxu0  ;;  %v3712_v18 = vpack.c.bf16 %v3684_v27, %v3683_v60  ;;  %v3532_v6 = vld [vmem:[#allocation3 + $0xb0] sm:$0xff] }
 0x3e1   : > { %v2749_v55 = vadd.f32 %v4655_v33, %v2717_v8  ;;  %v2660_v23 = vpop.f32.mrb[57].mxu1  ;;  %v3554_v47 = vadd.f32 %v3522_v39, %v3431_v13  ;;  %v4688_v37 = vpop.f32.mrb[78].mxu0  ;;  %v3711_v56 = vpack.c.bf16 %v3682_v57, %v3681_v0  ;;  %v3616_v49 = vld [vmem:[#allocation3 + $0x50] sm:$0xff]  ;;  %v3533_v39 = vld [vmem:[#allocation3 + $0xb8] sm:$0xff] }
 0x3e2   : > { %v2747_v52 = vadd.f32 %v2715_v42, %v2660_v23  ;;  %v4656_v20 = vpop.f32.mrb[58].mxu1  ;;  %3588 = vst.msk [vmem:[#allocation3 + $0x70] sm:$0xff] %vm1124_vm1, %v3556_v58  ;;  %v3557_v7 = vadd.f32 %v4688_v37, %v3525_v30  ;;  %v3434_v46 = vpop.f32.mrb[79].mxu0  ;;  %v3614_v54 = vld [vmem:[#allocation3 + $0x40] sm:$0xff]  ;;  %v3655_v61 = vadd.f32 %v6879_v28, %v3616_v49 }
 0x3e3   : > { %2781 = vst.msk [vmem:[#allocation3 + $0xd0] sm:$0xff] %vm1124_vm1, %v2749_v55  ;;  %v2750_v40 = vadd.f32 %v4656_v20, %v2718_v51  ;;  %v2663_v9 = vpop.f32.mrb[59].mxu1  ;;  %3586 = vst.msk [vmem:[#allocation3 + $0x60] sm:$0xff] %vm1124_vm1, %v3554_v47  ;;  %v3555_v35 = vadd.f32 %v3523_v25, %v3434_v46  ;;  %4713 = vmatprep.mubr.msk.bf16.mxu1 %vm1124_vm1, %v3711_v56  ;;  %v3653_v36 = vadd.f32 %v6879_v28, %v3614_v54  ;;  %v3617_v53 = vld [vmem:[#allocation3 + $0x58] sm:$0xff]  ;;  %v3530_v58 = vld [vmem:[#allocation3 + $0xa0] sm:$0xff] }
 0x3e4   : > { %2779 = vst.msk [vmem:[#allocation3 + $0xc0] sm:$0xff] %vm1124_vm1, %v2747_v52  ;;  %v2748_v59 = vadd.f32 %v2716_v45, %v2663_v9  ;;  %3589 = vst.msk [vmem:[#allocation3 + $0x78] sm:$0xff] %vm1124_vm1, %v3557_v7  ;;  %4714 = vmatmul.mubr.msk.bf16.gmra.mrb[4].mxu1 %vm1124_vm1, %v3712_v18  ;;  %v3615_v48 = vld [vmem:[#allocation3 + $0x48] sm:$0xff]  ;;  %v3656_v62 = vadd.f32 %v6879_v28, %v3617_v53  ;;  %v3687_v22 = vmax.f32 %v3655_v61, 0.0  ;;  %v2721_v9 = vld [vmem:[#allocation3 + $0xf0] sm:$0xff] }
 0x3e5   : > { %2782 = vst.msk [vmem:[#allocation3 + $0xd8] sm:$0xff] %vm1124_vm1, %v2750_v40  ;;  %3587 = vst.msk [vmem:[#allocation3 + $0x68] sm:$0xff] %vm1124_vm1, %v3555_v35  ;;  %v3654_v21 = vadd.f32 %v6879_v28, %v3615_v48  ;;  %v3685_v17 = vmax.f32 %v3653_v36, 0.0  ;;  %v3531_v51 = vld [vmem:[#allocation3 + $0xa8] sm:$0xff]  ;;  %v2722_v48 = vld [vmem:[#allocation3 + $0xf8] sm:$0xff] }
 0x3e6   : > { %2780 = vst.msk [vmem:[#allocation3 + $0xc8] sm:$0xff] %vm1124_vm1, %v2748_v59  ;;  %v3688_v34 = vmax.f32 %v3656_v62, 0.0  ;;  %v2719_v59 = vld [vmem:[#allocation3 + $0xe0] sm:$0xff] }
 0x3e7   : > { %v4691_v12 = vpop.f32.mrb[80].mxu0  ;;  %v3686_v15 = vmax.f32 %v3654_v21, 0.0 }
 0x3e8   : > { %v3560_v10 = vadd.f32 %v4691_v12, %v3528_v14  ;;  %v3447_v24 = vpop.f32.mrb[81].mxu0  ;;  %v3714_v29 = vpack.c.bf16 %v3688_v34, %v3687_v22  ;;  %v2720_v34 = vld [vmem:[#allocation3 + $0xe8] sm:$0xff] }
 0x3e9   : > { %v3558_v5 = vadd.f32 %v3526_v38, %v3447_v24  ;;  %v4692_v11 = vpop.f32.mrb[82].mxu0  ;;  %v3713_v2 = vpack.c.bf16 %v3686_v15, %v3685_v17  ;;  %v3620_v3 = vld [vmem:[#allocation3 + $0x70] sm:$0xff] }
 0x3ea   : > { %3592 = vst.msk [vmem:[#allocation3 + $0x90] sm:$0xff] %vm1124_vm1, %v3560_v10  ;;  %v3561_v31 = vadd.f32 %v4692_v11, %v3529_v44  ;;  %v3450_v4 = vpop.f32.mrb[83].mxu0  ;;  %v3618_v1 = vld [vmem:[#allocation3 + $0x60] sm:$0xff]  ;;  %v3659_v63 = vadd.f32 %v6879_v28, %v3620_v3  ;;  %v3536_v14 = vld [vmem:[#allocation3 + $0xd0] sm:$0xff] }
 0x3eb   : > { %3590 = vst.msk [vmem:[#allocation3 + $0x80] sm:$0xff] %vm1124_vm1, %v3558_v5  ;;  %v3559_v43 = vadd.f32 %v3527_v41, %v3450_v4  ;;  %4717 = vmatprep.mubr.msk.bf16.mxu1 %vm1124_vm1, %v3713_v2  ;;  %v3657_v19 = vadd.f32 %v6879_v28, %v3618_v1  ;;  %v3621_v16 = vld [vmem:[#allocation3 + $0x78] sm:$0xff]  ;;  %v3534_v22 = vld [vmem:[#allocation3 + $0xc0] sm:$0xff] }
 0x3ec   : > { %3593 = vst.msk [vmem:[#allocation3 + $0x98] sm:$0xff] %vm1124_vm1, %v3561_v31  ;;  %4718 = vmatmul.mubr.msk.bf16.gmra.mrb[8].mxu1 %vm1124_vm1, %v3714_v29  ;;  %v3619_v26 = vld [vmem:[#allocation3 + $0x68] sm:$0xff]  ;;  %v3660_v50 = vadd.f32 %v6879_v28, %v3621_v16  ;;  %v3691_v23 = vmax.f32 %v3659_v63, 0.0  ;;  %v3537_v2 = vld [vmem:[#allocation3 + $0xd8] sm:$0xff] }
 0x3ed   : > { %3591 = vst.msk [vmem:[#allocation3 + $0x88] sm:$0xff] %vm1124_vm1, %v3559_v43  ;;  %v3658_v27 = vadd.f32 %v6879_v28, %v3619_v26  ;;  %v3689_v32 = vmax.f32 %v3657_v19, 0.0  ;;  %v3535_v29 = vld [vmem:[#allocation3 + $0xc8] sm:$0xff] }
 0x3ee   : > { %v3692_v33 = vmax.f32 %v3660_v50, 0.0 }
 0x3ef   : > { %v4695_v8 = vpop.f32.mrb[84].mxu0  ;;  %v3690_v0 = vmax.f32 %v3658_v27, 0.0 }
 0x3f0   : > { %v3564_v57 = vadd.f32 %v4695_v8, %v3532_v6  ;;  %v3463_v55 = vpop.f32.mrb[85].mxu0  ;;  %v3716_v37 = vpack.c.bf16 %v3692_v33, %v3691_v23 }
 0x3f1   : > { %v3562_v42 = vadd.f32 %v3530_v58, %v3463_v55  ;;  %v4696_v13 = vpop.f32.mrb[86].mxu0  ;;  %v3715_v60 = vpack.c.bf16 %v3690_v0, %v3689_v32  ;;  %v3624_v52 = vld [vmem:[#allocation3 + $0x90] sm:$0xff] }
 0x3f2   : > { %3596 = vst.msk [vmem:[#allocation3 + $0xb0] sm:$0xff] %vm1124_vm1, %v3564_v57  ;;  %v3565_v47 = vadd.f32 %v4696_v13, %v3533_v39  ;;  %v3466_v20 = vpop.f32.mrb[87].mxu0  ;;  %v3622_v30 = vld [vmem:[#allocation3 + $0x80] sm:$0xff]  ;;  %v3663_v46 = vadd.f32 %v6879_v28, %v3624_v52 }
 0x3f3   : > { %3594 = vst.msk [vmem:[#allocation3 + $0xa0] sm:$0xff] %vm1124_vm1, %v3562_v42  ;;  %v3563_v56 = vadd.f32 %v3531_v51, %v3466_v20  ;;  %4721 = vmatprep.mubr.msk.bf16.mxu1 %vm1124_vm1, %v3715_v60  ;;  %v3661_v49 = vadd.f32 %v6879_v28, %v3622_v30  ;;  %v3625_v40 = vld [vmem:[#allocation3 + $0x98] sm:$0xff] }
 0x3f4   : > { %3597 = vst.msk [vmem:[#allocation3 + $0xb8] sm:$0xff] %vm1124_vm1, %v3565_v47  ;;  %v4659_v7 = vpop.f32.mrb[60].mxu1  ;;  %4722 = vmatmul.mubr.msk.bf16.gmra.mrb[12].mxu1 %vm1124_vm1, %v3716_v37  ;;  %v3623_v45 = vld [vmem:[#allocation3 + $0x88] sm:$0xff]  ;;  %v3664_v25 = vadd.f32 %v6879_v28, %v3625_v40  ;;  %v3695_v5 = vmax.f32 %v3663_v46, 0.0 }
 0x3f5   : > { %3595 = vst.msk [vmem:[#allocation3 + $0xa8] sm:$0xff] %vm1124_vm1, %v3563_v56  ;;  %v2753_v18 = vadd.f32 %v4659_v7, %v2721_v9  ;;  %v2676_v54 = vpop.f32.mrb[61].mxu1  ;;  %v3662_v35 = vadd.f32 %v6879_v28, %v3623_v45  ;;  %v3693_v17 = vmax.f32 %v3661_v49, 0.0 }
 0x3f6   : > { %v2751_v36 = vadd.f32 %v2719_v59, %v2676_v54  ;;  %v4660_v53 = vpop.f32.mrb[62].mxu1  ;;  %v3696_v61 = vmax.f32 %v3664_v25, 0.0 }
 0x3f7   : > { %2785 = vst.msk [vmem:[#allocation3 + $0xf0] sm:$0xff] %vm1124_vm1, %v2753_v18  ;;  %v2754_v62 = vadd.f32 %v4660_v53, %v2722_v48  ;;  %v2679_v21 = vpop.f32.mrb[63].mxu1  ;;  %v3694_v15 = vmax.f32 %v3662_v35, 0.0 }
 0x3f8   : > { %v4699_v12 = vpop.f32.mrb[88].mxu0  ;;  %2783 = vst.msk [vmem:[#allocation3 + $0xe0] sm:$0xff] %vm1124_vm1, %v2751_v36  ;;  %v2752_v10 = vadd.f32 %v2720_v34, %v2679_v21  ;;  %v3718_v1 = vpack.c.bf16 %v3696_v61, %v3695_v5 }
 0x3f9   : > { %v3568_v24 = vadd.f32 %v4699_v12, %v3536_v14  ;;  %v3479_v38 = vpop.f32.mrb[89].mxu0  ;;  %2786 = vst.msk [vmem:[#allocation3 + $0xf8] sm:$0xff] %vm1124_vm1, %v2754_v62  ;;  %v3717_v3 = vpack.c.bf16 %v3694_v15, %v3693_v17  ;;  %v3628_v31 = vld [vmem:[#allocation3 + $0xb0] sm:$0xff] }
 0x3fa   : > { %v3566_v11 = vadd.f32 %v3534_v22, %v3479_v38  ;;  %v4700_v44 = vpop.f32.mrb[90].mxu0  ;;  %2784 = vst.msk [vmem:[#allocation3 + $0xe8] sm:$0xff] %vm1124_vm1, %v2752_v10  ;;  %v3626_v43 = vld [vmem:[#allocation3 + $0xa0] sm:$0xff]  ;;  %v3667_v50 = vadd.f32 %v6879_v28, %v3628_v31 }
 0x3fb   : > { %3600 = vst.msk [vmem:[#allocation3 + $0xd0] sm:$0xff] %vm1124_vm1, %v3568_v24  ;;  %v3569_v4 = vadd.f32 %v4700_v44, %v3537_v2  ;;  %v3482_v41 = vpop.f32.mrb[91].mxu0  ;;  %4725 = vmatprep.mubr.msk.bf16.mxu1 %vm1124_vm1, %v3717_v3  ;;  %v3665_v16 = vadd.f32 %v6879_v28, %v3626_v43  ;;  %v3629_v26 = vld [vmem:[#allocation3 + $0xb8] sm:$0xff] }
 0x3fc   : > { %3598 = vst.msk [vmem:[#allocation3 + $0xc0] sm:$0xff] %vm1124_vm1, %v3566_v11  ;;  %v3567_v19 = vadd.f32 %v3535_v29, %v3482_v41  ;;  %4726 = vmatmul.mubr.msk.bf16.gmra.mrb[16].mxu1 %vm1124_vm1, %v3718_v1  ;;  %v3627_v63 = vld [vmem:[#allocation3 + $0xa8] sm:$0xff]  ;;  %v3668_v27 = vadd.f32 %v6879_v28, %v3629_v26  ;;  %v3699_v13 = vmax.f32 %v3667_v50, 0.0 }
 0x3fd   : > { %3601 = vst.msk [vmem:[#allocation3 + $0xd8] sm:$0xff] %vm1124_vm1, %v3569_v4  ;;  %v3666_v33 = vadd.f32 %v6879_v28, %v3627_v63  ;;  %v3697_v57 = vmax.f32 %v3665_v16, 0.0 }
 0x3fe   : > { %3599 = vst.msk [vmem:[#allocation3 + $0xc8] sm:$0xff] %vm1124_vm1, %v3567_v19  ;;  %v3540_v8 = vld [vmem:[#allocation3 + $0xf0] sm:$0xff]  ;;  %v3700_v6 = vmax.f32 %v3668_v27, 0.0 }
 0x3ff   : > { %v3538_v0 = vld [vmem:[#allocation3 + $0xe0] sm:$0xff]  ;;  %v3698_v55 = vmax.f32 %v3666_v33, 0.0 }
 0x400   : > { %v4703_v32 = vpop.f32.mrb[92].mxu0  ;;  %v3541_v42 = vld [vmem:[#allocation3 + $0xf8] sm:$0xff]  ;;  %v3720_v30 = vpack.c.bf16 %v3700_v6, %v3699_v13 }
 0x401   : > { %v3572_v58 = vadd.f32 %v4703_v32, %v3540_v8  ;;  %v3495_v23 = vpop.f32.mrb[93].mxu0  ;;  %v3539_v52 = vld [vmem:[#allocation3 + $0xe8] sm:$0xff]  ;;  %v3719_v47 = vpack.c.bf16 %v3698_v55, %v3697_v57 }
 0x402   : > { %v3570_v39 = vadd.f32 %v3538_v0, %v3495_v23  ;;  %v4704_v60 = vpop.f32.mrb[94].mxu0  ;;  %v3632_v20 = vld [vmem:[#allocation3 + $0xd0] sm:$0xff] }
 0x403   : > { %3604 = vst.msk [vmem:[#allocation3 + $0xf0] sm:$0xff] %vm1124_vm1, %v3572_v58  ;;  %v3573_v51 = vadd.f32 %v4704_v60, %v3541_v42  ;;  %v3498_v37 = vpop.f32.mrb[95].mxu0  ;;  %v3630_v56 = vld [vmem:[#allocation3 + $0xc0] sm:$0xff]  ;;  %4729 = vmatprep.mubr.msk.bf16.mxu1 %vm1124_vm1, %v3719_v47  ;;  %v3671_v45 = vadd.f32 %v6879_v28, %v3632_v20 }
 0x404   : > { %3602 = vst.msk [vmem:[#allocation3 + $0xe0] sm:$0xff] %vm1124_vm1, %v3570_v39  ;;  %v3571_v49 = vadd.f32 %v3539_v52, %v3498_v37  ;;  %v3669_v40 = vadd.f32 %v6879_v28, %v3630_v56  ;;  %v3633_v7 = vld [vmem:[#allocation3 + $0xd8] sm:$0xff]  ;;  %4730 = vmatmul.mubr.msk.bf16.gmra.mrb[20].mxu1 %vm1124_vm1, %v3720_v30 }
 0x405   : > { %3605 = vst.msk [vmem:[#allocation3 + $0xf8] sm:$0xff] %vm1124_vm1, %v3573_v51  ;;  %v3631_v9 = vld [vmem:[#allocation3 + $0xc8] sm:$0xff]  ;;  %v3672_v46 = vadd.f32 %v6879_v28, %v3633_v7  ;;  %v3703_v35 = vmax.f32 %v3671_v45, 0.0 }
 0x406   : > { %3603 = vst.msk [vmem:[#allocation3 + $0xe8] sm:$0xff] %vm1124_vm1, %v3571_v49  ;;  %v3670_v25 = vadd.f32 %v6879_v28, %v3631_v9  ;;  %v3701_v54 = vmax.f32 %v3669_v40, 0.0 }
 0x407   : > { %v3704_v18 = vmax.f32 %v3672_v46, 0.0 }
 0x408   : > { %v3702_v59 = vmax.f32 %v3670_v25, 0.0 }
 0x409   : > { %v3722_v48 = vpack.c.bf16 %v3704_v18, %v3703_v35 }
 0x40a   : > { %v3721_v36 = vpack.c.bf16 %v3702_v59, %v3701_v54  ;;  %v3636_v53 = vld [vmem:[#allocation3 + $0xf0] sm:$0xff] }
 0x40b   : > { %v3634_v61 = vld [vmem:[#allocation3 + $0xe0] sm:$0xff]  ;;  %v3675_v12 = vadd.f32 %v6879_v28, %v3636_v53 }
 0x40c   : > { %4733 = vmatprep.mubr.msk.bf16.mxu1 %vm1124_vm1, %v3721_v36  ;;  %v3673_v62 = vadd.f32 %v6879_v28, %v3634_v61  ;;  %v3637_v21 = vld [vmem:[#allocation3 + $0xf8] sm:$0xff] }
 0x40d   : > { %4734 = vmatmul.mubr.msk.bf16.gmra.mrb[24].mxu1 %vm1124_vm1, %v3722_v48  ;;  %v3635_v34 = vld [vmem:[#allocation3 + $0xe8] sm:$0xff]  ;;  %v3676_v14 = vadd.f32 %v6879_v28, %v3637_v21  ;;  %v3707_v38 = vmax.f32 %v3675_v12, 0.0 }
 0x40e   : > { %v3674_v17 = vadd.f32 %v6879_v28, %v3635_v34  ;;  %v3705_v10 = vmax.f32 %v3673_v62, 0.0 }
 0x40f   : > { %v3708_v15 = vmax.f32 %v3676_v14, 0.0 }
 0x410   : > { %v3706_v24 = vmax.f32 %v3674_v17, 0.0 }
 0x411   : > { %v3724_v5 = vpack.c.bf16 %v3708_v15, %v3707_v38 }
 0x412   : > { %v3723_v22 = vpack.c.bf16 %v3706_v24, %v3705_v10 }
 0x414   : > { %4737 = vmatprep.mubr.msk.bf16.mxu1 %vm1124_vm1, %v3723_v22 }
 0x415   : > { %4738 = vmatmul.mubr.msk.bf16.gmra.mrb[28].mxu1 %vm1124_vm1, %v3724_v5 }
 0x4af   : > { %v4711_v11 = vpop.f32.mrb[0].mxu1 }
 0x4b0   : > { %4016 = vst [vmem:[%s6971_s26 + $0x10] sm:$0xff] %v4711_v11  ;;  %v3823_v28 = vpop.f32.mrb[1].mxu1 }
 0x4b1   : > { %4014 = vst [vmem:[%s6971_s26] sm:$0xff] %v3823_v28  ;;  %v4712_v44 = vpop.f32.mrb[2].mxu1 }
 0x4b2   : > { %4017 = vst [vmem:[%s6971_s26 + $0x18] sm:$0xff] %v4712_v44  ;;  %v3826_v2 = vpop.f32.mrb[3].mxu1 }
 0x4b3   : > { %4015 = vst [vmem:[%s6971_s26 + $0x8] sm:$0xff] %v3826_v2 }
 0x4b7   : > { %v4715_v3 = vpop.f32.mrb[4].mxu1 }
 0x4b8   : > { %4020 = vst [vmem:[%s6971_s26 + $0x30] sm:$0xff] %v4715_v3  ;;  %v3839_v31 = vpop.f32.mrb[5].mxu1 }
 0x4b9   : > { %4018 = vst [vmem:[%s6971_s26 + $0x20] sm:$0xff] %v3839_v31  ;;  %v4716_v4 = vpop.f32.mrb[6].mxu1 }
 0x4ba   : > { %4021 = vst [vmem:[%s6971_s26 + $0x38] sm:$0xff] %v4716_v4  ;;  %v3842_v41 = vpop.f32.mrb[7].mxu1 }
 0x4bb   : > { %4019 = vst [vmem:[%s6971_s26 + $0x28] sm:$0xff] %v3842_v41 }
 0x4bf   : > { %v4719_v29 = vpop.f32.mrb[8].mxu1 }
 0x4c0   : > { %4024 = vst [vmem:[%s6971_s26 + $0x50] sm:$0xff] %v4719_v29  ;;  %v3855_v1 = vpop.f32.mrb[9].mxu1 }
 0x4c1   : > { %4022 = vst [vmem:[%s6971_s26 + $0x40] sm:$0xff] %v3855_v1  ;;  %v4720_v43 = vpop.f32.mrb[10].mxu1 }
 0x4c2   : > { %4025 = vst [vmem:[%s6971_s26 + $0x58] sm:$0xff] %v4720_v43  ;;  %v3858_v19 = vpop.f32.mrb[11].mxu1 }
 0x4c3   : > { %4023 = vst [vmem:[%s6971_s26 + $0x48] sm:$0xff] %v3858_v19 }
 0x4c7   : > { %v4723_v16 = vpop.f32.mrb[12].mxu1 }
 0x4c8   : > { %4028 = vst [vmem:[%s6971_s26 + $0x70] sm:$0xff] %v4723_v16  ;;  %v3871_v26 = vpop.f32.mrb[13].mxu1 }
 0x4c9   : > { %4026 = vst [vmem:[%s6971_s26 + $0x60] sm:$0xff] %v3871_v26  ;;  %v4724_v63 = vpop.f32.mrb[14].mxu1 }
 0x4ca   : > { %4029 = vst [vmem:[%s6971_s26 + $0x78] sm:$0xff] %v4724_v63  ;;  %v3874_v50 = vpop.f32.mrb[15].mxu1 }
 0x4cb   : > { %4027 = vst [vmem:[%s6971_s26 + $0x68] sm:$0xff] %v3874_v50 }
 0x4cf   : > { %v4727_v27 = vpop.f32.mrb[16].mxu1 }
 0x4d0   : > { %4032 = vst [vmem:[%s6971_s26 + $0x90] sm:$0xff] %v4727_v27  ;;  %v3887_v33 = vpop.f32.mrb[17].mxu1 }
 0x4d1   : > { %4030 = vst [vmem:[%s6971_s26 + $0x80] sm:$0xff] %v3887_v33  ;;  %v4728_v8 = vpop.f32.mrb[18].mxu1 }
 0x4d2   : > { %4033 = vst [vmem:[%s6971_s26 + $0x98] sm:$0xff] %v4728_v8  ;;  %v3890_v6 = vpop.f32.mrb[19].mxu1 }
 0x4d3   : > { %4031 = vst [vmem:[%s6971_s26 + $0x88] sm:$0xff] %v3890_v6 }
 0x4d7   : > { %v4731_v32 = vpop.f32.mrb[20].mxu1 }
 0x4d8   : > { %4036 = vst [vmem:[%s6971_s26 + $0xb0] sm:$0xff] %v4731_v32  ;;  %v3903_v0 = vpop.f32.mrb[21].mxu1 }
 0x4d9   : > { %4034 = vst [vmem:[%s6971_s26 + $0xa0] sm:$0xff] %v3903_v0  ;;  %v4732_v57 = vpop.f32.mrb[22].mxu1 }
 0x4da   : > { %4037 = vst [vmem:[%s6971_s26 + $0xb8] sm:$0xff] %v4732_v57  ;;  %v3906_v55 = vpop.f32.mrb[23].mxu1 }
 0x4db   : > { %4035 = vst [vmem:[%s6971_s26 + $0xa8] sm:$0xff] %v3906_v55 }
 0x4e0   : > { %v4735_v58 = vpop.f32.mrb[24].mxu1 }
 0x4e1   : > { %4040 = vst [vmem:[%s6971_s26 + $0xd0] sm:$0xff] %v4735_v58  ;;  %v3919_v23 = vpop.f32.mrb[25].mxu1 }
 0x4e2   : > { %4038 = vst [vmem:[%s6971_s26 + $0xc0] sm:$0xff] %v3919_v23  ;;  %v4736_v42 = vpop.f32.mrb[26].mxu1 }
 0x4e3   : > { %4041 = vst [vmem:[%s6971_s26 + $0xd8] sm:$0xff] %v4736_v42  ;;  %v3922_v13 = vpop.f32.mrb[27].mxu1 }
 0x4e4   : > { %4039 = vst [vmem:[%s6971_s26 + $0xc8] sm:$0xff] %v3922_v13 }
 0x4e8   : > { %v4739_v39 = vpop.f32.mrb[28].mxu1 }
 0x4e9   : > { %4044 = vst [vmem:[%s6971_s26 + $0xf0] sm:$0xff] %v4739_v39  ;;  %v3935_v60 = vpop.f32.mrb[29].mxu1 }
 0x4ea   : > { %4042 = vst [vmem:[%s6971_s26 + $0xe0] sm:$0xff] %v3935_v60  ;;  %v4740_v52 = vpop.f32.mrb[30].mxu1 }
 0x4eb   : > { %4045 = vst [vmem:[%s6971_s26 + $0xf8] sm:$0xff] %v4740_v52  ;;  %v3938_v47 = vpop.f32.mrb[31].mxu1 }
 0x4ec   : > { %4043 = vst [vmem:[%s6971_s26 + $0xe8] sm:$0xff] %v3938_v47 }
 0x4ed   : > { %5204 = shalt.err (!%p5201_p11)
}
 0x4ee   : > { %s5205_s23 = scalar_lea.hbm %s7007_s25, 4096  ;;  %s5209_s26 = scalar_lea.hbm %s7065_s9, 8192 }
 0x4ef   : > { %p5206_p12 = scmp.ne.s32.totalorder %s7007_s25, %s5205_s23  ;;  %p5210_p7 = scmp.lt.u32.totalorder %s7007_s25, %s7065_s9 }
 0x4f0   : > { %p5211_p6 = scmp.lt.u32.totalorder %s5209_s26, %s5205_s23  ;;  %p5213_p4 = scmp.lt.u32.totalorder %s5205_s23, %s7007_s25 }
 0x4f1   : > { %p5207_p3 = pnand %p5206_p12, %p7091_p1 }
 0x4f2   : > { %p5212_p9 = por %p5211_p6, %p5210_p7 }
 0x4f3   : > { %p5208_p5 = pneg %p5207_p3 }
 0x4f4   : > { %p5214_p13 = por %p5213_p4, %p5212_p9 }
 0x4f6   : > { %p5215_p0 = pnand %p5214_p13, %p5208_p5 }
 0x4f8   : > { %5218 = shalt.err (!%p5215_p0)
}
 0x4f9   : > { %s5292_s22 = smov 128   ;;  %s5293_s24 = smov 8  }
 0x4fa   : > { %4807 = dma.vmem_to_hbm [thread:$0]  (%p7091_p1), %s7009_s19, 4096, %s7007_s25, %s4047_s15, %s5292_s22, %s5292_s22, %s5293_s24  }
 0x4fb PF: > { %s4075_s14 = sand.u32 1, %s5261_s30   ;;  %p7092_p2 = scmp.ne.s32.totalorder %s7080_s18, 0 }
 0x4fc   : > { %p7093_p8 = scmp.ge.s32.totalorder %s5273_s12, 2  ;;  %s4076_s28 = scalar_lea.sflag [#allocation6], %s4075_s14 }
 0x4fe   : > { %p4839_p10 = pnand %p7093_p8, %p7092_p2 }
 0x500   : > { %5256 = dma.done.wait (!%p4839_p10), %s4076_s28, 4096  }
 0x501   : > { %5258 = vsyncadd (!%p4839_p10), %s4076_s28, 4294963200  ;;  %p26_p11 = scmp.ge.s32.totalorder %s5569_s27, 4   ;;  %s7094_s30 = smov %s5265_s10 }
 0x502   : > { %s7095_s10 = smov %s5269_s11  ;;  %s7096_s11 = smov %s5580_s13 }
 0x503   : > { %s7097_s12 = smov %s5569_s27  ;;  %28 = sbr.rel (!%p26_p11) target bundleno = 12 (0xc), region = 137 }
 0x50a   :  { %4081 = vsyncpa [#allocation5], 1 }
 0x50b   :  { %4083 = vsyncpa [#allocation5 + $0x1], 1 }
 0x50c   :  { %4084 = vsyncpa [#allocation8], 1 }
 0x50d   :  { %4085 = vsyncpa [#allocation11], 1 }
 0x50e   :  { %4086 = vsyncpa [#allocation14], 1 }
 0x50f   :  { %4087 = vsyncpa [#allocation17], 1 }
 0x510   :  { %4088 = vsyncpa [#allocation6], 1 }
 0x511   :  { %4090 = vsyncpa [#allocation6 + $0x1], 1 }

</bundles_post_ra>
